<compile_context>
chip_gen: v5e
topology: v5e:2x2
jax: 0.10.0
libtpu: 0.0.40
codegen_flags: <defaults>
</compile_context>

<pallas_src>
import math

import jax
import jax.numpy as jnp
from jax import lax
from jax.experimental import pallas as pl
from jax.experimental.pallas import tpu as pltpu

D_MODEL = 32
N_HEADS = 4
HEAD_DIM = D_MODEL // N_HEADS
HIDDEN = 2 * D_MODEL          # GRU hidden size per direction (= 64)
GRU_OUT = 2 * HIDDEN          # bidirectional concat (= 128)
GATE = 2 * HIDDEN             # one gate slab [fwd | rev] (= 128 lanes)
EPS = 1e-5                    # nn.LayerNorm default eps
NEG_SLOPE = 0.01              # F.leaky_relu default negative_slope

# rows of the packed "vec" slab (16, D_MODEL)
_LN1Q_G, _LN1Q_B, _LN1KV_G, _LN1KV_B = 0, 1, 2, 3
_LN2_G, _LN2_B, _LN3_G, _LN3_B = 4, 5, 6, 7
_BQ, _BK, _BV, _BO, _BLIN = 8, 9, 10, 11, 12


# ---------------------------------------------------------------------------
# Single fused kernel, whole batch per invocation.
# Query-side tensors are TIME-major: row r = t*B + b.
# ---------------------------------------------------------------------------
def _make_kernel(B, S, Skv):
    def kernel(x_ref, kv_ref, mask_ref, vec_ref, attnw_ref,
               gruw_ref, grub_ref, wlin_ref, out_ref):
        x = x_ref[...]            # (B*S, D)  time-major
        kv = kv_ref[...]          # (B*Skv, D) batch-major
        vec = vec_ref[...]        # (16, D) packed LN params / biases

        def ln(t, gi, bi):
            mu = jnp.mean(t, axis=-1, keepdims=True)
            tc = t - mu
            var = jnp.mean(tc * tc, axis=-1, keepdims=True)
            return tc * lax.rsqrt(var + EPS) * vec[gi:gi + 1, :] + vec[bi:bi + 1, :]

        # ---- norm1 + multi-head cross attention (fused projections) -------
        qt = ln(x, _LN1Q_G, _LN1Q_B)
        kvt = ln(kv, _LN1KV_G, _LN1KV_B)

        aw = attnw_ref[...]                                   # (D, 4D) = [Wq|Wk|Wv|Wo]
        q_all = (jnp.dot(qt, aw[:, 0:D_MODEL],
                         preferred_element_type=jnp.float32)
                 + vec[_BQ:_BQ + 1, :])                       # (B*S, D)
        bkv = jnp.concatenate([vec[_BK:_BK + 1, :], vec[_BV:_BV + 1, :]], axis=1)
        kv_all = (jnp.dot(kvt, aw[:, D_MODEL:3 * D_MODEL],
                          preferred_element_type=jnp.float32)
                  + bkv)                                      # (B*Skv, 2D) = [K|V]

        mask = mask_ref[...]                                  # (B*S, B*Skv) additive
        scale = 1.0 / math.sqrt(HEAD_DIM)
        o_heads = []
        for h in range(N_HEADS):                              # static, unrolled
            lo = h * HEAD_DIM
            qh = q_all[:, lo:lo + HEAD_DIM]
            kh = kv_all[:, lo:lo + HEAD_DIM]
            vh = kv_all[:, D_MODEL + lo:D_MODEL + lo + HEAD_DIM]
            s = jnp.dot(qh, kh.T, preferred_element_type=jnp.float32) * scale + mask
            s = s - jnp.max(s, axis=-1, keepdims=True)
            p = jnp.exp(s)
            p = p * pl.reciprocal(jnp.sum(p, axis=-1, keepdims=True), approx=False)
            o_heads.append(jnp.dot(p, vh, preferred_element_type=jnp.float32))
        o = jnp.concatenate(o_heads, axis=1)                  # (B*S, D)
        attn = (jnp.dot(o, aw[:, 3 * D_MODEL:4 * D_MODEL],
                        preferred_element_type=jnp.float32)
                + vec[_BO:_BO + 1, :])

        x1 = x + attn
        xt2 = ln(x1, _LN2_G, _LN2_B)

        # ---- bidirectional GRU: batch folded, both directions in one state -
        # hidden state h = [h_fwd (64 lanes) | h_rev (64 lanes)] per batch row.
        # gate-major columns: [0:128)=r, [128:256)=z, [256:384)=n, each 128-wide
        # block = [fwd | rev]; whh is block-diagonal per direction.
        wih = gruw_ref[0:D_MODEL, :]                          # (D, 3*GATE)
        whh = gruw_ref[D_MODEL:D_MODEL + GATE, :]             # (GATE, 3*GATE)
        bih = grub_ref[0:1, :]                                # (1, 3*GATE)
        bhh = grub_ref[1:2, :]                                # (1, 3*GATE)
        fwd_lane = grub_ref[2:3, :] > 0.5                     # (1, 3*GATE) fwd-lane mask

        # one dense input projection; row block t holds both directions' gate
        # inputs for time t (fwd lanes + rev lanes).
        xg = jnp.dot(xt2, wih, preferred_element_type=jnp.float32) + bih

        hcur = jnp.zeros((B, GATE), jnp.float32)
        h_rows = []
        for t in range(S):                                    # static, fully unrolled
            # forward half reads time t, reverse half reads time S-1-t
            g = jnp.where(fwd_lane,
                          xg[t * B:(t + 1) * B, :],
                          xg[(S - 1 - t) * B:(S - t) * B, :])
            hg = jnp.dot(hcur, whh, preferred_element_type=jnp.float32) + bhh
            rz = jax.nn.sigmoid(g[:, 0:2 * GATE] + hg[:, 0:2 * GATE])   # fused r|z
            n = jnp.tanh(g[:, 2 * GATE:] + rz[:, 0:GATE] * hg[:, 2 * GATE:])
            z = rz[:, GATE:2 * GATE]
            hcur = (1.0 - z) * n + z * hcur
            h_rows.append(hcur)
        # time block t of the linear operand = [h(t) | h(S-1-t)]:
        #   lanes [0:64)   = h_fwd(t)        (used)
        #   lanes [192:256)= h_rev(t)        (used)
        # the other lanes hit zero rows of the stacked output weight.
        hs = jnp.concatenate(
            [jnp.concatenate([h_rows[t], h_rows[S - 1 - t]], axis=1)
             for t in range(S)], axis=0)                      # (B*S, 2*GRU_OUT)

        # ---- leaky_relu + Linear(128->32) + residual + norm3 ---------------
        a = jnp.where(hs >= 0, hs, NEG_SLOPE * hs)
        y = (jnp.dot(a, wlin_ref[...], preferred_element_type=jnp.float32)
             + vec[_BLIN:_BLIN + 1, :])

        x2 = x1 + y
        out_ref[...] = ln(x2, _LN3_G, _LN3_B)

    return kernel


# ---------------------------------------------------------------------------
# Parameter packing / re-layout (pure JAX, runs inside jit, tiny).
# ---------------------------------------------------------------------------
def _prepare(p):
    D, H = D_MODEL, HIDDEN
    f32 = jnp.float32
    zrow = jnp.zeros((1, D), f32)

    # (16, D) slab: LN gains/biases, attention biases, blin, padding rows
    vec = jnp.concatenate(
        [p['ln1q_g'], p['ln1q_b'], p['ln1kv_g'], p['ln1kv_b'],
         p['ln2_g'], p['ln2_b'], p['ln3_g'], p['ln3_b'],
         p['bq'], p['bk'], p['bv'], p['bo'], p['blin'],
         zrow, zrow, zrow], axis=0)

    # (D, 4D) slab: [Wq | Wk | Wv | Wo]
    attn_w = jnp.concatenate([p['wq'], p['wk'], p['wv'], p['wo']], axis=1)

    # gate-major [r_f r_r z_f z_r n_f n_r] column layout
    def gate_major(f, r):
        return jnp.concatenate(
            [jnp.concatenate([f[:, gi * H:(gi + 1) * H],
                              r[:, gi * H:(gi + 1) * H]], axis=1)
             for gi in range(3)], axis=1)

    wih = gate_major(p['gru_wih_f'], p['gru_wih_r'])          # (D, 3*GATE)
    bih = gate_major(p['gru_bih_f'], p['gru_bih_r'])          # (1, 3*GATE)
    bhh = gate_major(p['gru_bhh_f'], p['gru_bhh_r'])          # (1, 3*GATE)

    # block-diagonal hidden-hidden weights (GATE, 3*GATE)
    zH = jnp.zeros((H, H), f32)
    whh = jnp.concatenate(
        [jnp.concatenate(
            [jnp.concatenate([p['gru_whh_f'][:, gi * H:(gi + 1) * H], zH], axis=1),
             jnp.concatenate([zH, p['gru_whh_r'][:, gi * H:(gi + 1) * H]], axis=1)],
            axis=0)
         for gi in range(3)], axis=1)

    gru_w = jnp.concatenate([wih, whh], axis=0)               # (D+GATE, 3*GATE)

    # forward-lane indicator row (1 in fwd lanes, 0 in rev lanes of each gate)
    fwd_ind = jnp.concatenate(
        [jnp.concatenate([jnp.ones((1, H), f32), jnp.zeros((1, H), f32)], axis=1)
         for _ in range(3)], axis=1)                          # (1, 3*GATE)
    gru_b = jnp.concatenate([bih, bhh, fwd_ind], axis=0)      # (3, 3*GATE)

    # output Linear stacked for the [h(t) | h(S-1-t)] lane-concat operand:
    # rows [0:64) = Wlin forward rows, rows [192:256) = Wlin reverse rows.
    zL = jnp.zeros((H, D), f32)
    wlin = jnp.concatenate([p['wlin'][:H], zL, zL, p['wlin'][H:]], axis=0)  # (4H, D)

    return vec, attn_w, gru_w, gru_b, wlin


@jax.jit
def cross_attention_forward(x, kv, params):
    B, S, D = x.shape
    Skv = kv.shape[1]
    QB, KB = B * S, B * Skv

    vec, attn_w, gru_w, gru_b, wlin = _prepare(params)

    # queries TIME-major (row t*B+b) so GRU steps read contiguous row blocks;
    # keys/values stay batch-major (row b*Skv+s).
    x_tm = jnp.transpose(x, (1, 0, 2)).reshape(QB, D)
    kv_flat = kv.reshape(KB, D)

    # additive mask keeping the folded (QB, KB) score matrix block-diagonal
    q_batch = jnp.tile(jnp.arange(B, dtype=jnp.int32), S)          # query row -> batch
    k_batch = jnp.repeat(jnp.arange(B, dtype=jnp.int32), Skv)      # key  col -> batch
    attn_mask = jnp.where(q_batch[:, None] == k_batch[None, :],
                          0.0, -1e30).astype(jnp.float32)

    args = (x_tm, kv_flat, attn_mask, vec, attn_w, gru_w, gru_b, wlin)
    in_specs = [pl.BlockSpec(a.shape, lambda i, _n=a.ndim: (0,) * _n) for a in args]

    out_tm = pl.pallas_call(
        _make_kernel(B, S, Skv),
        grid=(1,),
        in_specs=in_specs,
        out_specs=pl.BlockSpec((QB, D), lambda i: (0, 0)),
        out_shape=jax.ShapeDtypeStruct((QB, D), jnp.float32),
        compiler_params=pltpu.CompilerParams(dimension_semantics=("arbitrary",)),
    )(*args)
    return jnp.transpose(out_tm.reshape(S, B, D), (1, 0, 2))


# ---------------------------------------------------------------------------
# Deterministic parameter init (shapes from CrossAttention.__init__)
# ---------------------------------------------------------------------------
def init_params(key):
    ks = jax.random.split(key, 28)
    it = iter(ks)

    def nrm(shape, scale=0.1):
        return scale * jax.random.normal(next(it), shape, jnp.float32)

    D, H = D_MODEL, HIDDEN
    p = {}
    for name in ('ln1q', 'ln1kv', 'ln2', 'ln3'):
        p[f'{name}_g'] = 1.0 + nrm((1, D))
        p[f'{name}_b'] = nrm((1, D))
    # MultiheadAttention: in_proj split into q/k/v, out_proj (pre-transposed)
    p['wq'], p['wk'], p['wv'] = nrm((D, D)), nrm((D, D)), nrm((D, D))
    p['bq'], p['bk'], p['bv'] = nrm((1, D)), nrm((1, D)), nrm((1, D))
    p['wo'], p['bo'] = nrm((D, D)), nrm((1, D))
    # FFN: bidirectional GRU (hidden = 2*d_model) + Linear(4*d_model -> d_model)
    for d in ('f', 'r'):
        p[f'gru_wih_{d}'] = nrm((D, 3 * H))
        p[f'gru_whh_{d}'] = nrm((H, 3 * H))
        p[f'gru_bih_{d}'] = nrm((1, 3 * H))
        p[f'gru_bhh_{d}'] = nrm((1, 3 * H))
    p['wlin'], p['blin'] = nrm((GRU_OUT, D)), nrm((1, D))
    return p


# ---------------------------------------------------------------------------
# Pure-JAX reference (same math, used only for a correctness check)
# ---------------------------------------------------------------------------
def reference(x, kv, p):
    def ln(t, g, b):
        mu = t.mean(-1, keepdims=True)
        var = ((t - mu) ** 2).mean(-1, keepdims=True)
        return (t - mu) / jnp.sqrt(var + EPS) * g + b

    B, S, D = x.shape
    Skv = kv.shape[1]
    qt = ln(x, p['ln1q_g'], p['ln1q_b'])
    kvt = ln(kv, p['ln1kv_g'], p['ln1kv_b'])
    q = qt @ p['wq'] + p['bq']
    k = kvt @ p['wk'] + p['bk']
    v = kvt @ p['wv'] + p['bv']
    qh = q.reshape(B, S, N_HEADS, HEAD_DIM)
    kh = k.reshape(B, Skv, N_HEADS, HEAD_DIM)
    vh = v.reshape(B, Skv, N_HEADS, HEAD_DIM)
    s = jnp.einsum('bqhd,bkhd->bhqk', qh, kh) / math.sqrt(HEAD_DIM)
    pr = jax.nn.softmax(s, axis=-1)
    o = jnp.einsum('bhqk,bkhd->bqhd', pr, vh).reshape(B, S, D)
    x1 = x + (o @ p['wo'] + p['bo'])
    xt2 = ln(x1, p['ln2_g'], p['ln2_b'])

    def gru_dir(xs, wih, whh, bih, bhh, reverse):
        H2 = HIDDEN
        xg = xs @ wih + bih
        if reverse:
            xg = xg[:, ::-1, :]

        def step(h, g):
            hg = h @ whh + bhh
            r = jax.nn.sigmoid(g[:, :H2] + hg[:, :H2])
            z = jax.nn.sigmoid(g[:, H2:2 * H2] + hg[:, H2:2 * H2])
            n = jnp.tanh(g[:, 2 * H2:] + r * hg[:, 2 * H2:])
            h_new = (1.0 - z) * n + z * h
            return h_new, h_new

        h0 = jnp.zeros((xs.shape[0], H2), jnp.float32)
        _, hs = lax.scan(step, h0, jnp.swapaxes(xg, 0, 1))
        hs = jnp.swapaxes(hs, 0, 1)
        return hs[:, ::-1, :] if reverse else hs

    hf = gru_dir(xt2, p['gru_wih_f'], p['gru_whh_f'], p['gru_bih_f'], p['gru_bhh_f'], False)
    hr = gru_dir(xt2, p['gru_wih_r'], p['gru_whh_r'], p['gru_bih_r'], p['gru_bhh_r'], True)
    g = jnp.concatenate([hf, hr], axis=-1)
    a = jnp.where(g >= 0, g, NEG_SLOPE * g)
    x2 = x1 + (a @ p['wlin'] + p['blin'])
    return ln(x2, p['ln3_g'], p['ln3_b'])


if __name__ == "__main__":
    key = jax.random.PRNGKey(0)
    kx, kkv, kp = jax.random.split(key, 3)

    B, S, SKV = 2, 8, 16
    x = 0.5 * jax.random.normal(kx, (B, S, D_MODEL), jnp.float32)
    kv = 0.5 * jax.random.normal(kkv, (B, SKV, D_MODEL), jnp.float32)
    params = init_params(kp)

    out = cross_attention_forward(x, kv, params)
    out = jax.block_until_ready(out)

    ref = reference(x, kv, params)
    err = float(jnp.max(jnp.abs(out - ref)))
    assert out.shape == (B, S, D_MODEL), out.shape
    assert err < 2e-3, f"mismatch vs reference: max abs err = {err}"
    print("KERNEL_OK")
</pallas_src>

<mosaic_0001>
module attributes {stable_mosaic.version = 11 : i64} {
  func.func @kernel(%arg0: i32, %arg1: memref<16x32xf32, #tpu.memory_space<vmem>>, %arg2: memref<32x32xf32, #tpu.memory_space<vmem>>, %arg3: memref<16x32xf32, #tpu.memory_space<vmem>>, %arg4: memref<16x32xf32, #tpu.memory_space<vmem>>, %arg5: memref<32x128xf32, #tpu.memory_space<vmem>>, %arg6: memref<160x384xf32, #tpu.memory_space<vmem>>, %arg7: memref<3x384xf32, #tpu.memory_space<vmem>>, %arg8: memref<256x32xf32, #tpu.memory_space<vmem>>, %arg9: memref<16x32xf32, #tpu.memory_space<vmem>>) attributes {dimension_semantics = [#tpu.dimension_semantics<arbitrary>], iteration_bounds = array<i64: 1>, scalar_prefetch = 0 : i64, scratch_operands = 0 : i64, tpu.core_type = #tpu.core_type<tc>, window_params = [{pipeline_mode = #tpu.pipeline_mode<synchronous>, transform_indices = @transform_0, window_bounds = array<i64: 16, 32>}, {pipeline_mode = #tpu.pipeline_mode<synchronous>, transform_indices = @transform_1, window_bounds = array<i64: 32, 32>}, {pipeline_mode = #tpu.pipeline_mode<synchronous>, transform_indices = @transform_2, window_bounds = array<i64: 16, 32>}, {pipeline_mode = #tpu.pipeline_mode<synchronous>, transform_indices = @transform_3, window_bounds = array<i64: 16, 32>}, {pipeline_mode = #tpu.pipeline_mode<synchronous>, transform_indices = @transform_4, window_bounds = array<i64: 32, 128>}, {pipeline_mode = #tpu.pipeline_mode<synchronous>, transform_indices = @transform_5, window_bounds = array<i64: 160, 384>}, {pipeline_mode = #tpu.pipeline_mode<synchronous>, transform_indices = @transform_6, window_bounds = array<i64: 3, 384>}, {pipeline_mode = #tpu.pipeline_mode<synchronous>, transform_indices = @transform_7, window_bounds = array<i64: 256, 32>}, {pipeline_mode = #tpu.pipeline_mode<synchronous>, transform_indices = @transform_8, window_bounds = array<i64: 16, 32>}]} {
    %c0 = arith.constant 0 : index
    %c0_0 = arith.constant 0 : index
    %0 = vector.load %arg1[%c0, %c0_0] : memref<16x32xf32, #tpu.memory_space<vmem>>, vector<16x32xf32>
    %c0_1 = arith.constant 0 : index
    %c0_2 = arith.constant 0 : index
    %1 = vector.load %arg2[%c0_1, %c0_2] : memref<32x32xf32, #tpu.memory_space<vmem>>, vector<32x32xf32>
    %c0_3 = arith.constant 0 : index
    %c0_4 = arith.constant 0 : index
    %2 = vector.load %arg4[%c0_3, %c0_4] : memref<16x32xf32, #tpu.memory_space<vmem>>, vector<16x32xf32>
    %cst = arith.constant dense<0.000000e+00> : vector<16xf32>
    %3 = vector.multi_reduction <add>, %0, %cst [1] : vector<16x32xf32> to vector<16xf32>
    %4 = vector.shape_cast %3 : vector<16xf32> to vector<16x1xf32>
    %cst_5 = arith.constant 3.200000e+01 : f32
    %5 = vector.broadcast %cst_5 : f32 to vector<16x1xf32>
    %6 = arith.divf %4, %5 : vector<16x1xf32>
    %7 = vector.broadcast %6 : vector<16x1xf32> to vector<16x32xf32>
    %8 = arith.subf %0, %7 : vector<16x32xf32>
    %9 = arith.mulf %8, %8 : vector<16x32xf32>
    %cst_6 = arith.constant dense<0.000000e+00> : vector<16xf32>
    %10 = vector.multi_reduction <add>, %9, %cst_6 [1] : vector<16x32xf32> to vector<16xf32>
    %11 = vector.shape_cast %10 : vector<16xf32> to vector<16x1xf32>
    %cst_7 = arith.constant 3.200000e+01 : f32
    %12 = vector.broadcast %cst_7 : f32 to vector<16x1xf32>
    %13 = arith.divf %11, %12 : vector<16x1xf32>
    %cst_8 = arith.constant 9.99999974E-6 : f32
    %14 = vector.broadcast %cst_8 : f32 to vector<16x1xf32>
    %15 = arith.addf %13, %14 : vector<16x1xf32>
    %16 = math.rsqrt %15 : vector<16x1xf32>
    %17 = vector.broadcast %16 : vector<16x1xf32> to vector<16x32xf32>
    %18 = arith.mulf %8, %17 : vector<16x32xf32>
    %19 = vector.extract_strided_slice %2 {offsets = [0, 0], sizes = [1, 32], strides = [1, 1]} : vector<16x32xf32> to vector<1x32xf32>
    %20 = vector.broadcast %19 : vector<1x32xf32> to vector<16x32xf32>
    %21 = arith.mulf %18, %20 : vector<16x32xf32>
    %22 = vector.extract_strided_slice %2 {offsets = [1, 0], sizes = [1, 32], strides = [1, 1]} : vector<16x32xf32> to vector<1x32xf32>
    %23 = vector.broadcast %22 : vector<1x32xf32> to vector<16x32xf32>
    %24 = arith.addf %21, %23 : vector<16x32xf32>
    %cst_9 = arith.constant dense<0.000000e+00> : vector<32xf32>
    %25 = vector.multi_reduction <add>, %1, %cst_9 [1] : vector<32x32xf32> to vector<32xf32>
    %26 = vector.shape_cast %25 : vector<32xf32> to vector<32x1xf32>
    %cst_10 = arith.constant 3.200000e+01 : f32
    %27 = vector.broadcast %cst_10 : f32 to vector<32x1xf32>
    %28 = arith.divf %26, %27 : vector<32x1xf32>
    %29 = vector.broadcast %28 : vector<32x1xf32> to vector<32x32xf32>
    %30 = arith.subf %1, %29 : vector<32x32xf32>
    %31 = arith.mulf %30, %30 : vector<32x32xf32>
    %cst_11 = arith.constant dense<0.000000e+00> : vector<32xf32>
    %32 = vector.multi_reduction <add>, %31, %cst_11 [1] : vector<32x32xf32> to vector<32xf32>
    %33 = vector.shape_cast %32 : vector<32xf32> to vector<32x1xf32>
    %cst_12 = arith.constant 3.200000e+01 : f32
    %34 = vector.broadcast %cst_12 : f32 to vector<32x1xf32>
    %35 = arith.divf %33, %34 : vector<32x1xf32>
    %cst_13 = arith.constant 9.99999974E-6 : f32
    %36 = vector.broadcast %cst_13 : f32 to vector<32x1xf32>
    %37 = arith.addf %35, %36 : vector<32x1xf32>
    %38 = math.rsqrt %37 : vector<32x1xf32>
    %39 = vector.broadcast %38 : vector<32x1xf32> to vector<32x32xf32>
    %40 = arith.mulf %30, %39 : vector<32x32xf32>
    %41 = vector.extract_strided_slice %2 {offsets = [2, 0], sizes = [1, 32], strides = [1, 1]} : vector<16x32xf32> to vector<1x32xf32>
    %42 = vector.broadcast %41 : vector<1x32xf32> to vector<32x32xf32>
    %43 = arith.mulf %40, %42 : vector<32x32xf32>
    %44 = vector.extract_strided_slice %2 {offsets = [3, 0], sizes = [1, 32], strides = [1, 1]} : vector<16x32xf32> to vector<1x32xf32>
    %45 = vector.broadcast %44 : vector<1x32xf32> to vector<32x32xf32>
    %46 = arith.addf %43, %45 : vector<32x32xf32>
    %c0_14 = arith.constant 0 : index
    %c0_15 = arith.constant 0 : index
    %47 = vector.load %arg5[%c0_14, %c0_15] : memref<32x128xf32, #tpu.memory_space<vmem>>, vector<32x128xf32>
    %48 = vector.extract_strided_slice %47 {offsets = [0, 0], sizes = [32, 32], strides = [1, 1]} : vector<32x128xf32> to vector<32x32xf32>
    %cst_16 = arith.constant dense<0.000000e+00> : vector<16x32xf32>
    %49 = tpu.matmul %24, %48, %cst_16 {dimension_numbers = #tpu.dot_dimension_numbers<[1], [0], [0], [1], [0, 0, 1, 1], [], []>} : vector<16x32xf32>, vector<32x32xf32>, vector<16x32xf32> -> vector<16x32xf32>
    %50 = vector.extract_strided_slice %2 {offsets = [8, 0], sizes = [1, 32], strides = [1, 1]} : vector<16x32xf32> to vector<1x32xf32>
    %51 = vector.broadcast %50 : vector<1x32xf32> to vector<16x32xf32>
    %52 = arith.addf %49, %51 : vector<16x32xf32>
    %53 = vector.extract_strided_slice %2 {offsets = [9, 0], sizes = [1, 32], strides = [1, 1]} : vector<16x32xf32> to vector<1x32xf32>
    %54 = vector.extract_strided_slice %2 {offsets = [10, 0], sizes = [1, 32], strides = [1, 1]} : vector<16x32xf32> to vector<1x32xf32>
    %55 = tpu.concatenate %53, %54 in 1 : vector<1x32xf32>, vector<1x32xf32> -> vector<1x64xf32>
    %56 = vector.extract_strided_slice %47 {offsets = [0, 32], sizes = [32, 64], strides = [1, 1]} : vector<32x128xf32> to vector<32x64xf32>
    %cst_17 = arith.constant dense<0.000000e+00> : vector<32x64xf32>
    %57 = tpu.matmul %46, %56, %cst_17 {dimension_numbers = #tpu.dot_dimension_numbers<[1], [0], [0], [1], [0, 0, 1, 1], [], []>} : vector<32x32xf32>, vector<32x64xf32>, vector<32x64xf32> -> vector<32x64xf32>
    %58 = vector.broadcast %55 : vector<1x64xf32> to vector<32x64xf32>
    %59 = arith.addf %57, %58 : vector<32x64xf32>
    %c0_18 = arith.constant 0 : index
    %c0_19 = arith.constant 0 : index
    %60 = vector.load %arg3[%c0_18, %c0_19] : memref<16x32xf32, #tpu.memory_space<vmem>>, vector<16x32xf32>
    %61 = vector.extract_strided_slice %52 {offsets = [0, 0], sizes = [16, 8], strides = [1, 1]} : vector<16x32xf32> to vector<16x8xf32>
    %62 = vector.extract_strided_slice %59 {offsets = [0, 0], sizes = [32, 8], strides = [1, 1]} : vector<32x64xf32> to vector<32x8xf32>
    %63 = vector.extract_strided_slice %59 {offsets = [0, 32], sizes = [32, 8], strides = [1, 1]} : vector<32x64xf32> to vector<32x8xf32>
    %64 = tpu.transpose %62, [1, 0] : vector<32x8xf32> -> vector<8x32xf32>
    %cst_20 = arith.constant dense<0.000000e+00> : vector<16x32xf32>
    %65 = tpu.matmul %61, %64, %cst_20 {dimension_numbers = #tpu.dot_dimension_numbers<[1], [0], [0], [1], [0, 0, 1, 1], [], []>} : vector<16x8xf32>, vector<8x32xf32>, vector<16x32xf32> -> vector<16x32xf32>
    %cst_21 = arith.constant 0.353553385 : f32
    %66 = vector.broadcast %cst_21 : f32 to vector<16x32xf32>
    %67 = arith.mulf %65, %66 : vector<16x32xf32>
    %68 = arith.addf %67, %60 : vector<16x32xf32>
    %cst_22 = arith.constant dense<0xFF800000> : vector<16xf32>
    %69 = vector.multi_reduction <maximumf>, %68, %cst_22 [1] : vector<16x32xf32> to vector<16xf32>
    %70 = vector.shape_cast %69 : vector<16xf32> to vector<16x1xf32>
    %71 = vector.broadcast %70 : vector<16x1xf32> to vector<16x32xf32>
    %72 = arith.subf %68, %71 : vector<16x32xf32>
    %73 = math.exp %72 : vector<16x32xf32>
    %cst_23 = arith.constant dense<0.000000e+00> : vector<16xf32>
    %74 = vector.multi_reduction <add>, %73, %cst_23 [1] : vector<16x32xf32> to vector<16xf32>
    %75 = vector.shape_cast %74 : vector<16xf32> to vector<16x1xf32>
    %76 = tpu.reciprocal %75 : vector<16x1xf32> -> vector<16x1xf32>
    %77 = vector.broadcast %76 : vector<16x1xf32> to vector<16x32xf32>
    %78 = arith.mulf %73, %77 : vector<16x32xf32>
    %cst_24 = arith.constant dense<0.000000e+00> : vector<16x8xf32>
    %79 = tpu.matmul %78, %63, %cst_24 {dimension_numbers = #tpu.dot_dimension_numbers<[1], [0], [0], [1], [0, 0, 1, 1], [], []>} : vector<16x32xf32>, vector<32x8xf32>, vector<16x8xf32> -> vector<16x8xf32>
    %80 = vector.extract_strided_slice %52 {offsets = [0, 8], sizes = [16, 8], strides = [1, 1]} : vector<16x32xf32> to vector<16x8xf32>
    %81 = vector.extract_strided_slice %59 {offsets = [0, 8], sizes = [32, 8], strides = [1, 1]} : vector<32x64xf32> to vector<32x8xf32>
    %82 = vector.extract_strided_slice %59 {offsets = [0, 40], sizes = [32, 8], strides = [1, 1]} : vector<32x64xf32> to vector<32x8xf32>
    %83 = tpu.transpose %81, [1, 0] : vector<32x8xf32> -> vector<8x32xf32>
    %cst_25 = arith.constant dense<0.000000e+00> : vector<16x32xf32>
    %84 = tpu.matmul %80, %83, %cst_25 {dimension_numbers = #tpu.dot_dimension_numbers<[1], [0], [0], [1], [0, 0, 1, 1], [], []>} : vector<16x8xf32>, vector<8x32xf32>, vector<16x32xf32> -> vector<16x32xf32>
    %cst_26 = arith.constant 0.353553385 : f32
    %85 = vector.broadcast %cst_26 : f32 to vector<16x32xf32>
    %86 = arith.mulf %84, %85 : vector<16x32xf32>
    %87 = arith.addf %86, %60 : vector<16x32xf32>
    %cst_27 = arith.constant dense<0xFF800000> : vector<16xf32>
    %88 = vector.multi_reduction <maximumf>, %87, %cst_27 [1] : vector<16x32xf32> to vector<16xf32>
    %89 = vector.shape_cast %88 : vector<16xf32> to vector<16x1xf32>
    %90 = vector.broadcast %89 : vector<16x1xf32> to vector<16x32xf32>
    %91 = arith.subf %87, %90 : vector<16x32xf32>
    %92 = math.exp %91 : vector<16x32xf32>
    %cst_28 = arith.constant dense<0.000000e+00> : vector<16xf32>
    %93 = vector.multi_reduction <add>, %92, %cst_28 [1] : vector<16x32xf32> to vector<16xf32>
    %94 = vector.shape_cast %93 : vector<16xf32> to vector<16x1xf32>
    %95 = tpu.reciprocal %94 : vector<16x1xf32> -> vector<16x1xf32>
    %96 = vector.broadcast %95 : vector<16x1xf32> to vector<16x32xf32>
    %97 = arith.mulf %92, %96 : vector<16x32xf32>
    %cst_29 = arith.constant dense<0.000000e+00> : vector<16x8xf32>
    %98 = tpu.matmul %97, %82, %cst_29 {dimension_numbers = #tpu.dot_dimension_numbers<[1], [0], [0], [1], [0, 0, 1, 1], [], []>} : vector<16x32xf32>, vector<32x8xf32>, vector<16x8xf32> -> vector<16x8xf32>
    %99 = vector.extract_strided_slice %52 {offsets = [0, 16], sizes = [16, 8], strides = [1, 1]} : vector<16x32xf32> to vector<16x8xf32>
    %100 = vector.extract_strided_slice %59 {offsets = [0, 16], sizes = [32, 8], strides = [1, 1]} : vector<32x64xf32> to vector<32x8xf32>
    %101 = vector.extract_strided_slice %59 {offsets = [0, 48], sizes = [32, 8], strides = [1, 1]} : vector<32x64xf32> to vector<32x8xf32>
    %102 = tpu.transpose %100, [1, 0] : vector<32x8xf32> -> vector<8x32xf32>
    %cst_30 = arith.constant dense<0.000000e+00> : vector<16x32xf32>
    %103 = tpu.matmul %99, %102, %cst_30 {dimension_numbers = #tpu.dot_dimension_numbers<[1], [0], [0], [1], [0, 0, 1, 1], [], []>} : vector<16x8xf32>, vector<8x32xf32>, vector<16x32xf32> -> vector<16x32xf32>
    %cst_31 = arith.constant 0.353553385 : f32
    %104 = vector.broadcast %cst_31 : f32 to vector<16x32xf32>
    %105 = arith.mulf %103, %104 : vector<16x32xf32>
    %106 = arith.addf %105, %60 : vector<16x32xf32>
    %cst_32 = arith.constant dense<0xFF800000> : vector<16xf32>
    %107 = vector.multi_reduction <maximumf>, %106, %cst_32 [1] : vector<16x32xf32> to vector<16xf32>
    %108 = vector.shape_cast %107 : vector<16xf32> to vector<16x1xf32>
    %109 = vector.broadcast %108 : vector<16x1xf32> to vector<16x32xf32>
    %110 = arith.subf %106, %109 : vector<16x32xf32>
    %111 = math.exp %110 : vector<16x32xf32>
    %cst_33 = arith.constant dense<0.000000e+00> : vector<16xf32>
    %112 = vector.multi_reduction <add>, %111, %cst_33 [1] : vector<16x32xf32> to vector<16xf32>
    %113 = vector.shape_cast %112 : vector<16xf32> to vector<16x1xf32>
    %114 = tpu.reciprocal %113 : vector<16x1xf32> -> vector<16x1xf32>
    %115 = vector.broadcast %114 : vector<16x1xf32> to vector<16x32xf32>
    %116 = arith.mulf %111, %115 : vector<16x32xf32>
    %cst_34 = arith.constant dense<0.000000e+00> : vector<16x8xf32>
    %117 = tpu.matmul %116, %101, %cst_34 {dimension_numbers = #tpu.dot_dimension_numbers<[1], [0], [0], [1], [0, 0, 1, 1], [], []>} : vector<16x32xf32>, vector<32x8xf32>, vector<16x8xf32> -> vector<16x8xf32>
    %118 = vector.extract_strided_slice %52 {offsets = [0, 24], sizes = [16, 8], strides = [1, 1]} : vector<16x32xf32> to vector<16x8xf32>
    %119 = vector.extract_strided_slice %59 {offsets = [0, 24], sizes = [32, 8], strides = [1, 1]} : vector<32x64xf32> to vector<32x8xf32>
    %120 = vector.extract_strided_slice %59 {offsets = [0, 56], sizes = [32, 8], strides = [1, 1]} : vector<32x64xf32> to vector<32x8xf32>
    %121 = tpu.transpose %119, [1, 0] : vector<32x8xf32> -> vector<8x32xf32>
    %cst_35 = arith.constant dense<0.000000e+00> : vector<16x32xf32>
    %122 = tpu.matmul %118, %121, %cst_35 {dimension_numbers = #tpu.dot_dimension_numbers<[1], [0], [0], [1], [0, 0, 1, 1], [], []>} : vector<16x8xf32>, vector<8x32xf32>, vector<16x32xf32> -> vector<16x32xf32>
    %cst_36 = arith.constant 0.353553385 : f32
    %123 = vector.broadcast %cst_36 : f32 to vector<16x32xf32>
    %124 = arith.mulf %122, %123 : vector<16x32xf32>
    %125 = arith.addf %124, %60 : vector<16x32xf32>
    %cst_37 = arith.constant dense<0xFF800000> : vector<16xf32>
    %126 = vector.multi_reduction <maximumf>, %125, %cst_37 [1] : vector<16x32xf32> to vector<16xf32>
    %127 = vector.shape_cast %126 : vector<16xf32> to vector<16x1xf32>
    %128 = vector.broadcast %127 : vector<16x1xf32> to vector<16x32xf32>
    %129 = arith.subf %125, %128 : vector<16x32xf32>
    %130 = math.exp %129 : vector<16x32xf32>
    %cst_38 = arith.constant dense<0.000000e+00> : vector<16xf32>
    %131 = vector.multi_reduction <add>, %130, %cst_38 [1] : vector<16x32xf32> to vector<16xf32>
    %132 = vector.shape_cast %131 : vector<16xf32> to vector<16x1xf32>
    %133 = tpu.reciprocal %132 : vector<16x1xf32> -> vector<16x1xf32>
    %134 = vector.broadcast %133 : vector<16x1xf32> to vector<16x32xf32>
    %135 = arith.mulf %130, %134 : vector<16x32xf32>
    %cst_39 = arith.constant dense<0.000000e+00> : vector<16x8xf32>
    %136 = tpu.matmul %135, %120, %cst_39 {dimension_numbers = #tpu.dot_dimension_numbers<[1], [0], [0], [1], [0, 0, 1, 1], [], []>} : vector<16x32xf32>, vector<32x8xf32>, vector<16x8xf32> -> vector<16x8xf32>
    %137 = tpu.concatenate %79, %98, %117, %136 in 1 : vector<16x8xf32>, vector<16x8xf32>, vector<16x8xf32>, vector<16x8xf32> -> vector<16x32xf32>
    %138 = vector.extract_strided_slice %47 {offsets = [0, 96], sizes = [32, 32], strides = [1, 1]} : vector<32x128xf32> to vector<32x32xf32>
    %cst_40 = arith.constant dense<0.000000e+00> : vector<16x32xf32>
    %139 = tpu.matmul %137, %138, %cst_40 {dimension_numbers = #tpu.dot_dimension_numbers<[1], [0], [0], [1], [0, 0, 1, 1], [], []>} : vector<16x32xf32>, vector<32x32xf32>, vector<16x32xf32> -> vector<16x32xf32>
    %140 = vector.extract_strided_slice %2 {offsets = [11, 0], sizes = [1, 32], strides = [1, 1]} : vector<16x32xf32> to vector<1x32xf32>
    %141 = vector.broadcast %140 : vector<1x32xf32> to vector<16x32xf32>
    %142 = arith.addf %139, %141 : vector<16x32xf32>
    %143 = arith.addf %0, %142 : vector<16x32xf32>
    %cst_41 = arith.constant dense<0.000000e+00> : vector<16xf32>
    %144 = vector.multi_reduction <add>, %143, %cst_41 [1] : vector<16x32xf32> to vector<16xf32>
    %145 = vector.shape_cast %144 : vector<16xf32> to vector<16x1xf32>
    %cst_42 = arith.constant 3.200000e+01 : f32
    %146 = vector.broadcast %cst_42 : f32 to vector<16x1xf32>
    %147 = arith.divf %145, %146 : vector<16x1xf32>
    %148 = vector.broadcast %147 : vector<16x1xf32> to vector<16x32xf32>
    %149 = arith.subf %143, %148 : vector<16x32xf32>
    %150 = arith.mulf %149, %149 : vector<16x32xf32>
    %cst_43 = arith.constant dense<0.000000e+00> : vector<16xf32>
    %151 = vector.multi_reduction <add>, %150, %cst_43 [1] : vector<16x32xf32> to vector<16xf32>
    %152 = vector.shape_cast %151 : vector<16xf32> to vector<16x1xf32>
    %cst_44 = arith.constant 3.200000e+01 : f32
    %153 = vector.broadcast %cst_44 : f32 to vector<16x1xf32>
    %154 = arith.divf %152, %153 : vector<16x1xf32>
    %cst_45 = arith.constant 9.99999974E-6 : f32
    %155 = vector.broadcast %cst_45 : f32 to vector<16x1xf32>
    %156 = arith.addf %154, %155 : vector<16x1xf32>
    %157 = math.rsqrt %156 : vector<16x1xf32>
    %158 = vector.broadcast %157 : vector<16x1xf32> to vector<16x32xf32>
    %159 = arith.mulf %149, %158 : vector<16x32xf32>
    %160 = vector.extract_strided_slice %2 {offsets = [4, 0], sizes = [1, 32], strides = [1, 1]} : vector<16x32xf32> to vector<1x32xf32>
    %161 = vector.broadcast %160 : vector<1x32xf32> to vector<16x32xf32>
    %162 = arith.mulf %159, %161 : vector<16x32xf32>
    %163 = vector.extract_strided_slice %2 {offsets = [5, 0], sizes = [1, 32], strides = [1, 1]} : vector<16x32xf32> to vector<1x32xf32>
    %164 = vector.broadcast %163 : vector<1x32xf32> to vector<16x32xf32>
    %165 = arith.addf %162, %164 : vector<16x32xf32>
    %c0_46 = arith.constant 0 : index
    %c0_47 = arith.constant 0 : index
    %166 = vector.load %arg6[%c0_46, %c0_47] : memref<160x384xf32, #tpu.memory_space<vmem>>, vector<32x384xf32>
    %c32 = arith.constant 32 : index
    %c0_48 = arith.constant 0 : index
    %167 = vector.load %arg6[%c32, %c0_48] : memref<160x384xf32, #tpu.memory_space<vmem>>, vector<128x384xf32>
    %c0_49 = arith.constant 0 : index
    %c0_50 = arith.constant 0 : index
    %168 = vector.load %arg7[%c0_49, %c0_50] : memref<3x384xf32, #tpu.memory_space<vmem>>, vector<1x384xf32>
    %c1 = arith.constant 1 : index
    %c0_51 = arith.constant 0 : index
    %169 = vector.load %arg7[%c1, %c0_51] : memref<3x384xf32, #tpu.memory_space<vmem>>, vector<1x384xf32>
    %c2 = arith.constant 2 : index
    %c0_52 = arith.constant 0 : index
    %170 = vector.load %arg7[%c2, %c0_52] : memref<3x384xf32, #tpu.memory_space<vmem>>, vector<1x384xf32>
    %cst_53 = arith.constant 5.000000e-01 : f32
    %171 = vector.broadcast %cst_53 : f32 to vector<1x384xf32>
    %172 = arith.cmpf ogt, %170, %171 : vector<1x384xf32>
    %cst_54 = arith.constant dense<0.000000e+00> : vector<16x384xf32>
    %173 = tpu.matmul %165, %166, %cst_54 {dimension_numbers = #tpu.dot_dimension_numbers<[1], [0], [0], [1], [0, 0, 1, 1], [], []>} : vector<16x32xf32>, vector<32x384xf32>, vector<16x384xf32> -> vector<16x384xf32>
    %174 = vector.broadcast %168 : vector<1x384xf32> to vector<16x384xf32>
    %175 = arith.addf %173, %174 : vector<16x384xf32>
    %cst_55 = arith.constant 0.000000e+00 : f32
    %176 = vector.broadcast %cst_55 : f32 to vector<2x128xf32>
    %177 = vector.extract_strided_slice %175 {offsets = [0, 0], sizes = [2, 384], strides = [1, 1]} : vector<16x384xf32> to vector<2x384xf32>
    %178 = vector.extract_strided_slice %175 {offsets = [14, 0], sizes = [2, 384], strides = [1, 1]} : vector<16x384xf32> to vector<2x384xf32>
    %179 = vector.shape_cast %172 : vector<1x384xi1> to vector<1x384xi1>
    %180 = vector.broadcast %179 : vector<1x384xi1> to vector<2x384xi1>
    %181 = arith.select %180, %177, %178 : vector<2x384xi1>, vector<2x384xf32>
    %cst_56 = arith.constant dense<0.000000e+00> : vector<2x384xf32>
    %182 = tpu.matmul %176, %167, %cst_56 {dimension_numbers = #tpu.dot_dimension_numbers<[1], [0], [0], [1], [0, 0, 1, 1], [], []>} : vector<2x128xf32>, vector<128x384xf32>, vector<2x384xf32> -> vector<2x384xf32>
    %183 = vector.broadcast %169 : vector<1x384xf32> to vector<2x384xf32>
    %184 = arith.addf %182, %183 : vector<2x384xf32>
    %185 = vector.extract_strided_slice %181 {offsets = [0, 0], sizes = [2, 256], strides = [1, 1]} : vector<2x384xf32> to vector<2x256xf32>
    %186 = vector.extract_strided_slice %184 {offsets = [0, 0], sizes = [2, 256], strides = [1, 1]} : vector<2x384xf32> to vector<2x256xf32>
    %187 = arith.addf %185, %186 : vector<2x256xf32>
    %188 = arith.negf %187 : vector<2x256xf32>
    %189 = math.exp %188 : vector<2x256xf32>
    %cst_57 = arith.constant 1.000000e+00 : f32
    %190 = vector.broadcast %cst_57 : f32 to vector<2x256xf32>
    %191 = arith.addf %190, %189 : vector<2x256xf32>
    %192 = arith.divf %190, %191 : vector<2x256xf32>
    %193 = vector.extract_strided_slice %181 {offsets = [0, 256], sizes = [2, 128], strides = [1, 1]} : vector<2x384xf32> to vector<2x128xf32>
    %194 = vector.extract_strided_slice %192 {offsets = [0, 0], sizes = [2, 128], strides = [1, 1]} : vector<2x256xf32> to vector<2x128xf32>
    %195 = vector.extract_strided_slice %184 {offsets = [0, 256], sizes = [2, 128], strides = [1, 1]} : vector<2x384xf32> to vector<2x128xf32>
    %196 = arith.mulf %194, %195 : vector<2x128xf32>
    %197 = arith.addf %193, %196 : vector<2x128xf32>
    %198 = math.tanh %197 : vector<2x128xf32>
    %199 = vector.extract_strided_slice %192 {offsets = [0, 128], sizes = [2, 128], strides = [1, 1]} : vector<2x256xf32> to vector<2x128xf32>
    %cst_58 = arith.constant 1.000000e+00 : f32
    %200 = vector.broadcast %cst_58 : f32 to vector<2x128xf32>
    %201 = arith.subf %200, %199 : vector<2x128xf32>
    %202 = arith.mulf %201, %198 : vector<2x128xf32>
    %203 = arith.mulf %199, %176 : vector<2x128xf32>
    %204 = arith.addf %202, %203 : vector<2x128xf32>
    %205 = vector.extract_strided_slice %175 {offsets = [2, 0], sizes = [2, 384], strides = [1, 1]} : vector<16x384xf32> to vector<2x384xf32>
    %206 = vector.extract_strided_slice %175 {offsets = [12, 0], sizes = [2, 384], strides = [1, 1]} : vector<16x384xf32> to vector<2x384xf32>
    %207 = vector.shape_cast %172 : vector<1x384xi1> to vector<1x384xi1>
    %208 = vector.broadcast %207 : vector<1x384xi1> to vector<2x384xi1>
    %209 = arith.select %208, %205, %206 : vector<2x384xi1>, vector<2x384xf32>
    %cst_59 = arith.constant dense<0.000000e+00> : vector<2x384xf32>
    %210 = tpu.matmul %204, %167, %cst_59 {dimension_numbers = #tpu.dot_dimension_numbers<[1], [0], [0], [1], [0, 0, 1, 1], [], []>} : vector<2x128xf32>, vector<128x384xf32>, vector<2x384xf32> -> vector<2x384xf32>
    %211 = vector.broadcast %169 : vector<1x384xf32> to vector<2x384xf32>
    %212 = arith.addf %210, %211 : vector<2x384xf32>
    %213 = vector.extract_strided_slice %209 {offsets = [0, 0], sizes = [2, 256], strides = [1, 1]} : vector<2x384xf32> to vector<2x256xf32>
    %214 = vector.extract_strided_slice %212 {offsets = [0, 0], sizes = [2, 256], strides = [1, 1]} : vector<2x384xf32> to vector<2x256xf32>
    %215 = arith.addf %213, %214 : vector<2x256xf32>
    %216 = arith.negf %215 : vector<2x256xf32>
    %217 = math.exp %216 : vector<2x256xf32>
    %cst_60 = arith.constant 1.000000e+00 : f32
    %218 = vector.broadcast %cst_60 : f32 to vector<2x256xf32>
    %219 = arith.addf %218, %217 : vector<2x256xf32>
    %220 = arith.divf %218, %219 : vector<2x256xf32>
    %221 = vector.extract_strided_slice %209 {offsets = [0, 256], sizes = [2, 128], strides = [1, 1]} : vector<2x384xf32> to vector<2x128xf32>
    %222 = vector.extract_strided_slice %220 {offsets = [0, 0], sizes = [2, 128], strides = [1, 1]} : vector<2x256xf32> to vector<2x128xf32>
    %223 = vector.extract_strided_slice %212 {offsets = [0, 256], sizes = [2, 128], strides = [1, 1]} : vector<2x384xf32> to vector<2x128xf32>
    %224 = arith.mulf %222, %223 : vector<2x128xf32>
    %225 = arith.addf %221, %224 : vector<2x128xf32>
    %226 = math.tanh %225 : vector<2x128xf32>
    %227 = vector.extract_strided_slice %220 {offsets = [0, 128], sizes = [2, 128], strides = [1, 1]} : vector<2x256xf32> to vector<2x128xf32>
    %cst_61 = arith.constant 1.000000e+00 : f32
    %228 = vector.broadcast %cst_61 : f32 to vector<2x128xf32>
    %229 = arith.subf %228, %227 : vector<2x128xf32>
    %230 = arith.mulf %229, %226 : vector<2x128xf32>
    %231 = arith.mulf %227, %204 : vector<2x128xf32>
    %232 = arith.addf %230, %231 : vector<2x128xf32>
    %233 = vector.extract_strided_slice %175 {offsets = [4, 0], sizes = [2, 384], strides = [1, 1]} : vector<16x384xf32> to vector<2x384xf32>
    %234 = vector.extract_strided_slice %175 {offsets = [10, 0], sizes = [2, 384], strides = [1, 1]} : vector<16x384xf32> to vector<2x384xf32>
    %235 = vector.shape_cast %172 : vector<1x384xi1> to vector<1x384xi1>
    %236 = vector.broadcast %235 : vector<1x384xi1> to vector<2x384xi1>
    %237 = arith.select %236, %233, %234 : vector<2x384xi1>, vector<2x384xf32>
    %cst_62 = arith.constant dense<0.000000e+00> : vector<2x384xf32>
    %238 = tpu.matmul %232, %167, %cst_62 {dimension_numbers = #tpu.dot_dimension_numbers<[1], [0], [0], [1], [0, 0, 1, 1], [], []>} : vector<2x128xf32>, vector<128x384xf32>, vector<2x384xf32> -> vector<2x384xf32>
    %239 = vector.broadcast %169 : vector<1x384xf32> to vector<2x384xf32>
    %240 = arith.addf %238, %239 : vector<2x384xf32>
    %241 = vector.extract_strided_slice %237 {offsets = [0, 0], sizes = [2, 256], strides = [1, 1]} : vector<2x384xf32> to vector<2x256xf32>
    %242 = vector.extract_strided_slice %240 {offsets = [0, 0], sizes = [2, 256], strides = [1, 1]} : vector<2x384xf32> to vector<2x256xf32>
    %243 = arith.addf %241, %242 : vector<2x256xf32>
    %244 = arith.negf %243 : vector<2x256xf32>
    %245 = math.exp %244 : vector<2x256xf32>
    %cst_63 = arith.constant 1.000000e+00 : f32
    %246 = vector.broadcast %cst_63 : f32 to vector<2x256xf32>
    %247 = arith.addf %246, %245 : vector<2x256xf32>
    %248 = arith.divf %246, %247 : vector<2x256xf32>
    %249 = vector.extract_strided_slice %237 {offsets = [0, 256], sizes = [2, 128], strides = [1, 1]} : vector<2x384xf32> to vector<2x128xf32>
    %250 = vector.extract_strided_slice %248 {offsets = [0, 0], sizes = [2, 128], strides = [1, 1]} : vector<2x256xf32> to vector<2x128xf32>
    %251 = vector.extract_strided_slice %240 {offsets = [0, 256], sizes = [2, 128], strides = [1, 1]} : vector<2x384xf32> to vector<2x128xf32>
    %252 = arith.mulf %250, %251 : vector<2x128xf32>
    %253 = arith.addf %249, %252 : vector<2x128xf32>
    %254 = math.tanh %253 : vector<2x128xf32>
    %255 = vector.extract_strided_slice %248 {offsets = [0, 128], sizes = [2, 128], strides = [1, 1]} : vector<2x256xf32> to vector<2x128xf32>
    %cst_64 = arith.constant 1.000000e+00 : f32
    %256 = vector.broadcast %cst_64 : f32 to vector<2x128xf32>
    %257 = arith.subf %256, %255 : vector<2x128xf32>
    %258 = arith.mulf %257, %254 : vector<2x128xf32>
    %259 = arith.mulf %255, %232 : vector<2x128xf32>
    %260 = arith.addf %258, %259 : vector<2x128xf32>
    %261 = vector.extract_strided_slice %175 {offsets = [6, 0], sizes = [2, 384], strides = [1, 1]} : vector<16x384xf32> to vector<2x384xf32>
    %262 = vector.extract_strided_slice %175 {offsets = [8, 0], sizes = [2, 384], strides = [1, 1]} : vector<16x384xf32> to vector<2x384xf32>
    %263 = vector.shape_cast %172 : vector<1x384xi1> to vector<1x384xi1>
    %264 = vector.broadcast %263 : vector<1x384xi1> to vector<2x384xi1>
    %265 = arith.select %264, %261, %262 : vector<2x384xi1>, vector<2x384xf32>
    %cst_65 = arith.constant dense<0.000000e+00> : vector<2x384xf32>
    %266 = tpu.matmul %260, %167, %cst_65 {dimension_numbers = #tpu.dot_dimension_numbers<[1], [0], [0], [1], [0, 0, 1, 1], [], []>} : vector<2x128xf32>, vector<128x384xf32>, vector<2x384xf32> -> vector<2x384xf32>
    %267 = vector.broadcast %169 : vector<1x384xf32> to vector<2x384xf32>
    %268 = arith.addf %266, %267 : vector<2x384xf32>
    %269 = vector.extract_strided_slice %265 {offsets = [0, 0], sizes = [2, 256], strides = [1, 1]} : vector<2x384xf32> to vector<2x256xf32>
    %270 = vector.extract_strided_slice %268 {offsets = [0, 0], sizes = [2, 256], strides = [1, 1]} : vector<2x384xf32> to vector<2x256xf32>
    %271 = arith.addf %269, %270 : vector<2x256xf32>
    %272 = arith.negf %271 : vector<2x256xf32>
    %273 = math.exp %272 : vector<2x256xf32>
    %cst_66 = arith.constant 1.000000e+00 : f32
    %274 = vector.broadcast %cst_66 : f32 to vector<2x256xf32>
    %275 = arith.addf %274, %273 : vector<2x256xf32>
    %276 = arith.divf %274, %275 : vector<2x256xf32>
    %277 = vector.extract_strided_slice %265 {offsets = [0, 256], sizes = [2, 128], strides = [1, 1]} : vector<2x384xf32> to vector<2x128xf32>
    %278 = vector.extract_strided_slice %276 {offsets = [0, 0], sizes = [2, 128], strides = [1, 1]} : vector<2x256xf32> to vector<2x128xf32>
    %279 = vector.extract_strided_slice %268 {offsets = [0, 256], sizes = [2, 128], strides = [1, 1]} : vector<2x384xf32> to vector<2x128xf32>
    %280 = arith.mulf %278, %279 : vector<2x128xf32>
    %281 = arith.addf %277, %280 : vector<2x128xf32>
    %282 = math.tanh %281 : vector<2x128xf32>
    %283 = vector.extract_strided_slice %276 {offsets = [0, 128], sizes = [2, 128], strides = [1, 1]} : vector<2x256xf32> to vector<2x128xf32>
    %cst_67 = arith.constant 1.000000e+00 : f32
    %284 = vector.broadcast %cst_67 : f32 to vector<2x128xf32>
    %285 = arith.subf %284, %283 : vector<2x128xf32>
    %286 = arith.mulf %285, %282 : vector<2x128xf32>
    %287 = arith.mulf %283, %260 : vector<2x128xf32>
    %288 = arith.addf %286, %287 : vector<2x128xf32>
    %289 = vector.extract_strided_slice %175 {offsets = [8, 0], sizes = [2, 384], strides = [1, 1]} : vector<16x384xf32> to vector<2x384xf32>
    %290 = vector.extract_strided_slice %175 {offsets = [6, 0], sizes = [2, 384], strides = [1, 1]} : vector<16x384xf32> to vector<2x384xf32>
    %291 = vector.shape_cast %172 : vector<1x384xi1> to vector<1x384xi1>
    %292 = vector.broadcast %291 : vector<1x384xi1> to vector<2x384xi1>
    %293 = arith.select %292, %289, %290 : vector<2x384xi1>, vector<2x384xf32>
    %cst_68 = arith.constant dense<0.000000e+00> : vector<2x384xf32>
    %294 = tpu.matmul %288, %167, %cst_68 {dimension_numbers = #tpu.dot_dimension_numbers<[1], [0], [0], [1], [0, 0, 1, 1], [], []>} : vector<2x128xf32>, vector<128x384xf32>, vector<2x384xf32> -> vector<2x384xf32>
    %295 = vector.broadcast %169 : vector<1x384xf32> to vector<2x384xf32>
    %296 = arith.addf %294, %295 : vector<2x384xf32>
    %297 = vector.extract_strided_slice %293 {offsets = [0, 0], sizes = [2, 256], strides = [1, 1]} : vector<2x384xf32> to vector<2x256xf32>
    %298 = vector.extract_strided_slice %296 {offsets = [0, 0], sizes = [2, 256], strides = [1, 1]} : vector<2x384xf32> to vector<2x256xf32>
    %299 = arith.addf %297, %298 : vector<2x256xf32>
    %300 = arith.negf %299 : vector<2x256xf32>
    %301 = math.exp %300 : vector<2x256xf32>
    %cst_69 = arith.constant 1.000000e+00 : f32
    %302 = vector.broadcast %cst_69 : f32 to vector<2x256xf32>
    %303 = arith.addf %302, %301 : vector<2x256xf32>
    %304 = arith.divf %302, %303 : vector<2x256xf32>
    %305 = vector.extract_strided_slice %293 {offsets = [0, 256], sizes = [2, 128], strides = [1, 1]} : vector<2x384xf32> to vector<2x128xf32>
    %306 = vector.extract_strided_slice %304 {offsets = [0, 0], sizes = [2, 128], strides = [1, 1]} : vector<2x256xf32> to vector<2x128xf32>
    %307 = vector.extract_strided_slice %296 {offsets = [0, 256], sizes = [2, 128], strides = [1, 1]} : vector<2x384xf32> to vector<2x128xf32>
    %308 = arith.mulf %306, %307 : vector<2x128xf32>
    %309 = arith.addf %305, %308 : vector<2x128xf32>
    %310 = math.tanh %309 : vector<2x128xf32>
    %311 = vector.extract_strided_slice %304 {offsets = [0, 128], sizes = [2, 128], strides = [1, 1]} : vector<2x256xf32> to vector<2x128xf32>
    %cst_70 = arith.constant 1.000000e+00 : f32
    %312 = vector.broadcast %cst_70 : f32 to vector<2x128xf32>
    %313 = arith.subf %312, %311 : vector<2x128xf32>
    %314 = arith.mulf %313, %310 : vector<2x128xf32>
    %315 = arith.mulf %311, %288 : vector<2x128xf32>
    %316 = arith.addf %314, %315 : vector<2x128xf32>
    %317 = vector.extract_strided_slice %175 {offsets = [10, 0], sizes = [2, 384], strides = [1, 1]} : vector<16x384xf32> to vector<2x384xf32>
    %318 = vector.extract_strided_slice %175 {offsets = [4, 0], sizes = [2, 384], strides = [1, 1]} : vector<16x384xf32> to vector<2x384xf32>
    %319 = vector.shape_cast %172 : vector<1x384xi1> to vector<1x384xi1>
    %320 = vector.broadcast %319 : vector<1x384xi1> to vector<2x384xi1>
    %321 = arith.select %320, %317, %318 : vector<2x384xi1>, vector<2x384xf32>
    %cst_71 = arith.constant dense<0.000000e+00> : vector<2x384xf32>
    %322 = tpu.matmul %316, %167, %cst_71 {dimension_numbers = #tpu.dot_dimension_numbers<[1], [0], [0], [1], [0, 0, 1, 1], [], []>} : vector<2x128xf32>, vector<128x384xf32>, vector<2x384xf32> -> vector<2x384xf32>
    %323 = vector.broadcast %169 : vector<1x384xf32> to vector<2x384xf32>
    %324 = arith.addf %322, %323 : vector<2x384xf32>
    %325 = vector.extract_strided_slice %321 {offsets = [0, 0], sizes = [2, 256], strides = [1, 1]} : vector<2x384xf32> to vector<2x256xf32>
    %326 = vector.extract_strided_slice %324 {offsets = [0, 0], sizes = [2, 256], strides = [1, 1]} : vector<2x384xf32> to vector<2x256xf32>
    %327 = arith.addf %325, %326 : vector<2x256xf32>
    %328 = arith.negf %327 : vector<2x256xf32>
    %329 = math.exp %328 : vector<2x256xf32>
    %cst_72 = arith.constant 1.000000e+00 : f32
    %330 = vector.broadcast %cst_72 : f32 to vector<2x256xf32>
    %331 = arith.addf %330, %329 : vector<2x256xf32>
    %332 = arith.divf %330, %331 : vector<2x256xf32>
    %333 = vector.extract_strided_slice %321 {offsets = [0, 256], sizes = [2, 128], strides = [1, 1]} : vector<2x384xf32> to vector<2x128xf32>
    %334 = vector.extract_strided_slice %332 {offsets = [0, 0], sizes = [2, 128], strides = [1, 1]} : vector<2x256xf32> to vector<2x128xf32>
    %335 = vector.extract_strided_slice %324 {offsets = [0, 256], sizes = [2, 128], strides = [1, 1]} : vector<2x384xf32> to vector<2x128xf32>
    %336 = arith.mulf %334, %335 : vector<2x128xf32>
    %337 = arith.addf %333, %336 : vector<2x128xf32>
    %338 = math.tanh %337 : vector<2x128xf32>
    %339 = vector.extract_strided_slice %332 {offsets = [0, 128], sizes = [2, 128], strides = [1, 1]} : vector<2x256xf32> to vector<2x128xf32>
    %cst_73 = arith.constant 1.000000e+00 : f32
    %340 = vector.broadcast %cst_73 : f32 to vector<2x128xf32>
    %341 = arith.subf %340, %339 : vector<2x128xf32>
    %342 = arith.mulf %341, %338 : vector<2x128xf32>
    %343 = arith.mulf %339, %316 : vector<2x128xf32>
    %344 = arith.addf %342, %343 : vector<2x128xf32>
    %345 = vector.extract_strided_slice %175 {offsets = [12, 0], sizes = [2, 384], strides = [1, 1]} : vector<16x384xf32> to vector<2x384xf32>
    %346 = vector.extract_strided_slice %175 {offsets = [2, 0], sizes = [2, 384], strides = [1, 1]} : vector<16x384xf32> to vector<2x384xf32>
    %347 = vector.shape_cast %172 : vector<1x384xi1> to vector<1x384xi1>
    %348 = vector.broadcast %347 : vector<1x384xi1> to vector<2x384xi1>
    %349 = arith.select %348, %345, %346 : vector<2x384xi1>, vector<2x384xf32>
    %cst_74 = arith.constant dense<0.000000e+00> : vector<2x384xf32>
    %350 = tpu.matmul %344, %167, %cst_74 {dimension_numbers = #tpu.dot_dimension_numbers<[1], [0], [0], [1], [0, 0, 1, 1], [], []>} : vector<2x128xf32>, vector<128x384xf32>, vector<2x384xf32> -> vector<2x384xf32>
    %351 = vector.broadcast %169 : vector<1x384xf32> to vector<2x384xf32>
    %352 = arith.addf %350, %351 : vector<2x384xf32>
    %353 = vector.extract_strided_slice %349 {offsets = [0, 0], sizes = [2, 256], strides = [1, 1]} : vector<2x384xf32> to vector<2x256xf32>
    %354 = vector.extract_strided_slice %352 {offsets = [0, 0], sizes = [2, 256], strides = [1, 1]} : vector<2x384xf32> to vector<2x256xf32>
    %355 = arith.addf %353, %354 : vector<2x256xf32>
    %356 = arith.negf %355 : vector<2x256xf32>
    %357 = math.exp %356 : vector<2x256xf32>
    %cst_75 = arith.constant 1.000000e+00 : f32
    %358 = vector.broadcast %cst_75 : f32 to vector<2x256xf32>
    %359 = arith.addf %358, %357 : vector<2x256xf32>
    %360 = arith.divf %358, %359 : vector<2x256xf32>
    %361 = vector.extract_strided_slice %349 {offsets = [0, 256], sizes = [2, 128], strides = [1, 1]} : vector<2x384xf32> to vector<2x128xf32>
    %362 = vector.extract_strided_slice %360 {offsets = [0, 0], sizes = [2, 128], strides = [1, 1]} : vector<2x256xf32> to vector<2x128xf32>
    %363 = vector.extract_strided_slice %352 {offsets = [0, 256], sizes = [2, 128], strides = [1, 1]} : vector<2x384xf32> to vector<2x128xf32>
    %364 = arith.mulf %362, %363 : vector<2x128xf32>
    %365 = arith.addf %361, %364 : vector<2x128xf32>
    %366 = math.tanh %365 : vector<2x128xf32>
    %367 = vector.extract_strided_slice %360 {offsets = [0, 128], sizes = [2, 128], strides = [1, 1]} : vector<2x256xf32> to vector<2x128xf32>
    %cst_76 = arith.constant 1.000000e+00 : f32
    %368 = vector.broadcast %cst_76 : f32 to vector<2x128xf32>
    %369 = arith.subf %368, %367 : vector<2x128xf32>
    %370 = arith.mulf %369, %366 : vector<2x128xf32>
    %371 = arith.mulf %367, %344 : vector<2x128xf32>
    %372 = arith.addf %370, %371 : vector<2x128xf32>
    %373 = vector.extract_strided_slice %175 {offsets = [14, 0], sizes = [2, 384], strides = [1, 1]} : vector<16x384xf32> to vector<2x384xf32>
    %374 = vector.extract_strided_slice %175 {offsets = [0, 0], sizes = [2, 384], strides = [1, 1]} : vector<16x384xf32> to vector<2x384xf32>
    %375 = vector.shape_cast %172 : vector<1x384xi1> to vector<1x384xi1>
    %376 = vector.broadcast %375 : vector<1x384xi1> to vector<2x384xi1>
    %377 = arith.select %376, %373, %374 : vector<2x384xi1>, vector<2x384xf32>
    %cst_77 = arith.constant dense<0.000000e+00> : vector<2x384xf32>
    %378 = tpu.matmul %372, %167, %cst_77 {dimension_numbers = #tpu.dot_dimension_numbers<[1], [0], [0], [1], [0, 0, 1, 1], [], []>} : vector<2x128xf32>, vector<128x384xf32>, vector<2x384xf32> -> vector<2x384xf32>
    %379 = vector.broadcast %169 : vector<1x384xf32> to vector<2x384xf32>
    %380 = arith.addf %378, %379 : vector<2x384xf32>
    %381 = vector.extract_strided_slice %377 {offsets = [0, 0], sizes = [2, 256], strides = [1, 1]} : vector<2x384xf32> to vector<2x256xf32>
    %382 = vector.extract_strided_slice %380 {offsets = [0, 0], sizes = [2, 256], strides = [1, 1]} : vector<2x384xf32> to vector<2x256xf32>
    %383 = arith.addf %381, %382 : vector<2x256xf32>
    %384 = arith.negf %383 : vector<2x256xf32>
    %385 = math.exp %384 : vector<2x256xf32>
    %cst_78 = arith.constant 1.000000e+00 : f32
    %386 = vector.broadcast %cst_78 : f32 to vector<2x256xf32>
    %387 = arith.addf %386, %385 : vector<2x256xf32>
    %388 = arith.divf %386, %387 : vector<2x256xf32>
    %389 = vector.extract_strided_slice %377 {offsets = [0, 256], sizes = [2, 128], strides = [1, 1]} : vector<2x384xf32> to vector<2x128xf32>
    %390 = vector.extract_strided_slice %388 {offsets = [0, 0], sizes = [2, 128], strides = [1, 1]} : vector<2x256xf32> to vector<2x128xf32>
    %391 = vector.extract_strided_slice %380 {offsets = [0, 256], sizes = [2, 128], strides = [1, 1]} : vector<2x384xf32> to vector<2x128xf32>
    %392 = arith.mulf %390, %391 : vector<2x128xf32>
    %393 = arith.addf %389, %392 : vector<2x128xf32>
    %394 = math.tanh %393 : vector<2x128xf32>
    %395 = vector.extract_strided_slice %388 {offsets = [0, 128], sizes = [2, 128], strides = [1, 1]} : vector<2x256xf32> to vector<2x128xf32>
    %cst_79 = arith.constant 1.000000e+00 : f32
    %396 = vector.broadcast %cst_79 : f32 to vector<2x128xf32>
    %397 = arith.subf %396, %395 : vector<2x128xf32>
    %398 = arith.mulf %397, %394 : vector<2x128xf32>
    %399 = arith.mulf %395, %372 : vector<2x128xf32>
    %400 = arith.addf %398, %399 : vector<2x128xf32>
    %401 = tpu.concatenate %204, %400 in 1 : vector<2x128xf32>, vector<2x128xf32> -> vector<2x256xf32>
    %402 = tpu.concatenate %232, %372 in 1 : vector<2x128xf32>, vector<2x128xf32> -> vector<2x256xf32>
    %403 = tpu.concatenate %260, %344 in 1 : vector<2x128xf32>, vector<2x128xf32> -> vector<2x256xf32>
    %404 = tpu.concatenate %288, %316 in 1 : vector<2x128xf32>, vector<2x128xf32> -> vector<2x256xf32>
    %405 = tpu.concatenate %316, %288 in 1 : vector<2x128xf32>, vector<2x128xf32> -> vector<2x256xf32>
    %406 = tpu.concatenate %344, %260 in 1 : vector<2x128xf32>, vector<2x128xf32> -> vector<2x256xf32>
    %407 = tpu.concatenate %372, %232 in 1 : vector<2x128xf32>, vector<2x128xf32> -> vector<2x256xf32>
    %408 = tpu.concatenate %400, %204 in 1 : vector<2x128xf32>, vector<2x128xf32> -> vector<2x256xf32>
    %409 = tpu.concatenate %401, %402, %403, %404, %405, %406, %407, %408 in 0 : vector<2x256xf32>, vector<2x256xf32>, vector<2x256xf32>, vector<2x256xf32>, vector<2x256xf32>, vector<2x256xf32>, vector<2x256xf32>, vector<2x256xf32> -> vector<16x256xf32>
    %cst_80 = arith.constant 0.000000e+00 : f32
    %410 = vector.broadcast %cst_80 : f32 to vector<16x256xf32>
    %411 = arith.cmpf oge, %409, %410 : vector<16x256xf32>
    %cst_81 = arith.constant 0.00999999977 : f32
    %412 = vector.broadcast %cst_81 : f32 to vector<16x256xf32>
    %413 = arith.mulf %412, %409 : vector<16x256xf32>
    %414 = arith.select %411, %409, %413 : vector<16x256xi1>, vector<16x256xf32>
    %c0_82 = arith.constant 0 : index
    %c0_83 = arith.constant 0 : index
    %415 = vector.load %arg8[%c0_82, %c0_83] : memref<256x32xf32, #tpu.memory_space<vmem>>, vector<256x32xf32>
    %cst_84 = arith.constant dense<0.000000e+00> : vector<16x32xf32>
    %416 = tpu.matmul %414, %415, %cst_84 {dimension_numbers = #tpu.dot_dimension_numbers<[1], [0], [0], [1], [0, 0, 1, 1], [], []>} : vector<16x256xf32>, vector<256x32xf32>, vector<16x32xf32> -> vector<16x32xf32>
    %417 = vector.extract_strided_slice %2 {offsets = [12, 0], sizes = [1, 32], strides = [1, 1]} : vector<16x32xf32> to vector<1x32xf32>
    %418 = vector.broadcast %417 : vector<1x32xf32> to vector<16x32xf32>
    %419 = arith.addf %416, %418 : vector<16x32xf32>
    %420 = arith.addf %143, %419 : vector<16x32xf32>
    %cst_85 = arith.constant dense<0.000000e+00> : vector<16xf32>
    %421 = vector.multi_reduction <add>, %420, %cst_85 [1] : vector<16x32xf32> to vector<16xf32>
    %422 = vector.shape_cast %421 : vector<16xf32> to vector<16x1xf32>
    %cst_86 = arith.constant 3.200000e+01 : f32
    %423 = vector.broadcast %cst_86 : f32 to vector<16x1xf32>
    %424 = arith.divf %422, %423 : vector<16x1xf32>
    %425 = vector.broadcast %424 : vector<16x1xf32> to vector<16x32xf32>
    %426 = arith.subf %420, %425 : vector<16x32xf32>
    %427 = arith.mulf %426, %426 : vector<16x32xf32>
    %cst_87 = arith.constant dense<0.000000e+00> : vector<16xf32>
    %428 = vector.multi_reduction <add>, %427, %cst_87 [1] : vector<16x32xf32> to vector<16xf32>
    %429 = vector.shape_cast %428 : vector<16xf32> to vector<16x1xf32>
    %cst_88 = arith.constant 3.200000e+01 : f32
    %430 = vector.broadcast %cst_88 : f32 to vector<16x1xf32>
    %431 = arith.divf %429, %430 : vector<16x1xf32>
    %cst_89 = arith.constant 9.99999974E-6 : f32
    %432 = vector.broadcast %cst_89 : f32 to vector<16x1xf32>
    %433 = arith.addf %431, %432 : vector<16x1xf32>
    %434 = math.rsqrt %433 : vector<16x1xf32>
    %435 = vector.broadcast %434 : vector<16x1xf32> to vector<16x32xf32>
    %436 = arith.mulf %426, %435 : vector<16x32xf32>
    %437 = vector.extract_strided_slice %2 {offsets = [6, 0], sizes = [1, 32], strides = [1, 1]} : vector<16x32xf32> to vector<1x32xf32>
    %438 = vector.broadcast %437 : vector<1x32xf32> to vector<16x32xf32>
    %439 = arith.mulf %436, %438 : vector<16x32xf32>
    %440 = vector.extract_strided_slice %2 {offsets = [7, 0], sizes = [1, 32], strides = [1, 1]} : vector<16x32xf32> to vector<1x32xf32>
    %441 = vector.broadcast %440 : vector<1x32xf32> to vector<16x32xf32>
    %442 = arith.addf %439, %441 : vector<16x32xf32>
    %c0_90 = arith.constant 0 : index
    %c0_91 = arith.constant 0 : index
    %443 = vector.load %arg9[%c0_90, %c0_91] : memref<16x32xf32, #tpu.memory_space<vmem>>, vector<16x32xf32>
    tpu.vector_store %arg9[%c0_90, %c0_91], %442 {strides = array<i32>} : memref<16x32xf32, #tpu.memory_space<vmem>>, vector<16x32xf32>,
    return
  }
  func.func @transform_0(%arg0: i32) -> (i32, i32) {
    %c0_i32 = arith.constant 0 : i32
    %c0_i32_0 = arith.constant 0 : i32
    %c0_i32_1 = arith.constant 0 : i32
    return %c0_i32, %c0_i32_0 : i32, i32
  }
  func.func @transform_1(%arg0: i32) -> (i32, i32) {
    %c0_i32 = arith.constant 0 : i32
    %c0_i32_0 = arith.constant 0 : i32
    %c0_i32_1 = arith.constant 0 : i32
    return %c0_i32, %c0_i32_0 : i32, i32
  }
  func.func @transform_2(%arg0: i32) -> (i32, i32) {
    %c0_i32 = arith.constant 0 : i32
    %c0_i32_0 = arith.constant 0 : i32
    %c0_i32_1 = arith.constant 0 : i32
    return %c0_i32, %c0_i32_0 : i32, i32
  }
  func.func @transform_3(%arg0: i32) -> (i32, i32) {
    %c0_i32 = arith.constant 0 : i32
    %c0_i32_0 = arith.constant 0 : i32
    %c0_i32_1 = arith.constant 0 : i32
    return %c0_i32, %c0_i32_0 : i32, i32
  }
  func.func @transform_4(%arg0: i32) -> (i32, i32) {
    %c0_i32 = arith.constant 0 : i32
    %c0_i32_0 = arith.constant 0 : i32
    %c0_i32_1 = arith.constant 0 : i32
    return %c0_i32, %c0_i32_0 : i32, i32
  }
  func.func @transform_5(%arg0: i32) -> (i32, i32) {
    %c0_i32 = arith.constant 0 : i32
    %c0_i32_0 = arith.constant 0 : i32
    %c0_i32_1 = arith.constant 0 : i32
    return %c0_i32, %c0_i32_0 : i32, i32
  }
  func.func @transform_6(%arg0: i32) -> (i32, i32) {
    %c0_i32 = arith.constant 0 : i32
    %c0_i32_0 = arith.constant 0 : i32
    %c0_i32_1 = arith.constant 0 : i32
    return %c0_i32, %c0_i32_0 : i32, i32
  }
  func.func @transform_7(%arg0: i32) -> (i32, i32) {
    %c0_i32 = arith.constant 0 : i32
    %c0_i32_0 = arith.constant 0 : i32
    %c0_i32_1 = arith.constant 0 : i32
    return %c0_i32, %c0_i32_0 : i32, i32
  }
  func.func @transform_8(%arg0: i32) -> (i32, i32) {
    %c0_i32 = arith.constant 0 : i32
    %c0_i32_0 = arith.constant 0 : i32
    %c0_i32_1 = arith.constant 0 : i32
    return %c0_i32, %c0_i32_0 : i32, i32
  }
}

</mosaic_0001>

<bundles_post_ra>
// kernel: eq.8
= control target key start
LH: loop header
LB: loop body
LE: loop exit
PB: predicated region body
PF: predicated region fallthrough
CT: control target
= control target key end

     0   :  { %s67_s10 = smov 14   ;;  %s68_s11 = smov 10   ;;  %vm3_vm0 = vcmask 15360   ;;  %vm9_vm1 = vcmask 130160   ;;  %vm15_vm2 = vcmask 113760   ;;  %vm21_vm3 = vcmask 97360   ;;  %s111_s0 = inlined_call_operand.vmem [shape: s32[8,2], index: 0, kind: input, shape index: {}]   ;;  %s112_s1 = inlined_call_operand.vmem [shape: s32[16], index: 1, kind: output, shape index: {}]  }
   0x1   :  { %v53_v0 = vld [vmem:[%s111_s0 + $0x7] sm:$0x1]   ;;  %v55_v1 = vld [vmem:[%s111_s0 + $0x5] sm:$0x1]   ;;  %v57_v2 = vld [vmem:[%s111_s0 + $0x3] sm:$0x1]  }
   0x2   :  { %7 = vrot.lane.b32.xlu0 %v53_v0, %s67_s10  ;;  %19 = vrot.lane.b32.xlu1 %v55_v1, %s68_s11  ;;  %s69_s14 = smov 6   ;;  %v54_v3 = vld [vmem:[%s111_s0 + $0x6] sm:$0x1]   ;;  %v56_v4 = vld [vmem:[%s111_s0 + $0x4] sm:$0x1]   ;;  %s70_s21 = smov 12  }
   0x3   :  { %31 = vrot.lane.b32.xlu2 %v57_v2, %s69_s14  ;;  %v58_v5 = vld [vmem:[%s111_s0 + $0x2] sm:$0x1]   ;;  %s71_s22 = smov 8   ;;  %s72_s23 = smov 4   ;;  %v59_v6 = vld [vmem:[%s111_s0 + $0x1] sm:$0x1]  }
   0x4   :  { %s73_s26 = smov 2   ;;  %v2_v7 = vld [vmem:[%s111_s0] sm:$0x1]   ;;  %vm27_vm4 = vcmask 80960   ;;  %vm33_vm5 = vcmask 64560   ;;  %vm39_vm6 = vcmask 48160  }
   0x5   :  { %4 = vst.msk [vmem:[#allocation0] sm:$0x1] %vm3_vm0, %v2_v7   ;;  %vm45_vm7 = vcmask 31760  }
   0xa   :  { %13 = vrot.lane.b32.xlu0 %v54_v3, %s70_s21  ;;  %25 = vrot.lane.b32.xlu1 %v56_v4, %s71_s22 }
   0xb   :  { %37 = vrot.lane.b32.xlu2 %v58_v5, %s72_s23 }
  0x12   :  { %43 = vrot.lane.b32.xlu0 %v59_v6, %s73_s26 }
  0x5d   :  { %v32_v8 = vpop.permute.xlu2 %31  }
  0x65   :  { %v38_v9 = vpop.permute.xlu2 %37  }
  0x74   :  { %v8_v10 = vpop.permute.xlu0 %7   ;;  %v20_v11 = vpop.permute.xlu1 %19  }
  0x75   :  { %10 = vst.msk [vmem:[#allocation0] sm:$0x1] %vm9_vm1, %v8_v10  }
  0x7c   :  { %v14_v12 = vpop.permute.xlu0 %13   ;;  %v26_v13 = vpop.permute.xlu1 %25  }
  0x7d   :  { %16 = vst.msk [vmem:[#allocation0] sm:$0x1] %vm15_vm2, %v14_v12  }
  0x7e   :  { %22 = vst.msk [vmem:[#allocation0] sm:$0x1] %vm21_vm3, %v20_v11  }
  0x7f   :  { %28 = vst.msk [vmem:[#allocation0] sm:$0x1] %vm27_vm4, %v26_v13  }
  0x80   :  { %34 = vst.msk [vmem:[#allocation0] sm:$0x1] %vm33_vm5, %v32_v8  }
  0x81   :  { %40 = vst.msk [vmem:[#allocation0] sm:$0x1] %vm39_vm6, %v38_v9  }
  0x84   :  { %v44_v14 = vpop.permute.xlu0 %43  }
  0x85   :  { %46 = vst.msk [vmem:[#allocation0] sm:$0x1] %vm45_vm7, %v44_v14  }
  0x8c   :  { %v49_v15 = vld [vmem:[#allocation0] sm:$0x1] }
  0x8d   :  { %52 = vst [vmem:[%s112_s1] sm:$0x1] %v49_v15 }

// kernel: eq.11
= control target key start
LH: loop header
LB: loop body
LE: loop exit
PB: predicated region body
PF: predicated region fallthrough
CT: control target
= control target key end

     0   :  { %vm7_vm0 = vcmask 130048   ;;  %vm13_vm1 = vcmask 261248   ;;  %s39_s0 = inlined_call_operand.vmem [shape: s32[2,16], index: 0, kind: input, shape index: {}]   ;;  %s40_s1 = inlined_call_operand.vmem [shape: s32[32], index: 1, kind: output, shape index: {}]  }
   0x1   :  { %v4_v0 = vld [vmem:[%s39_s0] sm:$0x3]  ;;  %s22_s0 = smov 16  }
   0x2   :  { %5 = vst [vmem:[#allocation1] sm:$0x3] %v4_v0 }
   0x9   :  { %v10_v1 = vld [vmem:[#allocation1 + $0x1] sm:$0x1]   ;;  %v6_v2 = vld [vmem:[#allocation1] sm:$0x1]  }
   0xa   :  { %11 = vrot.lane.b32.xlu0 %v10_v1, %s22_s0  ;;  %8 = vst.msk [vmem:[#allocation0] sm:$0x1] %vm7_vm0, %v6_v2  }
  0x7c   :  { %v12_v3 = vpop.permute.xlu0 %11  }
  0x7d   :  { %14 = vst.msk [vmem:[#allocation0] sm:$0x1] %vm13_vm1, %v12_v3  }
  0x84   :  { %v17_v4 = vld [vmem:[#allocation0] sm:$0x1] }
  0x85   :  { %20 = vst [vmem:[%s40_s1] sm:$0x1] %v17_v4 }

// kernel: cross_attention_forward.1
= control target key start
LH: loop header
LB: loop body
LE: loop exit
PB: predicated region body
PF: predicated region fallthrough
CT: control target
= control target key end

     0   :  { %vm37_vm0 = vcmask 261120   ;;  %v2620_v12 = vmov 32.0   ;;  %s2621_s24 = smov 96   ;;  %s2622_s27 = smov 32   ;;  %s4281_s1 = inlined_call_operand.vmem [shape: f32[32,32], index: 1, kind: input, shape index: {}]   ;;  %s4282_s0 = inlined_call_operand.vmem [shape: f32[16,32], index: 0, kind: input, shape index: {}]   ;;  %s4283_s4 = inlined_call_operand.vmem [shape: f32[32,128], index: 4, kind: input, shape index: {}]   ;;  %s4284_s3 = inlined_call_operand.vmem [shape: f32[16,32], index: 3, kind: input, shape index: {}]   ;;  %s4285_s2 = inlined_call_operand.vmem [shape: f32[16,32], index: 2, kind: input, shape index: {}]   ;;  %s4286_s5 = inlined_call_operand.vmem [shape: f32[160,384], index: 5, kind: input, shape index: {}]   ;;  %s4287_s6 = inlined_call_operand.vmem [shape: f32[3,384], index: 6, kind: input, shape index: {}]   ;;  %s4288_s7 = inlined_call_operand.vmem [shape: f32[256,32], index: 7, kind: input, shape index: {}]   ;;  %s4289_s8 = inlined_call_operand.vmem [shape: f32[16,32], index: 8, kind: output, shape index: {}]  }
   0x1   :  { %v33_v0 = vld [vmem:[%s4281_s1 + $0x10] sm:$0xff]  ;;  %v31_v1 = vld [vmem:[%s4281_s1] sm:$0xff]  ;;  %v32_v6 = vld [vmem:[%s4281_s1 + $0x8] sm:$0xff]  ;;  %2430 = vrcp.f32 %v2620_v12  ;;  %s2623_s30 = smov 120   ;;  %s2624_s13 = smov 88  }
   0x2   :  { %v101_v2 = vsel %vm37_vm0, %v33_v0, 0.0  ;;  %v95_v3 = vsel %vm37_vm0, %v31_v1, 0.0  ;;  %v29_v4 = vld [vmem:[%s4282_s0] sm:$0xff]  ;;  %v34_v7 = vld [vmem:[%s4281_s1 + $0x18] sm:$0xff]  ;;  %v30_v8 = vld [vmem:[%s4282_s0 + $0x8] sm:$0xff]  ;;  %v98_v9 = vsel %vm37_vm0, %v32_v6, 0.0 }
   0x3   :  { %102 = vadd.xlane.f32.xlu1 %v101_v2  ;;  %96 = vadd.xlane.f32.xlu0 %v95_v3  ;;  %v38_v5 = vsel %vm37_vm0, %v29_v4, 0.0  ;;  %v104_v10 = vsel %vm37_vm0, %v34_v7, 0.0  ;;  %v41_v11 = vsel %vm37_vm0, %v30_v8, 0.0  ;;  %v196_v17 = vld [vmem:[%s4283_s4 + $0x18] sm:$0xff]  ;;  %v195_v19 = vld [vmem:[%s4283_s4 + $0x10] sm:$0xff]  ;;  %v194_v33 = vld [vmem:[%s4283_s4 + $0x8] sm:$0xff] }
   0x4   :  { %39 = vadd.xlane.f32.xlu2 %v38_v5  ;;  %216 = vmatpush.msra.mxu0 %v196_v17  ;;  %v193_v36 = vld [vmem:[%s4283_s4] sm:$0xff]  ;;  %v2370_v47 = vpack.i.bf16 %v195_v19, %v196_v17  ;;  %v2763_v61 = vld [vmem:[%s4284_s3 + $0x8] sm:$0xff]  ;;  %s2625_s14 = smov 112   ;;  %s2627_s15 = smov 72  }
   0x5   :  { %v2748_v50 = vpack.i.bf16 %v193_v36, %v194_v33  ;;  %v228_v62 = vrot.slane %v2763_v61, 1  ;;  %v2776_v12 = vld [vmem:[%s4284_s3] sm:$0xff]  ;;  %s2628_s16 = smov 80   ;;  %s2629_s1 = smov 8  }
   0x6   :  { %217 = vmatpush.msra.mxu0 %v195_v19  ;;  %s2630_s21 = smov 24   ;;  %s2631_s22 = smov 16  }
   0x7   :  { %v2431_v13 = vpop.eup %2430 }
   0x8   :  { %v45_v14 = vmul.f32 32.0, %v2431_v13  ;;  %vm49_vm1 = vweird.f32 %v2431_v13  ;;  %218 = vmatpush.msra.mxu0 %v194_v33 }
   0xa   :  { %v46_v15 = vsub.f32 1.0, %v45_v14  ;;  %219 = vmatpush.msra.mxu0 %v193_v36 }
   0xb   :  { %99 = vadd.xlane.f32.xlu0 %v98_v9  ;;  %105 = vadd.xlane.f32.xlu1 %v104_v10 }
   0xc   :  { %42 = vadd.xlane.f32.xlu2 %v41_v11  ;;  %v47_v16 = vmul.f32 %v2431_v13, %v46_v15 }
   0xe   :  { %v48_v18 = vadd.f32 %v2431_v13, %v47_v16 }
  0x10   :  { %v2709_v20 = vsel %vm49_vm1, %v2431_v13, %v48_v18 }
  0x11   :  { %4341 = vst [vmem:[#allocation2_spill] sm:$0xff] %v2709_v20 }
  0x76   :  { %v103_v21 = vpop.xlane.xlu1 %102  ;;  %v97_v22 = vpop.xlane.xlu0 %96 }
  0x77   :  { %v109_v23 = vmul.f32 %v103_v21, %v2709_v20  ;;  %v107_v24 = vmul.f32 %v97_v22, %v2709_v20  ;;  %v40_v38 = vpop.xlane.xlu2 %39  ;;  %v2779_v22 = vperm.slane %v2776_v12, 2 }
  0x78   :  { %v51_v43 = vmul.f32 %v2709_v20, %v40_v38 }
  0x79   :  { %v2713_v25 = vsub.f32 %v33_v0, %v109_v23  ;;  %v2715_v26 = vsub.f32 %v31_v1, %v107_v24 }
  0x7a   :  { %v2742_v45 = vsub.f32 %v29_v4, %v51_v43 }
  0x7b   :  { %v115_v27 = vmul.f32 %v2715_v26, %v2715_v26  ;;  %v117_v28 = vmul.f32 %v2713_v25, %v2713_v25 }
  0x7c   :  { %v55_v48 = vmul.f32 %v2742_v45, %v2742_v45 }
  0x7d   :  { %v119_v29 = vsel %vm37_vm0, %v115_v27, 0.0  ;;  %v125_v30 = vsel %vm37_vm0, %v117_v28, 0.0 }
  0x7e   :  { %120 = vadd.xlane.f32.xlu0 %v119_v29  ;;  %v100_v31 = vpop.xlane.xlu0 %99  ;;  %126 = vadd.xlane.f32.xlu2 %v125_v30  ;;  %v106_v32 = vpop.xlane.xlu1 %105  ;;  %v57_v51 = vsel %vm37_vm0, %v55_v48, 0.0  ;;  %v2783_v30 = vperm.slane %v2776_v12, 3 }
  0x7f   :  { %v108_v34 = vmul.f32 %v100_v31, %v2709_v20  ;;  %v110_v35 = vmul.f32 %v106_v32, %v2709_v20  ;;  %v43_v46 = vpop.xlane.xlu2 %42 }
  0x80   :  { %v52_v49 = vmul.f32 %v2709_v20, %v43_v46 }
  0x81   :  { %v2731_v37 = vsub.f32 %v32_v6, %v108_v34  ;;  %v2733_v39 = vsub.f32 %v34_v7, %v110_v35 }
  0x82   :  { %v2751_v52 = vsub.f32 %v30_v8, %v52_v49 }
  0x83   :  { %v116_v40 = vmul.f32 %v2731_v37, %v2731_v37  ;;  %v118_v42 = vmul.f32 %v2733_v39, %v2733_v39 }
  0x84   :  { %v56_v53 = vmul.f32 %v2751_v52, %v2751_v52 }
  0x85   :  { %v122_v41 = vsel %vm37_vm0, %v116_v40, 0.0  ;;  %v128_v44 = vsel %vm37_vm0, %v118_v42, 0.0 }
  0x86   :  { %123 = vadd.xlane.f32.xlu1 %v122_v41  ;;  %v60_v54 = vsel %vm37_vm0, %v56_v53, 0.0 }
  0x8e   :  { %129 = vadd.xlane.f32.xlu1 %v128_v44 }
  0x92   :  { %2371 = vrot.lane.b32.xlu0 %v2370_v47, %s2621_s24 }
  0x96   :  { %58 = vadd.xlane.f32.xlu1 %v57_v51  ;;  %2376 = vrot.lane.b32.xlu2 %v2748_v50, %s2621_s24 }
  0x9a   :  { %229 = vrot.lane.b32.xlu0 %v228_v62, %s2622_s27 }
  0x9e   :  { %61 = vadd.xlane.f32.xlu1 %v60_v54 }
  0xf1   :  { %v121_v55 = vpop.xlane.xlu0 %120  ;;  %v127_v56 = vpop.xlane.xlu2 %126 }
  0xf2   :  { %v131_v57 = vmul.f32 %v121_v55, %v2709_v20  ;;  %v133_v58 = vmul.f32 %v127_v56, %v2709_v20 }
  0xf4   :  { %v135_v59 = vadd.f32 1e-05, %v131_v57  ;;  %v137_v60 = vadd.f32 1e-05, %v133_v58 }
  0xf6   :  { %2432 = vrsqrt.f32 %v135_v59  ;;  %vm145_vm3 = vweird.f32 %v135_v59  ;;  %vm165_vm5 = vweird.f32 %v137_v60 }
  0xf7   :  { %2434 = vrsqrt.f32 %v137_v60 }
  0xf9   :  { %v124_v63 = vpop.xlane.xlu1 %123  ;;  %v2377_v16 = vpop.permute.xlu2 %2376 }
  0xfa   :  { %v132_v0 = vmul.f32 %v124_v63, %v2709_v20  ;;  %v2378_v28 = vunpack.i.l.bf16 %v2377_v16  ;;  %v2379_v38 = vunpack.i.h.bf16 %v2377_v16 }
  0xfc   :  { %v2433_v1 = vpop.eup %2432  ;;  %v136_v2 = vadd.f32 1e-05, %v132_v0 }
  0xfd   :  { %v2768_v3 = vpop.eup %2434  ;;  %v140_v4 = vmul.f32 %v2433_v1, %v135_v59  ;;  %vm146_vm2 = vweird.f32 %v2433_v1 }
  0xfe   :  { %v160_v5 = vmul.f32 %v2768_v3, %v137_v60  ;;  %2436 = vrsqrt.f32 %v136_v2  ;;  %vm147_vm4 = vmor %vm145_vm3, %vm146_vm2  ;;  %vm166_vm6 = vweird.f32 %v2768_v3  ;;  %vm155_vm9 = vweird.f32 %v136_v2 }
  0xff   :  { %v141_v6 = vmul.f32 %v2433_v1, %v140_v4  ;;  %vm2790_vm8 = vmor %vm165_vm5, %vm166_vm6  ;;  %vm293_vm5 = vcmask 64512  }
 0x100   :  { %v161_v8 = vmul.f32 %v2768_v3, %v160_v5 }
 0x101   :  { %v142_v7 = vmul.f32 0.5, %v141_v6  ;;  %v130_v9 = vpop.xlane.xlu1 %129 }
 0x102   :  { %v134_v10 = vmul.f32 %v130_v9, %v2709_v20  ;;  %v162_v18 = vmul.f32 0.5, %v161_v8  ;;  %v89_v9 = vperm.slane %v2776_v12, 0 }
 0x103   :  { %v143_v11 = vsub.f32 1.5, %v142_v7 }
 0x104   :  { %v2437_v13 = vpop.eup %2436  ;;  %v138_v14 = vadd.f32 1e-05, %v134_v10  ;;  %v2372_v15 = vpop.permute.xlu0 %2371  ;;  %v163_v31 = vsub.f32 1.5, %v162_v18 }
 0x105   :  { %v144_v17 = vmul.f32 %v2433_v1, %v143_v11  ;;  %v150_v19 = vmul.f32 %v2437_v13, %v136_v2  ;;  %v2373_v21 = vunpack.i.l.bf16 %v2372_v15  ;;  %v2374_v27 = vunpack.i.h.bf16 %v2372_v15 }
 0x106   :  { %2438 = vrsqrt.f32 %v138_v14  ;;  %vm156_vm7 = vweird.f32 %v2437_v13  ;;  %v164_v42 = vmul.f32 %v2768_v3, %v163_v31  ;;  %vm175_vm11 = vweird.f32 %v138_v14 }
 0x107   :  { %v148_v23 = vsel %vm147_vm4, %v2433_v1, %v144_v17  ;;  %v151_v24 = vmul.f32 %v2437_v13, %v150_v19  ;;  %274 = vmatpush.msra.mxu1 %v2373_v21  ;;  %vm157_vm10 = vmor %vm155_vm9, %vm156_vm7 }
 0x108   :  { %v179_v29 = vmul.f32 %v148_v23, %v2715_v26  ;;  %v168_v51 = vsel %vm2790_vm8, %v2768_v3, %v164_v42 }
 0x109   :  { %v152_v32 = vmul.f32 0.5, %v151_v24  ;;  %275 = vmatpush.msra.mxu1 %v2374_v27  ;;  %v59_v33 = vpop.xlane.xlu1 %58  ;;  %v181_v62 = vmul.f32 %v168_v51, %v2713_v25 }
 0x10a   :  { %v63_v34 = vmul.f32 %v59_v33, %v2709_v20  ;;  %v184_v35 = vmul.f32 %v2779_v22, %v179_v29 }
 0x10b   :  { %v153_v36 = vsub.f32 1.5, %v152_v32  ;;  %276 = vmatpush.msra.mxu1 %v2378_v28  ;;  %v186_v1 = vmul.f32 %v2779_v22, %v181_v62 }
 0x10c   :  { %v2439_v40 = vpop.eup %2438  ;;  %v65_v26 = vadd.f32 1e-05, %v63_v34  ;;  %v189_v41 = vadd.f32 %v2783_v30, %v184_v35  ;;  %v230_v27 = vpop.permute.xlu0 %229 }
 0x10d   :  { %v154_v44 = vmul.f32 %v2437_v13, %v153_v36  ;;  %v170_v46 = vmul.f32 %v2439_v40, %v138_v14  ;;  %277 = vmatpush.msra.mxu1 %v2379_v38  ;;  %vm176_vm12 = vweird.f32 %v2439_v40  ;;  %v191_v25 = vadd.f32 %v2783_v30, %v186_v1 }
 0x10e   :  { %2440 = vrsqrt.f32 %v65_v26  ;;  %2294 = vmatmul.msk.f32.vlgmr.msra.gmra.mxu1 %vm37_vm0, %v189_v41  ;;  %vm177_vm13 = vmor %vm175_vm11, %vm176_vm12  ;;  %vm73_vm14 = vweird.f32 %v65_v26  ;;  %v92_v14 = vperm.slane %v2776_v12, 1  ;;  %v232_v28 = vsel %vm37_vm0, %v2763_v61, %v230_v27 }
 0x10f   :  { %v158_v47 = vsel %vm157_vm10, %v2437_v13, %v154_v44  ;;  %v171_v48 = vmul.f32 %v2439_v40, %v170_v46  ;;  %v233_v29 = vperm.slane %v232_v28, 1 }
 0x110   :  { %v180_v49 = vmul.f32 %v158_v47, %v2731_v37 }
 0x111   :  { %v172_v53 = vmul.f32 0.5, %v171_v48  ;;  %v62_v54 = vpop.xlane.xlu1 %61 }
 0x112   :  { %v64_v55 = vmul.f32 %v62_v54, %v2709_v20  ;;  %v185_v56 = vmul.f32 %v2779_v22, %v180_v49  ;;  %v2859_v49 = vld [vmem:[%s4285_s2] sm:$0xff] }
 0x113   :  { %v173_v57 = vsub.f32 1.5, %v172_v53 }
 0x114   :  { %v2441_v58 = vpop.eup %2440  ;;  %v66_v59 = vadd.f32 1e-05, %v64_v55  ;;  %v190_v60 = vadd.f32 %v2783_v30, %v185_v56  ;;  %v2866_v56 = vld [vmem:[%s4285_s2 + $0x8] sm:$0xff]  ;;  %s2626_s2 = smov 104  }
 0x115   :  { %v174_v63 = vmul.f32 %v2439_v40, %v173_v57  ;;  %v68_v37 = vmul.f32 %v2441_v58, %v65_v26  ;;  %vm74_vm15 = vweird.f32 %v2441_v58 }
 0x116   :  { %2442 = vrsqrt.f32 %v66_v59  ;;  %2295 = vmatmul.msk.f32.gmra.mxu1 %vm37_vm0, %v190_v60  ;;  %vm75_vm1 = vmor %vm73_vm14, %vm74_vm15  ;;  %vm83_vm2 = vweird.f32 %v66_v59 }
 0x117   :  { %v69_v0 = vmul.f32 %v2441_v58, %v68_v37  ;;  %v178_v2 = vsel %vm177_vm13, %v2439_v40, %v174_v63 }
 0x118   :  { %v182_v6 = vmul.f32 %v178_v2, %v2733_v39 }
 0x119   :  { %v70_v3 = vmul.f32 0.5, %v69_v0 }
 0x11a   :  { %v187_v15 = vmul.f32 %v2779_v22, %v182_v6 }
 0x11b   :  { %v71_v4 = vsub.f32 1.5, %v70_v3 }
 0x11c   :  { %v2443_v5 = vpop.eup %2442  ;;  %v192_v19 = vadd.f32 %v2783_v30, %v187_v15 }
 0x11d   :  { %v72_v7 = vmul.f32 %v2441_v58, %v71_v4  ;;  %v78_v8 = vmul.f32 %v2443_v5, %v66_v59  ;;  %vm84_vm3 = vweird.f32 %v2443_v5 }
 0x11e   :  { %2296 = vmatmul.msk.f32.gmra.mxu1 %vm37_vm0, %v191_v25  ;;  %vm85_vm4 = vmor %vm83_vm2, %vm84_vm3 }
 0x11f   :  { %v76_v10 = vsel %vm75_vm1, %v2441_v58, %v72_v7  ;;  %v79_v11 = vmul.f32 %v2443_v5, %v78_v8 }
 0x120   :  { %v87_v13 = vmul.f32 %v76_v10, %v2742_v45 }
 0x121   :  { %v80_v16 = vmul.f32 0.5, %v79_v11 }
 0x122   :  { %v90_v17 = vmul.f32 %v89_v9, %v87_v13 }
 0x123   :  { %v81_v18 = vsub.f32 1.5, %v80_v16 }
 0x124   :  { %v93_v39 = vadd.f32 %v92_v14, %v90_v17 }
 0x125   :  { %v82_v21 = vmul.f32 %v2443_v5, %v81_v18 }
 0x126   :  { %2292 = vmatmul.msk.f32.vlgmr.msra.gmra.mxu0 %vm37_vm0, %v93_v39  ;;  %2297 = vmatmul.msk.f32.gmra.mxu1 %vm37_vm0, %v192_v19 }
 0x127   :  { %v86_v23 = vsel %vm85_vm4, %v2443_v5, %v82_v21 }
 0x128   :  { %v88_v45 = vmul.f32 %v86_v23, %v2751_v52  ;;  %v197_v52 = vperm.slane %v2763_v61, 0 }
 0x12a   :  { %v91_v12 = vmul.f32 %v89_v9, %v88_v45 }
 0x12c   :  { %v94_v24 = vadd.f32 %v92_v14, %v91_v12 }
 0x12e   :  { %2293 = vmatmul.msk.f32.gmra.mxu0 %vm37_vm0, %v94_v24 }
 0x18b   :  { %v279_v22 = vpop.f32.mrf.mxu1 }
 0x18c   :  { %v2830_v40 = vadd.f32 %v279_v22, %v233_v29 }
 0x193   :  { %v282_v31 = vpop.f32.mrf.mxu1 }
 0x194   :  { %v2819_v30 = vadd.f32 %v282_v31, %v233_v29 }
 0x196   :  { %434 = vrot.lane.b32.xlu0 %v2819_v30, %s2623_s30  ;;  %v2887_v9 = vpack.i.bf16 %v2830_v40, %v2819_v30 }
 0x19b   :  { %v285_v32 = vpop.f32.mrf.mxu1 }
 0x19c   :  { %v2822_v33 = vadd.f32 %v285_v32, %v233_v29 }
 0x19e   :  { %436 = vrot.lane.b32.xlu2 %v2822_v33, %s2623_s30 }
 0x1a3   :  { %v221_v34 = vpop.f32.mrf.mxu0  ;;  %v288_v35 = vpop.f32.mrf.mxu1 }
 0x1a4   :  { %v2826_v36 = vadd.f32 %v221_v34, %v197_v52  ;;  %v2828_v38 = vadd.f32 %v288_v35, %v233_v29 }
 0x1a6   :  { %438 = vrot.lane.b32.xlu1 %v2828_v38, %s2623_s30  ;;  %2298 = vmatpush.xpose.msk.msra.mxu2 %vm293_vm5, %v2828_v38  ;;  %v2872_v60 = vpack.i.bf16 %v2822_v33, %v2828_v38 }
 0x1a7   :  { %428 = vrot.lane.b32.xlu0 %v2826_v36, %s2623_s30  ;;  %432 = vrot.lane.b32.xlu2 %v2830_v40, %s2623_s30 }
 0x1aa   :  { %2299 = vmatpush.xpose.msk.msra.mxu2 %vm293_vm5, %v2822_v33 }
 0x1ab   :  { %v224_v61 = vpop.f32.mrf.mxu0 }
 0x1ac   :  { %v2839_v26 = vadd.f32 %v224_v61, %v197_v52 }
 0x1ae   :  { %2300 = vmatpush.xpose.msk.msra.mxu2 %vm293_vm5, %v2819_v30 }
 0x1af   :  { %430 = vrot.lane.b32.xlu2 %v2839_v26, %s2623_s30 }
 0x1b2   :  { %2301 = vmatpush.xpose.msk.msra.mxu2 %vm293_vm5, %v2830_v40 }
 0x1b5   :  { %2302 = vmatmul.msk.f32.vlgmr.msra.gmra.mxu2 %vm293_vm5, %v2826_v36 }
 0x1bd   :  { %2303 = vmatmul.msk.f32.gmra.mxu2 %vm293_vm5, %v2839_v26 }
 0x1f8   :  { %v437_v42 = vpop.permute.xlu2 %436 }
 0x201   :  { %v433_v44 = vpop.permute.xlu2 %432 }
 0x208   :  { %v435_v43 = vpop.permute.xlu0 %434 }
 0x209   :  { %v431_v47 = vpop.permute.xlu2 %430 }
 0x218   :  { %v439_v41 = vpop.permute.xlu1 %438 }
 0x219   :  { %2306 = vmatpush.xpose.msk.msrb.mxu1 %vm293_vm5, %v439_v41  ;;  %v429_v46 = vpop.permute.xlu0 %428 }
 0x21d   :  { %2307 = vmatpush.xpose.msk.msrb.mxu1 %vm293_vm5, %v437_v42 }
 0x221   :  { %2308 = vmatpush.xpose.msk.msrb.mxu1 %vm293_vm5, %v435_v43 }
 0x225   :  { %2309 = vmatpush.xpose.msk.msrb.mxu1 %vm293_vm5, %v433_v44 }
 0x228   :  { %2310 = vmatmul.msk.f32.vlgmr.msrb.gmra.mxu1 %vm293_vm5, %v429_v46 }
 0x230   :  { %2311 = vmatmul.msk.f32.gmra.mxu1 %vm293_vm5, %v431_v47 }
 0x238   :  { %v329_v48 = vpop.f32.mrf.mxu2 }
 0x239   :  { %v335_v51 = vmul.f32 0.35355338, %v329_v48 }
 0x23b   :  { %v337_v53 = vadd.f32 %v335_v51, %v2859_v49 }
 0x23d   :  { %v339_v54 = vsel %vm37_vm0, %v337_v53, -inf }
 0x23e   :  { %340 = vmax.xlane.f32.xlu0 %v339_v54 }
 0x240   :  { %v332_v55 = vpop.f32.mrf.mxu2 }
 0x241   :  { %v336_v57 = vmul.f32 0.35355338, %v332_v55 }
 0x243   :  { %v338_v58 = vadd.f32 %v336_v57, %v2866_v56 }
 0x245   :  { %v342_v59 = vsel %vm37_vm0, %v338_v58, -inf }
 0x246   :  { %343 = vmax.xlane.f32.xlu2 %v342_v59 }
 0x25e   :  { %2391 = vrot.lane.b32.xlu2 %v2872_v60, %s2624_s13 }
 0x266   :  { %574 = vrot.lane.b32.xlu2 %v2819_v30, %s2625_s14 }
 0x2a5   :  { %v469_v62 = vpop.f32.mrf.mxu1 }
 0x2a6   :  { %v475_v63 = vmul.f32 0.35355338, %v469_v62 }
 0x2a8   :  { %v477_v37 = vadd.f32 %v475_v63, %v2859_v49 }
 0x2aa   :  { %v479_v0 = vsel %vm37_vm0, %v477_v37, -inf }
 0x2ab   :  { %480 = vmax.xlane.f32.xlu1 %v479_v0 }
 0x2ad   :  { %v472_v1 = vpop.f32.mrf.mxu1 }
 0x2ae   :  { %v476_v2 = vmul.f32 0.35355338, %v472_v1 }
 0x2b0   :  { %v478_v3 = vadd.f32 %v476_v2, %v2866_v56 }
 0x2b1   :  { %v341_v4 = vpop.xlane.xlu0 %340 }
 0x2b2   :  { %v345_v5 = vsub.f32 %v337_v53, %v341_v4  ;;  %v482_v25 = vsel %vm37_vm0, %v478_v3, -inf }
 0x2b3   :  { %483 = vmax.xlane.f32.xlu0 %v482_v25 }
 0x2b4   :  { %v347_v6 = vmul.f32 1.442695, %v345_v5 }
 0x2b6   :  { %2444 = vpow2.f32 %v347_v6 }
 0x2b9   :  { %v344_v10 = vpop.xlane.xlu2 %343 }
 0x2ba   :  { %v346_v11 = vsub.f32 %v338_v58, %v344_v10 }
 0x2bc   :  { %v2881_v7 = vpop.eup %2444  ;;  %v349_v13 = vmul.f32 1.442695, %v346_v11 }
 0x2bd   :  { %v351_v8 = vsel %vm37_vm0, %v2881_v7, 0.0 }
 0x2be   :  { %352 = vadd.xlane.f32.xlu2 %v351_v8  ;;  %2446 = vpow2.f32 %v349_v13 }
 0x2c1   :  { %v2392_v17 = vpop.permute.xlu2 %2391 }
 0x2c2   :  { %v2393_v46 = vunpack.i.l.bf16 %v2392_v17  ;;  %v2394_v53 = vunpack.i.h.bf16 %v2392_v17 }
 0x2c4   :  { %2386 = vrot.lane.b32.xlu1 %v2887_v9, %s2621_s24  ;;  %v2905_v14 = vpop.eup %2446 }
 0x2c5   :  { %v354_v15 = vsel %vm37_vm0, %v2905_v14, 0.0 }
 0x2c7   :  { %2381 = vrot.lane.b32.xlu0 %v2872_v60, %s2621_s24 }
 0x2c9   :  { %v575_v45 = vpop.permute.xlu2 %574 }
 0x2cc   :  { %718 = vrot.lane.b32.xlu1 %v2828_v38, %s2626_s2 }
 0x2cf   :  { %2396 = vrot.lane.b32.xlu0 %v2887_v9, %s2624_s13 }
 0x2d4   :  { %716 = vrot.lane.b32.xlu1 %v2822_v33, %s2626_s2 }
 0x2d6   :  { %712 = vrot.lane.b32.xlu2 %v2830_v40, %s2626_s2 }
 0x2d7   :  { %578 = vrot.lane.b32.xlu0 %v2828_v38, %s2625_s14 }
 0x2df   :  { %576 = vrot.lane.b32.xlu0 %v2822_v33, %s2625_s14 }
 0x2e7   :  { %714 = vrot.lane.b32.xlu0 %v2819_v30, %s2626_s2 }
 0x2ef   :  { %568 = vrot.lane.b32.xlu0 %v2826_v36, %s2625_s14 }
 0x2f7   :  { %710 = vrot.lane.b32.xlu0 %v2839_v26, %s2626_s2 }
 0x2fe   :  { %355 = vadd.xlane.f32.xlu1 %v354_v15 }
 0x317   :  { %572 = vrot.lane.b32.xlu1 %v2830_v40, %s2625_s14 }
 0x31e   :  { %v481_v16 = vpop.xlane.xlu1 %480 }
 0x31f   :  { %v485_v18 = vsub.f32 %v477_v37, %v481_v16  ;;  %708 = vrot.lane.b32.xlu1 %v2826_v36, %s2626_s2 }
 0x321   :  { %v487_v39 = vmul.f32 1.442695, %v485_v18 }
 0x323   :  { %2448 = vpow2.f32 %v487_v39 }
 0x326   :  { %v484_v19 = vpop.xlane.xlu0 %483 }
 0x327   :  { %v486_v21 = vsub.f32 %v478_v3, %v484_v19 }
 0x329   :  { %v2912_v23 = vpop.eup %2448  ;;  %v489_v12 = vmul.f32 1.442695, %v486_v21 }
 0x32a   :  { %v491_v24 = vsel %vm37_vm0, %v2912_v23, 0.0 }
 0x32b   :  { %2450 = vpow2.f32 %v489_v12  ;;  %492 = vadd.xlane.f32.xlu2 %v491_v24 }
 0x331   :  { %v2916_v22 = vpop.eup %2450  ;;  %v353_v27 = vpop.xlane.xlu2 %352 }
 0x332   :  { %2452 = vrcp.f32 %v353_v27  ;;  %v494_v28 = vsel %vm37_vm0, %v2916_v22, 0.0  ;;  %v368_v34 = vand.u32 2147483648, %v353_v27  ;;  %v366_v38 = vand.u32 2147483647, %v353_v27 }
 0x333   :  { %495 = vadd.xlane.f32.xlu2 %v494_v28  ;;  %vm362_vm7 = vweird.f32 %v353_v27 }
 0x334   :  { %v369_v42 = vor.u32 1.1754944e-38, %v368_v34  ;;  %vm367_vm9 = vcmp.eq.f32.partialorder %v366_v38, 8.507059e+37 }
 0x336   :  { %v2387_v29 = vpop.permute.xlu1 %2386 }
 0x337   :  { %v2388_v61 = vunpack.i.l.bf16 %v2387_v29  ;;  %v2389_v43 = vunpack.i.h.bf16 %v2387_v29 }
 0x338   :  { %v2453_v31 = vpop.eup %2452 }
 0x339   :  { %v358_v30 = vmul.f32 %v2453_v31, %v353_v27  ;;  %v2382_v32 = vpop.permute.xlu0 %2381  ;;  %vm363_vm6 = vweird.f32 %v2453_v31  ;;  %v713_v63 = vpop.permute.xlu2 %712 }
 0x33a   :  { %v2383_v33 = vunpack.i.l.bf16 %v2382_v32  ;;  %v2384_v35 = vunpack.i.h.bf16 %v2382_v32  ;;  %vm364_vm8 = vmor %vm362_vm7, %vm363_vm6 }
 0x33b   :  { %v359_v52 = vsub.f32 1.0, %v358_v30 }
 0x33c   :  { %417 = vmatpush.msra.mxu3 %v2383_v33 }
 0x33d   :  { %v360_v36 = vmul.f32 %v2453_v31, %v359_v52 }
 0x33e   :  { %v719_v40 = vpop.permute.xlu1 %718  ;;  %418 = vmatpush.msra.mxu3 %v2384_v35 }
 0x33f   :  { %2322 = vmatpush.xpose.msk.msra.mxu1 %vm293_vm5, %v719_v40  ;;  %v361_v41 = vadd.f32 %v2453_v31, %v360_v36 }
 0x340   :  { %419 = vmatpush.msra.mxu3 %v2388_v61 }
 0x341   :  { %v2397_v44 = vpop.permute.xlu0 %2396  ;;  %v365_v47 = vsel %vm364_vm8, %v2453_v31, %v361_v41 }
 0x342   :  { %420 = vmatpush.msra.mxu3 %v2389_v43  ;;  %v370_v48 = vsel %vm367_vm9, %v369_v42, %v365_v47  ;;  %v2398_v55 = vunpack.i.l.bf16 %v2397_v44  ;;  %v2399_v57 = vunpack.i.h.bf16 %v2397_v44 }
 0x343   :  { %v385_v51 = vmul.f32 %v2881_v7, %v370_v48 }
 0x344   :  { %557 = vmatpush.msrb.mxu3 %v2393_v46 }
 0x345   :  { %2304 = vmatmul.msk.f32.vlgmr.msra.gmra.mxu3 %vm37_vm0, %v385_v51 }
 0x346   :  { %558 = vmatpush.msrb.mxu3 %v2394_v53  ;;  %v717_v54 = vpop.permute.xlu1 %716 }
 0x347   :  { %2323 = vmatpush.xpose.msk.msra.mxu1 %vm293_vm5, %v717_v54 }
 0x348   :  { %559 = vmatpush.msrb.mxu3 %v2398_v55 }
 0x349   :  { %v579_v58 = vpop.permute.xlu0 %578 }
 0x34a   :  { %560 = vmatpush.msrb.mxu3 %v2399_v57 }
 0x34b   :  { %570 = vrot.lane.b32.xlu2 %v2839_v26, %s2625_s14 }
 0x34c   :  { %2314 = vmatpush.xpose.msk.msra.mxu3 %vm293_vm5, %v579_v58 }
 0x351   :  { %v577_v59 = vpop.permute.xlu0 %576 }
 0x352   :  { %2315 = vmatpush.xpose.msk.msra.mxu3 %vm293_vm5, %v577_v59 }
 0x356   :  { %2316 = vmatpush.xpose.msk.msra.mxu3 %vm293_vm5, %v575_v45 }
 0x359   :  { %v715_v62 = vpop.permute.xlu0 %714 }
 0x35a   :  { %2324 = vmatpush.xpose.msk.msra.mxu1 %vm293_vm5, %v715_v62 }
 0x35e   :  { %2325 = vmatpush.xpose.msk.msra.mxu1 %vm293_vm5, %v713_v63 }
 0x361   :  { %v569_v11 = vpop.permute.xlu0 %568 }
 0x369   :  { %v711_v15 = vpop.permute.xlu0 %710 }
 0x371   :  { %v356_v37 = vpop.xlane.xlu1 %355 }
 0x372   :  { %2454 = vrcp.f32 %v356_v37  ;;  %v382_v3 = vand.u32 2147483648, %v356_v37  ;;  %v380_v26 = vand.u32 2147483647, %v356_v37  ;;  %vm376_vm11 = vweird.f32 %v356_v37 }
 0x374   :  { %v383_v25 = vor.u32 1.1754944e-38, %v382_v3  ;;  %vm381_vm13 = vcmp.eq.f32.partialorder %v380_v26, 8.507059e+37 }
 0x378   :  { %v2455_v0 = vpop.eup %2454 }
 0x379   :  { %v372_v1 = vmul.f32 %v2455_v0, %v356_v37  ;;  %vm377_vm10 = vweird.f32 %v2455_v0 }
 0x37a   :  { %vm378_vm12 = vmor %vm376_vm11, %vm377_vm10 }
 0x37b   :  { %v373_v2 = vsub.f32 1.0, %v372_v1 }
 0x37d   :  { %v374_v4 = vmul.f32 %v2455_v0, %v373_v2 }
 0x37f   :  { %v375_v5 = vadd.f32 %v2455_v0, %v374_v4 }
 0x381   :  { %v379_v6 = vsel %vm378_vm12, %v2455_v0, %v375_v5 }
 0x382   :  { %v384_v7 = vsel %vm381_vm13, %v383_v25, %v379_v6 }
 0x383   :  { %v386_v8 = vmul.f32 %v2905_v14, %v384_v7 }
 0x385   :  { %2305 = vmatmul.msk.f32.gmra.mxu3 %vm37_vm0, %v386_v8 }
 0x389   :  { %v573_v10 = vpop.permute.xlu1 %572 }
 0x38a   :  { %2317 = vmatpush.xpose.msk.msra.mxu3 %vm293_vm5, %v573_v10 }
 0x391   :  { %v709_v13 = vpop.permute.xlu1 %708 }
 0x392   :  { %2326 = vmatmul.msk.f32.vlgmr.msra.gmra.mxu1 %vm293_vm5, %v709_v13 }
 0x39a   :  { %2327 = vmatmul.msk.f32.gmra.mxu1 %vm293_vm5, %v711_v15 }
 0x39e   :  { %v493_v16 = vpop.xlane.xlu2 %492 }
 0x39f   :  { %2456 = vrcp.f32 %v493_v16  ;;  %v508_v14 = vand.u32 2147483648, %v493_v16  ;;  %v506_v45 = vand.u32 2147483647, %v493_v16  ;;  %vm502_vm15 = vweird.f32 %v493_v16 }
 0x3a1   :  { %v509_v27 = vor.u32 1.1754944e-38, %v508_v14  ;;  %vm507_vm2 = vcmp.eq.f32.partialorder %v506_v45, 8.507059e+37 }
 0x3a5   :  { %v2457_v17 = vpop.eup %2456 }
 0x3a6   :  { %v498_v18 = vmul.f32 %v2457_v17, %v493_v16  ;;  %v496_v39 = vpop.xlane.xlu2 %495  ;;  %vm503_vm14 = vweird.f32 %v2457_v17 }
 0x3a7   :  { %2458 = vrcp.f32 %v496_v39  ;;  %vm504_vm1 = vmor %vm502_vm15, %vm503_vm14  ;;  %v522_v33 = vand.u32 2147483648, %v496_v39  ;;  %v520_v34 = vand.u32 2147483647, %v496_v39  ;;  %vm516_vm4 = vweird.f32 %v496_v39 }
 0x3a8   :  { %v499_v19 = vsub.f32 1.0, %v498_v18 }
 0x3a9   :  { %v523_v36 = vor.u32 1.1754944e-38, %v522_v33  ;;  %vm521_vm7 = vcmp.eq.f32.partialorder %v520_v34, 8.507059e+37 }
 0x3aa   :  { %v500_v21 = vmul.f32 %v2457_v17, %v499_v19 }
 0x3ac   :  { %v501_v12 = vadd.f32 %v2457_v17, %v500_v21 }
 0x3ad   :  { %v2459_v24 = vpop.eup %2458 }
 0x3ae   :  { %v512_v28 = vmul.f32 %v2459_v24, %v496_v39  ;;  %v505_v29 = vsel %vm504_vm1, %v2457_v17, %v501_v12  ;;  %vm517_vm3 = vweird.f32 %v2459_v24 }
 0x3af   :  { %v510_v31 = vsel %vm507_vm2, %v509_v27, %v505_v29  ;;  %vm518_vm6 = vmor %vm516_vm4, %vm517_vm3 }
 0x3b0   :  { %v513_v30 = vsub.f32 1.0, %v512_v28  ;;  %v525_v32 = vmul.f32 %v2912_v23, %v510_v31  ;;  %v571_v23 = vpop.permute.xlu2 %570 }
 0x3b2   :  { %v514_v52 = vmul.f32 %v2459_v24, %v513_v30  ;;  %2312 = vmatmul.msk.f32.vlgmr.msrb.gmra.mxu3 %vm37_vm0, %v525_v32 }
 0x3b4   :  { %v515_v35 = vadd.f32 %v2459_v24, %v514_v52 }
 0x3b6   :  { %v519_v38 = vsel %vm518_vm6, %v2459_v24, %v515_v35 }
 0x3b7   :  { %v524_v40 = vsel %vm521_vm7, %v523_v36, %v519_v38 }
 0x3b8   :  { %v526_v61 = vmul.f32 %v2916_v22, %v524_v40 }
 0x3ba   :  { %2313 = vmatmul.msk.f32.gmra.mxu3 %vm37_vm0, %v526_v61 }
 0x3c2   :  { %2318 = vmatmul.msk.f32.vlgmr.msra.gmra.mxu3 %vm293_vm5, %v569_v11 }
 0x3c8   :  { %v2946_v51 = vpop.f32.mrf.mxu3 }
 0x3ca   :  { %2319 = vmatmul.msk.f32.gmra.mxu3 %vm293_vm5, %v571_v23 }
 0x408   :  { %v2948_v53 = vpop.f32.mrf.mxu3 }
 0x40f   :  { %v749_v41 = vpop.f32.mrf.mxu1 }
 0x410   :  { %v755_v42 = vmul.f32 0.35355338, %v749_v41 }
 0x412   :  { %v757_v43 = vadd.f32 %v755_v42, %v2859_v49 }
 0x414   :  { %v759_v44 = vsel %vm37_vm0, %v757_v43, -inf }
 0x415   :  { %760 = vmax.xlane.f32.xlu1 %v759_v44 }
 0x417   :  { %v752_v46 = vpop.f32.mrf.mxu1 }
 0x418   :  { %v756_v47 = vmul.f32 0.35355338, %v752_v46 }
 0x41a   :  { %v758_v48 = vadd.f32 %v756_v47, %v2866_v56 }
 0x41c   :  { %v762_v22 = vsel %vm37_vm0, %v758_v48, -inf }
 0x41d   :  { %763 = vmax.xlane.f32.xlu0 %v762_v22 }
 0x431   :  { %2401 = vrot.lane.b32.xlu0 %v2872_v60, %s2627_s15 }
 0x435   :  { %v562_v54 = vpop.f32.mrf.mxu3 }
 0x43d   :  { %v565_v55 = vpop.f32.mrf.mxu3 }
 0x445   :  { %v609_v57 = vpop.f32.mrf.mxu3 }
 0x446   :  { %v615_v58 = vmul.f32 0.35355338, %v609_v57 }
 0x448   :  { %v617_v59 = vadd.f32 %v615_v58, %v2859_v49 }
 0x44a   :  { %v619_v62 = vsel %vm37_vm0, %v617_v59, -inf }
 0x44b   :  { %620 = vmax.xlane.f32.xlu2 %v619_v62 }
 0x44d   :  { %v612_v63 = vpop.f32.mrf.mxu3 }
 0x44e   :  { %v616_v37 = vmul.f32 0.35355338, %v612_v63 }
 0x450   :  { %v618_v0 = vadd.f32 %v616_v37, %v2866_v56 }
 0x452   :  { %v622_v1 = vsel %vm37_vm0, %v618_v0, -inf }
 0x453   :  { %623 = vmax.xlane.f32.xlu1 %v622_v1 }
 0x488   :  { %v761_v2 = vpop.xlane.xlu1 %760 }
 0x489   :  { %v765_v3 = vsub.f32 %v757_v43, %v761_v2 }
 0x48b   :  { %v767_v4 = vmul.f32 1.442695, %v765_v3 }
 0x48d   :  { %2460 = vpow2.f32 %v767_v4 }
 0x490   :  { %v764_v26 = vpop.xlane.xlu0 %763 }
 0x491   :  { %v766_v5 = vsub.f32 %v758_v48, %v764_v26 }
 0x493   :  { %v2956_v25 = vpop.eup %2460  ;;  %v769_v6 = vmul.f32 1.442695, %v766_v5 }
 0x494   :  { %v771_v49 = vsel %vm37_vm0, %v2956_v25, 0.0 }
 0x495   :  { %2462 = vpow2.f32 %v769_v6  ;;  %772 = vadd.xlane.f32.xlu2 %v771_v49 }
 0x49b   :  { %v2960_v7 = vpop.eup %2462 }
 0x49c   :  { %v774_v56 = vsel %vm37_vm0, %v2960_v7, 0.0 }
 0x49d   :  { %775 = vadd.xlane.f32.xlu1 %v774_v56 }
 0x4a3   :  { %v2402_v8 = vpop.permute.xlu0 %2401 }
 0x4a4   :  { %v2403_v10 = vunpack.i.l.bf16 %v2402_v8  ;;  %v2404_v11 = vunpack.i.h.bf16 %v2402_v8 }
 0x4a6   :  { %837 = vmatpush.msrb.mxu3 %v2403_v10 }
 0x4a8   :  { %838 = vmatpush.msrb.mxu3 %v2404_v11 }
 0x4b6   :  { %2406 = vrot.lane.b32.xlu1 %v2887_v9, %s2627_s15 }
 0x4be   :  { %v621_v13 = vpop.xlane.xlu2 %620 }
 0x4bf   :  { %v625_v15 = vsub.f32 %v617_v59, %v621_v13 }
 0x4c1   :  { %v627_v16 = vmul.f32 1.442695, %v625_v15 }
 0x4c3   :  { %2464 = vpow2.f32 %v627_v16 }
 0x4c6   :  { %v624_v17 = vpop.xlane.xlu1 %623 }
 0x4c7   :  { %v626_v18 = vsub.f32 %v618_v0, %v624_v17 }
 0x4c9   :  { %v2966_v39 = vpop.eup %2464  ;;  %v629_v19 = vmul.f32 1.442695, %v626_v18 }
 0x4ca   :  { %v631_v14 = vsel %vm37_vm0, %v2966_v39, 0.0 }
 0x4cb   :  { %2466 = vpow2.f32 %v629_v19  ;;  %632 = vadd.xlane.f32.xlu0 %v631_v14  ;;  %v2564_v14 = vld [vmem:[%s4283_s4 + $0x18] sm:$0xff] }
 0x4d1   :  { %v2970_v21 = vpop.eup %2466 }
 0x4d2   :  { %v634_v45 = vsel %vm37_vm0, %v2970_v21, 0.0 }
 0x4d3   :  { %635 = vadd.xlane.f32.xlu2 %v634_v45 }
 0x4df   :  { %2416 = vrot.lane.b32.xlu0 %v2887_v9, %s2628_s16 }
 0x4e7   :  { %850 = vrot.lane.b32.xlu0 %v562_v54, %s2629_s1 }
 0x4eb   :  { %2411 = vrot.lane.b32.xlu2 %v2872_v60, %s2628_s16 }
 0x4f3   :  { %2426 = vrot.lane.b32.xlu2 %v2748_v50, %s2622_s27 }
 0x4fb   :  { %852 = vrot.lane.b32.xlu2 %v565_v55, %s2629_s1 }
 0x508   :  { %v773_v12 = vpop.xlane.xlu2 %772 }
 0x509   :  { %2468 = vrcp.f32 %v773_v12  ;;  %v788_v52 = vand.u32 2147483648, %v773_v12  ;;  %vm782_vm9 = vweird.f32 %v773_v12  ;;  %v786_v60 = vand.u32 2147483647, %v773_v12 }
 0x50b   :  { %v789_v35 = vor.u32 1.1754944e-38, %v788_v52  ;;  %vm787_vm11 = vcmp.eq.f32.partialorder %v786_v60, 8.507059e+37 }
 0x50f   :  { %v2469_v27 = vpop.eup %2468 }
 0x510   :  { %v776_v24 = vpop.xlane.xlu1 %775  ;;  %v778_v28 = vmul.f32 %v2469_v27, %v773_v12  ;;  %vm783_vm8 = vweird.f32 %v2469_v27 }
 0x511   :  { %2470 = vrcp.f32 %v776_v24  ;;  %vm784_vm10 = vmor %vm782_vm9, %vm783_vm8  ;;  %v802_v23 = vand.u32 2147483648, %v776_v24  ;;  %vm796_vm13 = vweird.f32 %v776_v24  ;;  %v800_v43 = vand.u32 2147483647, %v776_v24 }
 0x512   :  { %v779_v29 = vsub.f32 1.0, %v778_v28 }
 0x513   :  { %v803_v46 = vor.u32 1.1754944e-38, %v802_v23  ;;  %vm801_vm15 = vcmp.eq.f32.partialorder %v800_v43, 8.507059e+37 }
 0x514   :  { %v780_v30 = vmul.f32 %v2469_v27, %v779_v29 }
 0x516   :  { %v781_v33 = vadd.f32 %v2469_v27, %v780_v30 }
 0x517   :  { %v2471_v31 = vpop.eup %2470 }
 0x518   :  { %v792_v32 = vmul.f32 %v2471_v31, %v776_v24  ;;  %v785_v34 = vsel %vm784_vm10, %v2469_v27, %v781_v33  ;;  %vm797_vm12 = vweird.f32 %v2471_v31  ;;  %vm874_vm10 = vcmask 130048  }
 0x519   :  { %v790_v38 = vsel %vm787_vm11, %v789_v35, %v785_v34  ;;  %vm798_vm14 = vmor %vm796_vm13, %vm797_vm12  ;;  %vm877_vm11 = vcmask 195584  }
 0x51a   :  { %v793_v9 = vsub.f32 1.0, %v792_v32  ;;  %v805_v42 = vmul.f32 %v2956_v25, %v790_v38 }
 0x51c   :  { %v794_v50 = vmul.f32 %v2471_v31, %v793_v9 }
 0x51e   :  { %v795_v61 = vadd.f32 %v2471_v31, %v794_v50 }
 0x520   :  { %v799_v44 = vsel %vm798_vm14, %v2471_v31, %v795_v61 }
 0x521   :  { %v804_v47 = vsel %vm801_vm15, %v803_v46, %v799_v44  ;;  %v2567_v46 = vld [vmem:[%s4282_s0] sm:$0xff] }
 0x522   :  { %v806_v48 = vmul.f32 %v2960_v7, %v804_v47 }
 0x528   :  { %v2407_v36 = vpop.permute.xlu1 %2406 }
 0x529   :  { %v2408_v40 = vunpack.i.l.bf16 %v2407_v36  ;;  %v2409_v41 = vunpack.i.h.bf16 %v2407_v36 }
 0x52b   :  { %839 = vmatpush.msrb.mxu3 %v2408_v40 }
 0x52d   :  { %840 = vmatpush.msrb.mxu3 %v2409_v41 }
 0x52e   :  { %2328 = vmatmul.msk.f32.vlgmr.msrb.gmra.mxu3 %vm37_vm0, %v805_v42  ;;  %v2566_v42 = vld [vmem:[%s4284_s3 + $0x8] sm:$0xff] }
 0x536   :  { %2329 = vmatmul.msk.f32.gmra.mxu3 %vm37_vm0, %v806_v48 }
 0x53e   :  { %v633_v22 = vpop.xlane.xlu0 %632 }
 0x53f   :  { %2472 = vrcp.f32 %v633_v22  ;;  %v648_v37 = vand.u32 2147483648, %v633_v22  ;;  %vm642_vm2 = vweird.f32 %v633_v22  ;;  %v646_v0 = vand.u32 2147483647, %v633_v22 }
 0x541   :  { %v649_v5 = vor.u32 1.1754944e-38, %v648_v37  ;;  %vm647_vm4 = vcmp.eq.f32.partialorder %v646_v0, 8.507059e+37 }
 0x545   :  { %v2473_v54 = vpop.eup %2472 }
 0x546   :  { %v638_v55 = vmul.f32 %v2473_v54, %v633_v22  ;;  %v636_v57 = vpop.xlane.xlu2 %635  ;;  %vm643_vm1 = vweird.f32 %v2473_v54 }
 0x547   :  { %2474 = vrcp.f32 %v636_v57  ;;  %vm644_vm3 = vmor %vm642_vm2, %vm643_vm1  ;;  %v662_v10 = vand.u32 2147483648, %v636_v57  ;;  %vm656_vm7 = vweird.f32 %v636_v57  ;;  %v660_v15 = vand.u32 2147483647, %v636_v57 }
 0x548   :  { %v639_v58 = vsub.f32 1.0, %v638_v55 }
 0x549   :  { %v663_v17 = vor.u32 1.1754944e-38, %v662_v10  ;;  %vm661_vm9 = vcmp.eq.f32.partialorder %v660_v15, 8.507059e+37  ;;  %v974_v10 = vld [vmem:[%s4286_s5] sm:$0xff]  ;;  %v3087_v15 = vld [vmem:[%s4286_s5 + $0x138] sm:$0xff] }
 0x54a   :  { %v640_v59 = vmul.f32 %v2473_v54, %v639_v58 }
 0x54c   :  { %v641_v62 = vadd.f32 %v2473_v54, %v640_v59 }
 0x54d   :  { %v2475_v63 = vpop.eup %2474 }
 0x54e   :  { %v652_v1 = vmul.f32 %v2475_v63, %v636_v57  ;;  %v2412_v2 = vpop.permute.xlu2 %2411  ;;  %v645_v26 = vsel %vm644_vm3, %v2473_v54, %v641_v62  ;;  %vm657_vm6 = vweird.f32 %v2475_v63  ;;  %v2568_v54 = vld [vmem:[%s4282_s0 + $0x8] sm:$0xff] }
 0x54f   :  { %v2413_v3 = vunpack.i.l.bf16 %v2412_v2  ;;  %v2414_v6 = vunpack.i.h.bf16 %v2412_v2  ;;  %v650_v56 = vsel %vm647_vm4, %v649_v5, %v645_v26  ;;  %vm658_vm8 = vmor %vm656_vm7, %vm657_vm6  ;;  %v3033_v26 = vld [vmem:[%s4286_s5 + $0x1c8] sm:$0xff]  ;;  %v3039_v5 = vld [vmem:[%s4286_s5 + $0x1b0] sm:$0xff] }
 0x550   :  { %v653_v4 = vsub.f32 1.0, %v652_v1  ;;  %v665_v13 = vmul.f32 %v2966_v39, %v650_v56  ;;  %v2565_v39 = vld [vmem:[%s4283_s4 + $0x10] sm:$0xff]  ;;  %v977_v56 = vld [vmem:[%s4286_s5 + $0x18] sm:$0xff] }
 0x551   :  { %v2417_v25 = vpop.permute.xlu0 %2416  ;;  %697 = vmatpush.msrb.mxu0 %v2413_v3  ;;  %v2420_v45 = vpack.i.bf16 %v2565_v39, %v2564_v14  ;;  %v3117_v14 = vld [vmem:[%s4286_s5 + $0x188] sm:$0xff]  ;;  %v3123_v39 = vld [vmem:[%s4286_s5 + $0xf0] sm:$0xff] }
 0x552   :  { %v654_v49 = vmul.f32 %v2475_v63, %v653_v4  ;;  %v2418_v7 = vunpack.i.l.bf16 %v2417_v25  ;;  %v2419_v11 = vunpack.i.h.bf16 %v2417_v25  ;;  %v983_v25 = vld [vmem:[%s4286_s5 + $0x48] sm:$0xff] }
 0x553   :  { %698 = vmatpush.msrb.mxu0 %v2414_v6  ;;  %2421 = vrot.lane.b32.xlu1 %v2420_v45, %s2622_s27  ;;  %v3048_v6 = vld [vmem:[%s4286_s5 + $0x198] sm:$0xff]  ;;  %v984_v45 = vld [vmem:[%s4286_s5 + $0x50] sm:$0xff] }
 0x554   :  { %v655_v8 = vadd.f32 %v2475_v63, %v654_v49  ;;  %v980_v49 = vld [vmem:[%s4286_s5 + $0x30] sm:$0xff]  ;;  %1088 = vmatpush.msrb.mxu1 %v984_v45 }
 0x555   :  { %699 = vmatpush.msrb.mxu0 %v2418_v7  ;;  %v3057_v7 = vld [vmem:[%s4286_s5 + $0x180] sm:$0xff] }
 0x556   :  { %v659_v16 = vsel %vm658_vm8, %v2475_v63, %v655_v8  ;;  %v2427_v30 = vpop.permute.xlu2 %2426  ;;  %v3066_v8 = vld [vmem:[%s4286_s5 + $0x168] sm:$0xff] }
 0x557   :  { %700 = vmatpush.msrb.mxu0 %v2419_v11  ;;  %v664_v18 = vsel %vm661_vm9, %v663_v17, %v659_v16  ;;  %v2428_v32 = vunpack.i.l.bf16 %v2427_v30  ;;  %v2429_v33 = vunpack.i.h.bf16 %v2427_v30  ;;  %v3075_v11 = vld [vmem:[%s4286_s5 + $0x150] sm:$0xff]  ;;  %v3093_v16 = vld [vmem:[%s4286_s5 + $0x1b8] sm:$0xff]  ;;  %v3099_v17 = vld [vmem:[%s4286_s5 + $0x120] sm:$0xff] }
 0x558   :  { %2320 = vmatmul.msk.f32.vlgmr.msrb.gmra.mxu0 %vm37_vm0, %v665_v13  ;;  %v666_v19 = vmul.f32 %v2970_v21, %v664_v18  ;;  %v3081_v13 = vld [vmem:[%s4286_s5 + $0x1d0] sm:$0xff]  ;;  %v3105_v18 = vld [vmem:[%s4286_s5 + $0x1a0] sm:$0xff] }
 0x559   :  { %v851_v9 = vpop.permute.xlu0 %850  ;;  %1065 = vmatpush.msra.mxu0 %v983_v25  ;;  %v978_v30 = vld [vmem:[%s4286_s5 + $0x20] sm:$0xff] }
 0x55a   :  { %v872_v60 = vsel %vm293_vm5, %v2946_v51, %v851_v9  ;;  %v880_v51 = vperm.slane %v2566_v42, 3  ;;  %v3176_v9 = vld [vmem:[%s4286_s5 + $0xa8] sm:$0xff]  ;;  %v3313_v25 = vld [vmem:[%s4286_s5 + $0x160] sm:$0xff] }
 0x55b   :  { %1066 = vmatpush.msra.mxu0 %v980_v49  ;;  %4346 = vst [vmem:[#allocation5_spill] sm:$0xff] %v3176_v9 }
 0x55d   :  { %1067 = vmatpush.msra.mxu0 %v977_v56  ;;  %v3321_v56 = vld [vmem:[%s4286_s5 + $0x148] sm:$0xff] }
 0x55e   :  { %v853_v36 = vpop.permute.xlu2 %852 }
 0x55f   :  { %v873_v38 = vsel %vm293_vm5, %v2948_v53, %v853_v36  ;;  %1068 = vmatpush.msra.mxu0 %v974_v10  ;;  %v3206_v36 = vld [vmem:[%s4286_s5 + $0x78] sm:$0xff] }
 0x560   :  { %2321 = vmatmul.msk.f32.gmra.mxu0 %vm37_vm0, %v666_v19  ;;  %v3111_v19 = vld [vmem:[%s4286_s5 + $0x108] sm:$0xff]  ;;  %4348 = vst [vmem:[#allocation7_spill] sm:$0xff] %v3206_v36 }
 0x561   :  { %1168 = vmatpush.msrb.mxu0 %v3081_v13 }
 0x563   :  { %1169 = vmatpush.msrb.mxu0 %v3093_v16 }
 0x565   :  { %1170 = vmatpush.msrb.mxu0 %v3105_v18 }
 0x567   :  { %1171 = vmatpush.msrb.mxu0 %v3117_v14 }
 0x5b1   :  { %v842_v12 = vpop.f32.mrf.mxu3 }
 0x5b2   :  { %866 = vrot.lane.b32.xlu0 %v842_v12, %s2630_s21  ;;  %v985_v12 = vld [vmem:[%s4286_s5 + $0x58] sm:$0xff] }
 0x5b3   :  { %1111 = vmatpush.msra.mxu3 %v985_v12  ;;  %v3329_v12 = vld [vmem:[%s4286_s5 + $0x130] sm:$0xff] }
 0x5b9   :  { %v845_v24 = vpop.f32.mrf.mxu3 }
 0x5ba   :  { %868 = vrot.lane.b32.xlu0 %v845_v24, %s2630_s21  ;;  %v3135_v24 = vld [vmem:[%s4286_s5 + $0x170] sm:$0xff] }
 0x5bb   :  { %1172 = vmatpush.msrb.mxu0 %v3135_v24 }
 0x5c5   :  { %v2422_v28 = vpop.permute.xlu1 %2421 }
 0x5c6   :  { %v2423_v29 = vunpack.i.l.bf16 %v2422_v28  ;;  %v2424_v31 = vunpack.i.h.bf16 %v2422_v28  ;;  %v982_v28 = vld [vmem:[%s4286_s5 + $0x40] sm:$0xff] }
 0x5c7   :  { %1112 = vmatpush.msra.mxu3 %v982_v28 }
 0x5c8   :  { %911 = vmatpush.msrb.mxu2 %v2423_v29  ;;  %v3153_v29 = vld [vmem:[%s4286_s5 + $0x158] sm:$0xff] }
 0x5c9   :  { %1173 = vmatpush.msrb.mxu0 %v3153_v29 }
 0x5ca   :  { %912 = vmatpush.msrb.mxu2 %v2424_v31  ;;  %v3158_v31 = vld [vmem:[%s4286_s5 + $0xc0] sm:$0xff] }
 0x5cc   :  { %913 = vmatpush.msrb.mxu2 %v2428_v32  ;;  %v979_v32 = vld [vmem:[%s4286_s5 + $0x28] sm:$0xff] }
 0x5cd   :  { %1113 = vmatpush.msra.mxu3 %v979_v32 }
 0x5ce   :  { %914 = vmatpush.msrb.mxu2 %v2429_v33  ;;  %v3171_v33 = vld [vmem:[%s4286_s5 + $0x140] sm:$0xff] }
 0x5cf   :  { %1174 = vmatpush.msrb.mxu0 %v3171_v33 }
 0x5d0   :  { %1148 = vmatpush.msra.mxu2 %v3033_v26 }
 0x5d2   :  { %1149 = vmatpush.msra.mxu2 %v3039_v5 }
 0x5d4   :  { %1150 = vmatpush.msra.mxu2 %v3048_v6 }
 0x5d5   :  { %v702_v27 = vpop.f32.mrf.mxu0 }
 0x5d6   :  { %858 = vrot.lane.b32.xlu1 %v702_v27, %s2631_s22  ;;  %1151 = vmatpush.msra.mxu2 %v3057_v7  ;;  %v3140_v27 = vld [vmem:[%s4286_s5 + $0xd8] sm:$0xff] }
 0x5d8   :  { %1152 = vmatpush.msra.mxu2 %v3066_v8 }
 0x5da   :  { %1153 = vmatpush.msra.mxu2 %v3075_v11 }
 0x5dc   :  { %1154 = vmatpush.msra.mxu2 %v3087_v15 }
 0x5dd   :  { %v705_v21 = vpop.f32.mrf.mxu0 }
 0x5de   :  { %860 = vrot.lane.b32.xlu1 %v705_v21, %s2631_s22  ;;  %1155 = vmatpush.msra.mxu2 %v3099_v17  ;;  %v981_v21 = vld [vmem:[%s4286_s5 + $0x38] sm:$0xff] }
 0x5df   :  { %1089 = vmatpush.msrb.mxu1 %v981_v21 }
 0x5e0   :  { %1156 = vmatpush.msra.mxu2 %v3111_v19 }
 0x5e1   :  { %1090 = vmatpush.msrb.mxu1 %v978_v30  ;;  %v2569_v30 = vld [vmem:[%s4284_s3] sm:$0xff] }
 0x5e2   :  { %1157 = vmatpush.msra.mxu2 %v3123_v39  ;;  %v968_v32 = vperm.slane %v2569_v30, 4 }
 0x5e4   :  { %1158 = vmatpush.msra.mxu2 %v3140_v27 }
 0x5e6   :  { %1159 = vmatpush.msra.mxu2 %v3158_v31 }
 0x5e8   :  { %1160 = vmatpush.msra.mxu2 %v3176_v9 }
 0x624   :  { %v867_v52 = vpop.permute.xlu0 %866 }
 0x62c   :  { %v869_v61 = vpop.permute.xlu0 %868 }
 0x648   :  { %v859_v34 = vpop.permute.xlu1 %858 }
 0x649   :  { %v875_v50 = vsel %vm874_vm10, %v872_v60, %v859_v34  ;;  %v976_v60 = vld [vmem:[%s4286_s5 + $0x10] sm:$0xff]  ;;  %v3189_v34 = vld [vmem:[%s4286_s5 + $0x128] sm:$0xff] }
 0x64a   :  { %v878_v35 = vsel %vm877_vm11, %v875_v50, %v867_v52  ;;  %v975_v52 = vld [vmem:[%s4286_s5 + $0x8] sm:$0xff]  ;;  %1114 = vmatpush.msra.mxu3 %v976_v60  ;;  %v3194_v50 = vld [vmem:[%s4286_s5 + $0x90] sm:$0xff]  ;;  %1175 = vmatpush.msrb.mxu0 %v3189_v34 }
 0x64b   :  { %2330 = vmatmul.msk.f32.vlgmr.msrb.gmra.mxu2 %vm37_vm0, %v878_v35  ;;  %1091 = vmatpush.msrb.mxu1 %v975_v52  ;;  %4347 = vst [vmem:[#allocation6_spill] sm:$0xff] %v3194_v50  ;;  %v3201_v35 = vld [vmem:[%s4286_s5 + $0x110] sm:$0xff]  ;;  %v3342_v52 = vld [vmem:[%s4286_s5 + $0x118] sm:$0xff] }
 0x64c   :  { %1161 = vmatpush.msra.mxu2 %v3194_v50  ;;  %1264 = vmatpush.msrb.mxu3 %v3033_v26 }
 0x64d   :  { %1176 = vmatpush.msrb.mxu0 %v3201_v35 }
 0x64e   :  { %1162 = vmatpush.msra.mxu2 %v3206_v36  ;;  %1265 = vmatpush.msrb.mxu3 %v3039_v5 }
 0x650   :  { %v861_v40 = vpop.permute.xlu1 %860  ;;  %1266 = vmatpush.msrb.mxu3 %v3048_v6 }
 0x651   :  { %v876_v23 = vsel %vm874_vm10, %v873_v38, %v861_v40  ;;  %v3211_v38 = vld [vmem:[%s4286_s5 + $0xf8] sm:$0xff]  ;;  %v3216_v40 = vld [vmem:[%s4286_s5 + $0x60] sm:$0xff] }
 0x652   :  { %v879_v41 = vsel %vm877_vm11, %v876_v23, %v869_v61  ;;  %4349 = vst [vmem:[#allocation8_spill] sm:$0xff] %v3216_v40  ;;  %1177 = vmatpush.msrb.mxu0 %v3211_v38  ;;  %1163 = vmatpush.msra.mxu2 %v3216_v40 }
 0x653   :  { %2331 = vmatmul.msk.f32.gmra.mxu2 %vm37_vm0, %v879_v41  ;;  %v3225_v41 = vld [vmem:[%s4286_s5 + $0xe0] sm:$0xff]  ;;  %1267 = vmatpush.msrb.mxu3 %v3057_v7 }
 0x654   :  { %1178 = vmatpush.msrb.mxu0 %v3225_v41  ;;  %1284 = vmatpush.msrb.mxu2 %v3081_v13 }
 0x655   :  { %1268 = vmatpush.msrb.mxu3 %v3066_v8 }
 0x656   :  { %1285 = vmatpush.msrb.mxu2 %v3093_v16 }
 0x657   :  { %1269 = vmatpush.msrb.mxu3 %v3075_v11 }
 0x658   :  { %1286 = vmatpush.msrb.mxu2 %v3105_v18 }
 0x659   :  { %1270 = vmatpush.msrb.mxu3 %v3087_v15 }
 0x65a   :  { %1287 = vmatpush.msrb.mxu2 %v3117_v14 }
 0x65b   :  { %1271 = vmatpush.msrb.mxu3 %v3099_v17 }
 0x65c   :  { %1288 = vmatpush.msrb.mxu2 %v3135_v24 }
 0x65d   :  { %1272 = vmatpush.msrb.mxu3 %v3111_v19 }
 0x65e   :  { %1289 = vmatpush.msrb.mxu2 %v3153_v29 }
 0x65f   :  { %1273 = vmatpush.msrb.mxu3 %v3123_v39 }
 0x660   :  { %1290 = vmatpush.msrb.mxu2 %v3171_v33 }
 0x661   :  { %1274 = vmatpush.msrb.mxu3 %v3140_v27 }
 0x662   :  { %1291 = vmatpush.msrb.mxu2 %v3189_v34 }
 0x663   :  { %1275 = vmatpush.msrb.mxu3 %v3158_v31 }
 0x664   :  { %1292 = vmatpush.msrb.mxu2 %v3201_v35 }
 0x665   :  { %1276 = vmatpush.msrb.mxu3 %v3176_v9 }
 0x666   :  { %1293 = vmatpush.msrb.mxu2 %v3211_v38 }
 0x667   :  { %1277 = vmatpush.msrb.mxu3 %v3194_v50 }
 0x668   :  { %1294 = vmatpush.msrb.mxu2 %v3225_v41 }
 0x669   :  { %1278 = vmatpush.msrb.mxu3 %v3206_v36 }
 0x66b   :  { %1279 = vmatpush.msrb.mxu3 %v3216_v40 }
 0x6ce   :  { %v916_v43 = vpop.f32.mrf.mxu2 }
 0x6cf   :  { %v917_v44 = vadd.f32 %v916_v43, %v880_v51  ;;  %v3236_v43 = vld [vmem:[%s4286_s5 + $0xc8] sm:$0xff] }
 0x6d0   :  { %1179 = vmatpush.msrb.mxu0 %v3236_v43  ;;  %1295 = vmatpush.msrb.mxu2 %v3236_v43 }
 0x6d1   :  { %v3005_v47 = vadd.f32 %v2567_v46, %v917_v44  ;;  %v3247_v44 = vld [vmem:[%s4286_s5 + $0xb0] sm:$0xff]  ;;  %v3252_v46 = vld [vmem:[%s4286_s5 + $0x1d8] sm:$0xff] }
 0x6d2   :  { %4350 = vst [vmem:[#allocation9_spill] sm:$0xff] %v3247_v44  ;;  %1188 = vmatpush.msra.mxu1 %v3252_v46  ;;  %1180 = vmatpush.msrb.mxu0 %v3247_v44 }
 0x6d3   :  { %4344 = vst [vmem:[#allocation3_spill] sm:$0xff] %v3005_v47  ;;  %v924_v53 = vsel %vm37_vm0, %v3005_v47, 0.0  ;;  %1296 = vmatpush.msrb.mxu2 %v3247_v44 }
 0x6d4   :  { %925 = vadd.xlane.f32.xlu2 %v924_v53  ;;  %v3259_v53 = vld [vmem:[%s4286_s5 + $0x98] sm:$0xff] }
 0x6d5   :  { %4351 = vst [vmem:[#allocation10_spill] sm:$0xff] %v3259_v53  ;;  %1181 = vmatpush.msrb.mxu0 %v3259_v53  ;;  %1297 = vmatpush.msrb.mxu2 %v3259_v53 }
 0x6d6   :  { %v919_v48 = vpop.f32.mrf.mxu2 }
 0x6d7   :  { %v920_v22 = vadd.f32 %v919_v48, %v880_v51  ;;  %v2632_v51 = vmov 0.0   ;;  %v3264_v48 = vld [vmem:[%s4286_s5 + $0x1c0] sm:$0xff] }
 0x6d8   :  { %1164 = vmatmul.f32.vlgmr.msra.gmra.mxu2 %v2632_v51  ;;  %1189 = vmatpush.msra.mxu1 %v3264_v48 }
 0x6d9   :  { %v3012_v55 = vadd.f32 %v2568_v54, %v920_v22  ;;  %v3271_v54 = vld [vmem:[%s4286_s5 + $0x1a8] sm:$0xff] }
 0x6da   :  { %1190 = vmatpush.msra.mxu1 %v3271_v54 }
 0x6db   :  { %4345 = vst [vmem:[#allocation4_spill] sm:$0xff] %v3012_v55  ;;  %v927_v57 = vsel %vm37_vm0, %v3012_v55, 0.0 }
 0x6dc   :  { %928 = vadd.xlane.f32.xlu1 %v927_v57 }
 0x747   :  { %v926_v58 = vpop.xlane.xlu2 %925 }
 0x748   :  { %v930_v59 = vmul.f32 %v926_v58, %v2709_v20  ;;  %v3279_v58 = vld [vmem:[%s4286_s5 + $0x80] sm:$0xff] }
 0x749   :  { %4352 = vst [vmem:[#allocation11_spill] sm:$0xff] %v3279_v58  ;;  %1182 = vmatpush.msrb.mxu0 %v3279_v58  ;;  %1298 = vmatpush.msrb.mxu2 %v3279_v58 }
 0x74a   :  { %v3018_v62 = vsub.f32 %v3005_v47, %v930_v59 }
 0x74c   :  { %v934_v63 = vmul.f32 %v3018_v62, %v3018_v62 }
 0x74e   :  { %v936_v37 = vsel %vm37_vm0, %v934_v63, 0.0 }
 0x74f   :  { %937 = vadd.xlane.f32.xlu0 %v936_v37  ;;  %v929_v0 = vpop.xlane.xlu1 %928  ;;  %v3290_v37 = vld [vmem:[%s4286_s5 + $0x68] sm:$0xff] }
 0x750   :  { %v931_v1 = vmul.f32 %v929_v0, %v2709_v20  ;;  %4353 = vst [vmem:[#allocation12_spill] sm:$0xff] %v3290_v37  ;;  %1183 = vmatpush.msrb.mxu0 %v3290_v37  ;;  %1299 = vmatpush.msrb.mxu2 %v3290_v37 }
 0x752   :  { %v3025_v2 = vsub.f32 %v3012_v55, %v931_v1  ;;  %v3300_v1 = vld [vmem:[%s4286_s5 + $0x190] sm:$0xff]  ;;  %1426 = vmatpush.msra.mxu2 %v3252_v46 }
 0x753   :  { %1191 = vmatpush.msra.mxu1 %v3300_v1 }
 0x754   :  { %v935_v3 = vmul.f32 %v3025_v2, %v3025_v2  ;;  %1427 = vmatpush.msra.mxu2 %v3264_v48 }
 0x756   :  { %v939_v4 = vsel %vm37_vm0, %v935_v3, 0.0  ;;  %v3305_v3 = vld [vmem:[%s4286_s5 + $0x178] sm:$0xff]  ;;  %1428 = vmatpush.msra.mxu2 %v3271_v54 }
 0x757   :  { %940 = vadd.xlane.f32.xlu2 %v939_v4  ;;  %1192 = vmatpush.msra.mxu1 %v3305_v3 }
 0x758   :  { %1429 = vmatpush.msra.mxu2 %v3300_v1 }
 0x759   :  { %1193 = vmatpush.msra.mxu1 %v3313_v25 }
 0x75a   :  { %1430 = vmatpush.msra.mxu2 %v3305_v3 }
 0x75b   :  { %1194 = vmatpush.msra.mxu1 %v3321_v56 }
 0x75c   :  { %1431 = vmatpush.msra.mxu2 %v3313_v25 }
 0x75d   :  { %1195 = vmatpush.msra.mxu1 %v3329_v12 }
 0x75e   :  { %1432 = vmatpush.msra.mxu2 %v3321_v56 }
 0x75f   :  { %1196 = vmatpush.msra.mxu1 %v3342_v52 }
 0x760   :  { %1433 = vmatpush.msra.mxu2 %v3329_v12 }
 0x762   :  { %1434 = vmatpush.msra.mxu2 %v3342_v52 }
 0x7c2   :  { %v938_v61 = vpop.xlane.xlu0 %937 }
 0x7c3   :  { %v942_v23 = vmul.f32 %v938_v61, %v2709_v20 }
 0x7c5   :  { %v3230_v42 = vadd.f32 1e-05, %v942_v23 }
 0x7c7   :  { %2476 = vrsqrt.f32 %v3230_v42  ;;  %vm952_vm12 = vweird.f32 %v3230_v42 }
 0x7ca   :  { %v941_v22 = vpop.xlane.xlu2 %940 }
 0x7cb   :  { %v943_v57 = vmul.f32 %v941_v22, %v2709_v20  ;;  %v3351_v22 = vld [vmem:[%s4286_s5 + $0x100] sm:$0xff]  ;;  %v1165_v20 = vpop.f32.mrf.mxu2 }
 0x7cc   :  { %1197 = vmatpush.msra.mxu1 %v3351_v22  ;;  %1435 = vmatpush.msra.mxu2 %v3351_v22 }
 0x7cd   :  { %v2477_v59 = vpop.eup %2476  ;;  %v3284_v63 = vadd.f32 1e-05, %v943_v57 }
 0x7ce   :  { %v947_v0 = vmul.f32 %v2477_v59, %v3230_v42  ;;  %vm953_vm5 = vweird.f32 %v2477_v59  ;;  %v971_v42 = vperm.slane %v2569_v30, 5 }
 0x7cf   :  { %2478 = vrsqrt.f32 %v3284_v63  ;;  %vm954_vm13 = vmor %vm952_vm12, %vm953_vm5  ;;  %vm962_vm15 = vweird.f32 %v3284_v63 }
 0x7d0   :  { %v948_v4 = vmul.f32 %v2477_v59, %v947_v0 }
 0x7d2   :  { %v949_v49 = vmul.f32 0.5, %v948_v4 }
 0x7d4   :  { %v950_v10 = vsub.f32 1.5, %v949_v49  ;;  %v3367_v49 = vld [vmem:[%s4286_s5 + $0xd0] sm:$0xff] }
 0x7d5   :  { %v2479_v45 = vpop.eup %2478 }
 0x7d6   :  { %v951_v21 = vmul.f32 %v2477_v59, %v950_v10  ;;  %v957_v28 = vmul.f32 %v2479_v45, %v3284_v63  ;;  %vm963_vm14 = vweird.f32 %v2479_v45  ;;  %v3386_v63 = vld [vmem:[%s4286_s5 + $0xa0] sm:$0xff] }
 0x7d7   :  { %vm964_vm1 = vmor %vm962_vm15, %vm963_vm14  ;;  %4354 = vst [vmem:[#allocation13_spill] sm:$0xff] %v3386_v63 }
 0x7d8   :  { %v955_v60 = vsel %vm954_vm13, %v2477_v59, %v951_v21  ;;  %v958_v61 = vmul.f32 %v2479_v45, %v957_v28  ;;  %v3359_v59 = vld [vmem:[%s4286_s5 + $0xe8] sm:$0xff]  ;;  %v3378_v21 = vld [vmem:[%s4286_s5 + $0xb8] sm:$0xff] }
 0x7d9   :  { %v966_v23 = vmul.f32 %v955_v60, %v3018_v62  ;;  %1198 = vmatpush.msra.mxu1 %v3359_v59  ;;  %v3395_v60 = vld [vmem:[%s4286_s5 + $0x88] sm:$0xff]  ;;  %1436 = vmatpush.msra.mxu2 %v3359_v59 }
 0x7da   :  { %v959_v57 = vmul.f32 0.5, %v958_v61  ;;  %4355 = vst [vmem:[#allocation14_spill] sm:$0xff] %v3395_v60  ;;  %v3404_v61 = vld [vmem:[%s4286_s5 + $0x70] sm:$0xff] }
 0x7db   :  { %v969_v0 = vmul.f32 %v968_v32, %v966_v23  ;;  %1199 = vmatpush.msra.mxu1 %v3367_v49  ;;  %4356 = vst [vmem:[#allocation15_spill] sm:$0xff] %v3404_v61  ;;  %1437 = vmatpush.msra.mxu2 %v3367_v49 }
 0x7dc   :  { %v960_v62 = vsub.f32 1.5, %v959_v57  ;;  %v2633_v57 = vmov 0  }
 0x7dd   :  { %v972_v4 = vadd.f32 %v971_v42, %v969_v0  ;;  %1200 = vmatpush.msra.mxu1 %v3378_v21  ;;  %1438 = vmatpush.msra.mxu2 %v3378_v21 }
 0x7de   :  { %v961_v10 = vmul.f32 %v2479_v45, %v960_v62  ;;  %v2332_v62 = vld [vmem:[%s4287_s6 + $0x1] ss:$4 sm:$0x7] }
 0x7df   :  { %2334 = vmatmul.msk.f32.vlgmr.msra.gmra.mxu0 %vm37_vm0, %v972_v4  ;;  %2336 = vmatmul.msk.f32.vlgmr.msrb.gmra.mxu1 %vm37_vm0, %v972_v4 }
 0x7e0   :  { %v965_v28 = vsel %vm964_vm1, %v2479_v45, %v961_v10  ;;  %2338 = vmatmul.msk.f32.vlgmr.msra.gmra.mxu3 %vm37_vm0, %v972_v4  ;;  %1304 = vmatpush.msra.mxu0 %v3252_v46 }
 0x7e1   :  { %v967_v30 = vmul.f32 %v965_v28, %v3025_v2  ;;  %1201 = vmatpush.msra.mxu1 %v3386_v63  ;;  %1406 = vmatpush.msra.mxu3 %v3081_v13 }
 0x7e2   :  { %1305 = vmatpush.msra.mxu0 %v3264_v48  ;;  %1439 = vmatpush.msra.mxu2 %v3386_v63 }
 0x7e3   :  { %v970_v45 = vmul.f32 %v968_v32, %v967_v30  ;;  %1202 = vmatpush.msra.mxu1 %v3395_v60  ;;  %1407 = vmatpush.msra.mxu3 %v3093_v16  ;;  %v1034_v32 = vld [vmem:[%s4287_s6] ss:$4 sm:$0x7]  ;;  %v3517_v30 = vperm.slane %v2332_v62, 0 }
 0x7e4   :  { %1306 = vmatpush.msra.mxu0 %v3271_v54  ;;  %1440 = vmatpush.msra.mxu2 %v3395_v60  ;;  %v1041_v4 = vperm.slane %v1034_v32, 0  ;;  %v1042_v10 = vperm.slane %v1034_v32, 1  ;;  %v1043_v55 = vperm.slane %v1034_v32, 2 }
 0x7e5   :  { %v973_v2 = vadd.f32 %v971_v42, %v970_v45  ;;  %1203 = vmatpush.msra.mxu1 %v3404_v61  ;;  %1408 = vmatpush.msra.mxu3 %v3105_v18  ;;  %4357 = vst [vmem:[#allocation16_spill] sm:$0xff] %v3517_v30 }
 0x7e6   :  { %1307 = vmatpush.msra.mxu0 %v3300_v1  ;;  %1441 = vmatpush.msra.mxu2 %v3404_v61 }
 0x7e7   :  { %2335 = vmatmul.msk.f32.gmra.mxu0 %vm37_vm0, %v973_v2  ;;  %2337 = vmatmul.msk.f32.gmra.mxu1 %vm37_vm0, %v973_v2 }
 0x7e8   :  { %2339 = vmatmul.msk.f32.gmra.mxu3 %vm37_vm0, %v973_v2  ;;  %1386 = vmatpush.msrb.mxu1 %v3033_v26 }
 0x7e9   :  { %1308 = vmatpush.msra.mxu0 %v3305_v3  ;;  %1409 = vmatpush.msra.mxu3 %v3117_v14 }
 0x7ea   :  { %1387 = vmatpush.msrb.mxu1 %v3039_v5 }
 0x7eb   :  { %1309 = vmatpush.msra.mxu0 %v3313_v25  ;;  %1410 = vmatpush.msra.mxu3 %v3135_v24 }
 0x7ec   :  { %1388 = vmatpush.msrb.mxu1 %v3048_v6 }
 0x7ed   :  { %1310 = vmatpush.msra.mxu0 %v3321_v56  ;;  %1411 = vmatpush.msra.mxu3 %v3153_v29 }
 0x7ee   :  { %1389 = vmatpush.msrb.mxu1 %v3057_v7 }
 0x7ef   :  { %1184 = vmatmul.f32.vlgmr.msrb.gmra.mxu0 %v2632_v51  ;;  %1204 = vmatmul.f32.vlgmr.msra.gmra.mxu1 %v2632_v51  ;;  %v2333_v51 = vld [vmem:[%s4287_s6 + $0x2] ss:$4 sm:$0x7] }
 0x7f0   :  { %1311 = vmatpush.msra.mxu0 %v3329_v12  ;;  %1390 = vmatpush.msrb.mxu1 %v3066_v8  ;;  %vm1039_vm2 = vcmp.gt.f32.partialorder %v2333_v51, 0.5 }
 0x7f1   :  { %1412 = vmatpush.msra.mxu3 %v3171_v33  ;;  %v1122_v0 = vsel %vm1039_vm2, 1, %v2633_v57 }
 0x7f2   :  { %1312 = vmatpush.msra.mxu0 %v3342_v52  ;;  %1391 = vmatpush.msrb.mxu1 %v3075_v11  ;;  %v1123_v28 = vperm.slane %v1122_v0, 0  ;;  %v1124_v45 = vperm.slane %v1122_v0, 1 }
 0x7f3   :  { %1413 = vmatpush.msra.mxu3 %v3189_v34 }
 0x7f4   :  { %1313 = vmatpush.msra.mxu0 %v3351_v22  ;;  %1392 = vmatpush.msrb.mxu1 %v3087_v15  ;;  %vm3519_vm3 = vcmp.eq.s32.totalorder %v1123_v28, 1  ;;  %vm3524_vm4 = vcmp.eq.s32.totalorder %v1124_v45, 1 }
 0x7f5   :  { %1414 = vmatpush.msra.mxu3 %v3201_v35 }
 0x7f6   :  { %1314 = vmatpush.msra.mxu0 %v3359_v59  ;;  %1393 = vmatpush.msrb.mxu1 %v3099_v17 }
 0x7f7   :  { %1415 = vmatpush.msra.mxu3 %v3211_v38 }
 0x7f8   :  { %1315 = vmatpush.msra.mxu0 %v3367_v49  ;;  %1394 = vmatpush.msrb.mxu1 %v3111_v19 }
 0x7f9   :  { %1416 = vmatpush.msra.mxu3 %v3225_v41 }
 0x7fa   :  { %1316 = vmatpush.msra.mxu0 %v3378_v21  ;;  %1395 = vmatpush.msrb.mxu1 %v3123_v39 }
 0x7fb   :  { %1417 = vmatpush.msra.mxu3 %v3236_v43 }
 0x7fc   :  { %1317 = vmatpush.msra.mxu0 %v3386_v63  ;;  %1396 = vmatpush.msrb.mxu1 %v3140_v27 }
 0x7fd   :  { %1418 = vmatpush.msra.mxu3 %v3247_v44 }
 0x7fe   :  { %1318 = vmatpush.msra.mxu0 %v3395_v60  ;;  %1397 = vmatpush.msrb.mxu1 %v3158_v31  ;;  %v1166_v60 = vadd.f32 %v1165_v20, %v3517_v30 }
 0x7ff   :  { %1419 = vmatpush.msra.mxu3 %v3259_v53 }
 0x800   :  { %1319 = vmatpush.msra.mxu0 %v3404_v61  ;;  %1398 = vmatpush.msrb.mxu1 %v3176_v9 }
 0x801   :  { %1420 = vmatpush.msra.mxu3 %v3279_v58 }
 0x802   :  { %1399 = vmatpush.msrb.mxu1 %v3194_v50  ;;  %1507 = vmatpush.msrb.mxu0 %v3033_v26 }
 0x803   :  { %1421 = vmatpush.msra.mxu3 %v3290_v37 }
 0x804   :  { %1400 = vmatpush.msrb.mxu1 %v3206_v36  ;;  %1508 = vmatpush.msrb.mxu0 %v3039_v5 }
 0x806   :  { %1401 = vmatpush.msrb.mxu1 %v3216_v40  ;;  %1509 = vmatpush.msrb.mxu0 %v3048_v6 }
 0x808   :  { %1527 = vmatpush.msra.mxu1 %v3081_v13  ;;  %1510 = vmatpush.msrb.mxu0 %v3057_v7 }
 0x80a   :  { %1528 = vmatpush.msra.mxu1 %v3093_v16  ;;  %1511 = vmatpush.msrb.mxu0 %v3066_v8 }
 0x80c   :  { %1529 = vmatpush.msra.mxu1 %v3105_v18  ;;  %1512 = vmatpush.msrb.mxu0 %v3075_v11 }
 0x80e   :  { %1530 = vmatpush.msra.mxu1 %v3117_v14  ;;  %1513 = vmatpush.msrb.mxu0 %v3087_v15 }
 0x810   :  { %1531 = vmatpush.msra.mxu1 %v3135_v24  ;;  %1514 = vmatpush.msrb.mxu0 %v3099_v17 }
 0x812   :  { %1532 = vmatpush.msra.mxu1 %v3153_v29  ;;  %1515 = vmatpush.msrb.mxu0 %v3111_v19 }
 0x814   :  { %1533 = vmatpush.msra.mxu1 %v3171_v33  ;;  %1516 = vmatpush.msrb.mxu0 %v3123_v39 }
 0x816   :  { %1534 = vmatpush.msra.mxu1 %v3189_v34  ;;  %1517 = vmatpush.msrb.mxu0 %v3140_v27 }
 0x818   :  { %1535 = vmatpush.msra.mxu1 %v3201_v35  ;;  %1518 = vmatpush.msrb.mxu0 %v3158_v31 }
 0x81a   :  { %1536 = vmatpush.msra.mxu1 %v3211_v38  ;;  %1519 = vmatpush.msrb.mxu0 %v3176_v9 }
 0x81c   :  { %1537 = vmatpush.msra.mxu1 %v3225_v41  ;;  %1520 = vmatpush.msrb.mxu0 %v3194_v50 }
 0x81e   :  { %1538 = vmatpush.msra.mxu1 %v3236_v43  ;;  %1521 = vmatpush.msrb.mxu0 %v3206_v36 }
 0x820   :  { %1539 = vmatpush.msra.mxu1 %v3247_v44  ;;  %1522 = vmatpush.msrb.mxu0 %v3216_v40 }
 0x822   :  { %1540 = vmatpush.msra.mxu1 %v3259_v53 }
 0x824   :  { %1541 = vmatpush.msra.mxu1 %v3279_v58 }
 0x826   :  { %1542 = vmatpush.msra.mxu1 %v3290_v37  ;;  %v1125_v37 = vperm.slane %v1122_v0, 2 }
 0x828   :  { %vm3561_vm6 = vcmp.eq.s32.totalorder %v1125_v37, 1 }
 0x85c   :  { %v1070_v23 = vpop.f32.mrf.mxu0  ;;  %v1093_v42 = vpop.f32.mrf.mxu1 }
 0x85d   :  { %v1071_v2 = vadd.f32 %v1070_v23, %v1041_v4  ;;  %v1094_v51 = vadd.f32 %v1093_v42, %v1042_v10 }
 0x85f   :  { %v1629_v23 = vrot.slane %v1094_v51, 6  ;;  %v1628_v42 = vrot.slane %v1071_v2, 6  ;;  %v1747_v50 = vrot.slane %v1071_v2, 2  ;;  %v1748_v32 = vrot.slane %v1094_v51, 2 }
 0x863   :  { %v1116_v47 = vpop.f32.mrf.mxu3 }
 0x864   :  { %v1073_v40 = vpop.f32.mrf.mxu0  ;;  %v1096_v61 = vpop.f32.mrf.mxu1  ;;  %v3528_v63 = vadd.f32 %v1116_v47, %v1043_v55  ;;  %v3546_v47 = vperm.slane %v2332_v62, 1 }
 0x865   :  { %v1074_v58 = vadd.f32 %v1073_v40, %v1041_v4  ;;  %v1097_v36 = vadd.f32 %v1096_v61, %v1042_v10 }
 0x866   :  { %4366 = vst [vmem:[#allocation21_spill] sm:$0xff] %v3546_v47 }
 0x867   :  { %v1132_v0 = vrot.slane %v1074_v58, 6  ;;  %v1255_v44 = vrot.slane %v1074_v58, 2  ;;  %v1256_v28 = vrot.slane %v1097_v36, 2  ;;  %v3532_v9 = vsel %vm3524_vm4, %v1097_v36, %v1629_v23 }
 0x868   :  { %4362 = vst [vmem:[#allocation17_spill] sm:$0xff] %v3532_v9  ;;  %v3536_v20 = vsel %vm3519_vm3, %v1074_v58, %v1628_v42  ;;  %v3540_v40 = vsel %vm3519_vm3, %v1074_v58, %v1747_v50  ;;  %v3544_v61 = vsel %vm3524_vm4, %v1097_v36, %v1748_v32  ;;  %v1133_v58 = vrot.slane %v1097_v36, 6  ;;  %v4389_v42 = vld [vmem:[#allocation12_spill] sm:$0xff] }
 0x869   :  { %4363 = vst [vmem:[#allocation18_spill] sm:$0xff] %v3536_v20  ;;  %v3550_v4 = vsel %vm3519_vm3, %v1071_v2, %v1132_v0  ;;  %v3554_v10 = vsel %vm3519_vm3, %v1071_v2, %v1255_v44  ;;  %v3558_v45 = vsel %vm3524_vm4, %v1094_v51, %v1256_v28  ;;  %v1630_v32 = vrot.slane %v3528_v63, 6 }
 0x86a   :  { %4364 = vst [vmem:[#allocation19_spill] sm:$0xff] %v3540_v40  ;;  %v1208_v50 = vadd.f32 %v1166_v60, %v3550_v4  ;;  %v1749_v44 = vrot.slane %v3528_v63, 2  ;;  %v3574_v36 = vsel %vm3524_vm4, %v1094_v51, %v1133_v58 }
 0x86b   :  { %4365 = vst [vmem:[#allocation20_spill] sm:$0xff] %v3544_v61  ;;  %v1119_v23 = vpop.f32.mrf.mxu3 }
 0x86c   :  { %4367 = vst [vmem:[#allocation22_spill] sm:$0xff] %v3550_v4  ;;  %v2340_v0 = vmul.f32 -1.442695, %v1208_v50  ;;  %v1120_v61 = vadd.f32 %v1119_v23, %v1043_v55  ;;  %v1185_v40 = vpop.f32.mrf.mxu0 }
 0x86d   :  { %4368 = vst [vmem:[#allocation23_spill] sm:$0xff] %v3554_v10  ;;  %v1186_v2 = vadd.f32 %v1185_v40, %v3546_v47 }
 0x86e   :  { %4369 = vst [vmem:[#allocation24_spill] sm:$0xff] %v3558_v45  ;;  %2480 = vpow2.f32 %v2340_v0  ;;  %v1257_v57 = vrot.slane %v1120_v61, 2  ;;  %v3570_v60 = vsel %vm3561_vm6, %v1120_v61, %v1630_v32  ;;  %v3578_v37 = vsel %vm3561_vm6, %v1120_v61, %v1749_v44 }
 0x86f   :  { %4372 = vst [vmem:[#allocation25_spill] sm:$0xff] %v3570_v60  ;;  %v1209_v55 = vadd.f32 %v1186_v2, %v3574_v36  ;;  %v3586_v0 = vperm.slane %v2332_v62, 2 }
 0x870   :  { %4373 = vst [vmem:[#allocation26_spill] sm:$0xff] %v3574_v36  ;;  %v3584_v28 = vsel %vm3561_vm6, %v3528_v63, %v1257_v57 }
 0x871   :  { %4374 = vst [vmem:[#allocation27_spill] sm:$0xff] %v3578_v37  ;;  %v2341_v40 = vmul.f32 -1.442695, %v1209_v55  ;;  %v1205_v37 = vpop.f32.mrf.mxu1 }
 0x872   :  { %4375 = vst [vmem:[#allocation28_spill] sm:$0xff] %v3584_v28  ;;  %v1206_v55 = vadd.f32 %v1205_v37, %v3586_v0 }
 0x873   :  { %2482 = vpow2.f32 %v2341_v40  ;;  %4376 = vst [vmem:[#allocation29_spill] sm:$0xff] %v3586_v0 }
 0x874   :  { %v2481_v50 = vpop.eup %2480 }
 0x875   :  { %v1216_v23 = vadd.f32 1.0, %v2481_v50  ;;  %v1134_v50 = vrot.slane %v1120_v61, 6 }
 0x877   :  { %2484 = vrcp.f32 %v1216_v23  ;;  %v1229_v2 = vand.u32 2147483648, %v1216_v23  ;;  %v1227_v57 = vand.u32 2147483647, %v1216_v23  ;;  %vm1223_vm8 = vweird.f32 %v1216_v23 }
 0x879   :  { %v2483_v32 = vpop.eup %2482  ;;  %vm1228_vm10 = vcmp.eq.f32.partialorder %v1227_v57, 8.507059e+37 }
 0x87a   :  { %v1217_v53 = vadd.f32 1.0, %v2483_v32  ;;  %v1230_v32 = vor.u32 1.1754944e-38, %v1229_v2 }
 0x87c   :  { %2486 = vrcp.f32 %v1217_v53  ;;  %v1244_v28 = vand.u32 2147483648, %v1217_v53  ;;  %vm1238_vm5 = vweird.f32 %v1217_v53 }
 0x87d   :  { %v2485_v51 = vpop.eup %2484 }
 0x87e   :  { %v1219_v58 = vmul.f32 %v2485_v51, %v1216_v23  ;;  %vm1224_vm7 = vweird.f32 %v2485_v51  ;;  %v1245_v23 = vor.u32 1.1754944e-38, %v1244_v28 }
 0x87f   :  { %vm1225_vm9 = vmor %vm1223_vm8, %vm1224_vm7 }
 0x880   :  { %v1220_v44 = vsub.f32 1.0, %v1219_v58 }
 0x882   :  { %v2487_v60 = vpop.eup %2486  ;;  %v1221_v20 = vmul.f32 %v2485_v51, %v1220_v44  ;;  %v3592_v44 = vsel %vm3561_vm6, %v3528_v63, %v1134_v50  ;;  %v4387_v63 = vld [vmem:[#allocation15_spill] sm:$0xff] }
 0x883   :  { %v1234_v9 = vmul.f32 %v2487_v60, %v1217_v53  ;;  %vm1239_vm11 = vweird.f32 %v2487_v60  ;;  %4377 = vst [vmem:[#allocation30_spill] sm:$0xff] %v3592_v44 }
 0x884   :  { %v1222_v40 = vadd.f32 %v2485_v51, %v1221_v20  ;;  %v1242_v20 = vand.u32 2147483647, %v1217_v53  ;;  %vm1240_vm12 = vmor %vm1238_vm5, %vm1239_vm11 }
 0x885   :  { %v1235_v36 = vsub.f32 1.0, %v1234_v9 }
 0x886   :  { %v1226_v4 = vsel %vm1225_vm9, %v2485_v51, %v1222_v40  ;;  %vm1243_vm13 = vcmp.eq.f32.partialorder %v1242_v20, 8.507059e+37 }
 0x887   :  { %v1236_v62 = vmul.f32 %v2487_v60, %v1235_v36  ;;  %v1231_v58 = vsel %vm1228_vm10, %v1230_v32, %v1226_v4 }
 0x888   :  { %v1248_v45 = vmul.f32 %v1231_v58, %v1206_v55  ;;  %v4390_v58 = vld [vmem:[#allocation24_spill] sm:$0xff] }
 0x889   :  { %v1237_v37 = vadd.f32 %v2487_v60, %v1236_v62 }
 0x88a   :  { %v1249_v9 = vadd.f32 %v1248_v45, %v3592_v44  ;;  %v4388_v45 = vld [vmem:[#allocation8_spill] sm:$0xff] }
 0x88b   :  { %v1241_v61 = vsel %vm1240_vm12, %v2487_v60, %v1237_v37 }
 0x88c   :  { %2488 = vtanh.f32 %v1249_v9  ;;  %v1246_v36 = vsel %vm1243_vm13, %v1245_v23, %v1241_v61 }
 0x88d   :  { %v1251_v51 = vsub.f32 1.0, %v1246_v36  ;;  %v1253_v57 = vmul.f32 0.0, %v1246_v36 }
 0x892   :  { %v2489_v4 = vpop.eup %2488 }
 0x893   :  { %v1252_v2 = vmul.f32 %v2489_v4, %v1251_v51 }
 0x895   :  { %v3595_v55 = vadd.f32 %v1253_v57, %v1252_v2 }
 0x897   :  { %4378 = vst [vmem:[#allocation31_spill] sm:$0xff] %v3595_v55  ;;  %1280 = vmatmul.f32.vlgmr.msrb.gmra.mxu3 %v3595_v55  ;;  %1300 = vmatmul.f32.vlgmr.msrb.gmra.mxu2 %v3595_v55 }
 0x898   :  { %1320 = vmatmul.f32.vlgmr.msra.gmra.mxu0 %v3595_v55  ;;  %1547 = vmatpush.msrb.mxu3 %v3252_v46 }
 0x899   :  { %1640 = vmatpush.msrb.mxu2 %v3033_v26  ;;  %1660 = vmatpush.msra.mxu0 %v3081_v13  ;;  %v4379_v26 = vld [vmem:[#allocation5_spill] sm:$0xff] }
 0x89a   :  { %1548 = vmatpush.msrb.mxu3 %v3264_v48 }
 0x89b   :  { %1641 = vmatpush.msrb.mxu2 %v3039_v5  ;;  %1661 = vmatpush.msra.mxu0 %v3093_v16  ;;  %v4380_v5 = vld [vmem:[#allocation9_spill] sm:$0xff] }
 0x89c   :  { %1549 = vmatpush.msrb.mxu3 %v3271_v54 }
 0x89d   :  { %1642 = vmatpush.msrb.mxu2 %v3048_v6  ;;  %1662 = vmatpush.msra.mxu0 %v3105_v18  ;;  %v4381_v6 = vld [vmem:[#allocation13_spill] sm:$0xff] }
 0x89e   :  { %1550 = vmatpush.msrb.mxu3 %v3300_v1 }
 0x89f   :  { %1643 = vmatpush.msrb.mxu2 %v3057_v7  ;;  %1663 = vmatpush.msra.mxu0 %v3117_v14  ;;  %v4382_v7 = vld [vmem:[#allocation6_spill] sm:$0xff] }
 0x8a0   :  { %1551 = vmatpush.msrb.mxu3 %v3305_v3 }
 0x8a1   :  { %1644 = vmatpush.msrb.mxu2 %v3066_v8  ;;  %1664 = vmatpush.msra.mxu0 %v3135_v24  ;;  %v4383_v8 = vld [vmem:[#allocation10_spill] sm:$0xff] }
 0x8a2   :  { %1552 = vmatpush.msrb.mxu3 %v3313_v25 }
 0x8a3   :  { %1645 = vmatpush.msrb.mxu2 %v3075_v11  ;;  %1665 = vmatpush.msra.mxu0 %v3153_v29  ;;  %v4384_v11 = vld [vmem:[#allocation14_spill] sm:$0xff] }
 0x8a4   :  { %1553 = vmatpush.msrb.mxu3 %v3321_v56 }
 0x8a5   :  { %1646 = vmatpush.msrb.mxu2 %v3087_v15  ;;  %1666 = vmatpush.msra.mxu0 %v3171_v33  ;;  %v4385_v15 = vld [vmem:[#allocation7_spill] sm:$0xff] }
 0x8a6   :  { %1554 = vmatpush.msrb.mxu3 %v3329_v12 }
 0x8a7   :  { %1647 = vmatpush.msrb.mxu2 %v3099_v17  ;;  %1667 = vmatpush.msra.mxu0 %v3189_v34  ;;  %v4386_v17 = vld [vmem:[#allocation11_spill] sm:$0xff] }
 0x8a8   :  { %1555 = vmatpush.msrb.mxu3 %v3342_v52 }
 0x8a9   :  { %1648 = vmatpush.msrb.mxu2 %v3111_v19  ;;  %1668 = vmatpush.msra.mxu0 %v3201_v35 }
 0x8aa   :  { %1556 = vmatpush.msrb.mxu3 %v3351_v22 }
 0x8ab   :  { %1649 = vmatpush.msrb.mxu2 %v3123_v39  ;;  %1669 = vmatpush.msra.mxu0 %v3211_v38 }
 0x8ac   :  { %1557 = vmatpush.msrb.mxu3 %v3359_v59 }
 0x8ad   :  { %1650 = vmatpush.msrb.mxu2 %v3140_v27  ;;  %1670 = vmatpush.msra.mxu0 %v3225_v41 }
 0x8ae   :  { %1558 = vmatpush.msrb.mxu3 %v3367_v49 }
 0x8af   :  { %1651 = vmatpush.msrb.mxu2 %v3158_v31  ;;  %1671 = vmatpush.msra.mxu0 %v3236_v43 }
 0x8b0   :  { %1559 = vmatpush.msrb.mxu3 %v3378_v21 }
 0x8b1   :  { %1652 = vmatpush.msrb.mxu2 %v4379_v26  ;;  %1672 = vmatpush.msra.mxu0 %v4380_v5 }
 0x8b2   :  { %1560 = vmatpush.msrb.mxu3 %v4381_v6 }
 0x8b3   :  { %1653 = vmatpush.msrb.mxu2 %v4382_v7  ;;  %1673 = vmatpush.msra.mxu0 %v4383_v8 }
 0x8b4   :  { %1561 = vmatpush.msrb.mxu3 %v4384_v11 }
 0x8b5   :  { %1654 = vmatpush.msrb.mxu2 %v4385_v15  ;;  %1674 = vmatpush.msra.mxu0 %v4386_v17 }
 0x8b6   :  { %1562 = vmatpush.msrb.mxu3 %v4387_v63 }
 0x8b7   :  { %1655 = vmatpush.msrb.mxu2 %v4388_v45  ;;  %1675 = vmatpush.msra.mxu0 %v4389_v42 }
 0x91a   :  { %v1281_v60 = vpop.f32.mrf.mxu3  ;;  %v1301_v28 = vpop.f32.mrf.mxu2 }
 0x91b   :  { %v1282_v53 = vadd.f32 %v1281_v60, %v3517_v30  ;;  %v1302_v40 = vadd.f32 %v1301_v28, %v3546_v47  ;;  %v1321_v60 = vpop.f32.mrf.mxu0 }
 0x91d   :  { %v1326_v50 = vrot.slane %v1282_v53, 6  ;;  %v1327_v32 = vrot.slane %v1302_v40, 6 }
 0x91f   :  { %v1330_v62 = vadd.f32 %v1326_v50, %v3554_v10  ;;  %v1331_v37 = vadd.f32 %v1327_v32, %v4390_v58  ;;  %v1322_v32 = vadd.f32 %v1321_v60, %v3586_v0  ;;  %v4391_v60 = vld [vmem:[#allocation28_spill] sm:$0xff] }
 0x921   :  { %v2342_v20 = vmul.f32 -1.442695, %v1330_v62  ;;  %v2343_v9 = vmul.f32 -1.442695, %v1331_v37 }
 0x923   :  { %2490 = vpow2.f32 %v2342_v20 }
 0x924   :  { %2492 = vpow2.f32 %v2343_v9 }
 0x929   :  { %v2491_v61 = vpop.eup %2490 }
 0x92a   :  { %v2493_v23 = vpop.eup %2492  ;;  %v1338_v36 = vadd.f32 1.0, %v2491_v61 }
 0x92b   :  { %v1339_v51 = vadd.f32 1.0, %v2493_v23  ;;  %v1371_v23 = vrot.slane %v1322_v32, 6 }
 0x92c   :  { %2494 = vrcp.f32 %v1338_v36  ;;  %v1351_v40 = vand.u32 2147483648, %v1338_v36  ;;  %v1349_v37 = vand.u32 2147483647, %v1338_v36  ;;  %vm1345_vm15 = vweird.f32 %v1338_v36 }
 0x92d   :  { %2496 = vrcp.f32 %v1339_v51  ;;  %vm1360_vm4 = vweird.f32 %v1339_v51 }
 0x92e   :  { %v1352_v61 = vor.u32 1.1754944e-38, %v1351_v40  ;;  %vm1350_vm2 = vcmp.eq.f32.partialorder %v1349_v37, 8.507059e+37  ;;  %v1379_v40 = vrot.slane %v3595_v55, 6 }
 0x932   :  { %v2495_v4 = vpop.eup %2494 }
 0x933   :  { %v2497_v2 = vpop.eup %2496  ;;  %v1341_v57 = vmul.f32 %v2495_v4, %v1338_v36  ;;  %vm1346_vm14 = vweird.f32 %v2495_v4 }
 0x934   :  { %v1356_v28 = vmul.f32 %v2497_v2, %v1339_v51  ;;  %vm1347_vm1 = vmor %vm1345_vm15, %vm1346_vm14  ;;  %vm1361_vm3 = vweird.f32 %v2497_v2  ;;  %vm2128_vm15 = vcmask 1041408  }
 0x935   :  { %v1342_v53 = vsub.f32 1.0, %v1341_v57  ;;  %v1366_v57 = vand.u32 2147483648, %v1339_v51  ;;  %vm1362_vm6 = vmor %vm1360_vm4, %vm1361_vm3 }
 0x936   :  { %v1357_v50 = vsub.f32 1.0, %v1356_v28  ;;  %v1364_v28 = vand.u32 2147483647, %v1339_v51 }
 0x937   :  { %v1343_v62 = vmul.f32 %v2495_v4, %v1342_v53  ;;  %v1367_v30 = vor.u32 1.1754944e-38, %v1366_v57 }
 0x938   :  { %v1358_v20 = vmul.f32 %v2497_v2, %v1357_v50  ;;  %vm1365_vm7 = vcmp.eq.f32.partialorder %v1364_v28, 8.507059e+37 }
 0x939   :  { %v1344_v9 = vadd.f32 %v2495_v4, %v1343_v62 }
 0x93a   :  { %v1359_v44 = vadd.f32 %v2497_v2, %v1358_v20 }
 0x93b   :  { %v1348_v58 = vsel %vm1347_vm1, %v2495_v4, %v1344_v9  ;;  %vm2131_vm1 = vcmask 1043456  }
 0x93c   :  { %v1353_v10 = vsel %vm1350_vm2, %v1352_v61, %v1348_v58  ;;  %v1363_v0 = vsel %vm1362_vm6, %v2497_v2, %v1359_v44 }
 0x93d   :  { %v1373_v47 = vmul.f32 %v1371_v23, %v1353_v10  ;;  %v1368_v36 = vsel %vm1365_vm7, %v1367_v30, %v1363_v0  ;;  %v3670_v30 = vld [vmem:[%s4286_s5 + $0x1b0] sm:$0xff] }
 0x93e   :  { %v1376_v50 = vsub.f32 1.0, %v1368_v36  ;;  %v1381_v58 = vmul.f32 %v1379_v40, %v1368_v36  ;;  %v4398_v40 = vld [vmem:[#allocation30_spill] sm:$0xff] }
 0x93f   :  { %v1374_v53 = vadd.f32 %v1373_v47, %v4391_v60  ;;  %v3662_v47 = vld [vmem:[%s4286_s5 + $0x1c8] sm:$0xff] }
 0x941   :  { %2498 = vtanh.f32 %v1374_v53 }
 0x947   :  { %v2499_v4 = vpop.eup %2498 }
 0x948   :  { %v1377_v32 = vmul.f32 %v2499_v4, %v1376_v50 }
 0x94a   :  { %v3655_v62 = vadd.f32 %v1381_v58, %v1377_v32 }
 0x94c   :  { %4392 = vst [vmem:[#allocation5_spill] sm:$0xff] %v3655_v62  ;;  %v1384_v10 = vrot.slane %v3655_v62, 2 }
 0x94e   :  { %1402 = vmatmul.f32.vlgmr.msrb.gmra.mxu1 %v1384_v10  ;;  %1422 = vmatmul.f32.vlgmr.msra.gmra.mxu3 %v1384_v10 }
 0x94f   :  { %1442 = vmatmul.f32.vlgmr.msra.gmra.mxu2 %v1384_v10  ;;  %1680 = vmatpush.msrb.mxu1 %v3252_v46  ;;  %v3678_v46 = vld [vmem:[%s4286_s5 + $0x198] sm:$0xff] }
 0x950   :  { %1756 = vmatpush.msra.mxu3 %v3662_v47  ;;  %1776 = vmatpush.msra.mxu2 %v3081_v13  ;;  %v3686_v13 = vld [vmem:[%s4286_s5 + $0x180] sm:$0xff] }
 0x951   :  { %1681 = vmatpush.msrb.mxu1 %v3264_v48  ;;  %v4396_v48 = vld [vmem:[#allocation26_spill] sm:$0xff] }
 0x952   :  { %1757 = vmatpush.msra.mxu3 %v3670_v30  ;;  %1777 = vmatpush.msra.mxu2 %v3093_v16  ;;  %v3694_v16 = vld [vmem:[%s4286_s5 + $0x168] sm:$0xff] }
 0x953   :  { %1682 = vmatpush.msrb.mxu1 %v3271_v54 }
 0x954   :  { %1758 = vmatpush.msra.mxu3 %v3678_v46  ;;  %1778 = vmatpush.msra.mxu2 %v3105_v18  ;;  %v3702_v18 = vld [vmem:[%s4286_s5 + $0x150] sm:$0xff] }
 0x955   :  { %1683 = vmatpush.msrb.mxu1 %v3300_v1 }
 0x956   :  { %1759 = vmatpush.msra.mxu3 %v3686_v13  ;;  %1779 = vmatpush.msra.mxu2 %v3117_v14  ;;  %v3710_v14 = vld [vmem:[%s4286_s5 + $0x138] sm:$0xff] }
 0x957   :  { %1684 = vmatpush.msrb.mxu1 %v3305_v3 }
 0x958   :  { %1760 = vmatpush.msra.mxu3 %v3694_v16  ;;  %1780 = vmatpush.msra.mxu2 %v3135_v24  ;;  %v3718_v24 = vld [vmem:[%s4286_s5 + $0x120] sm:$0xff] }
 0x959   :  { %1685 = vmatpush.msrb.mxu1 %v3313_v25 }
 0x95a   :  { %1761 = vmatpush.msra.mxu3 %v3702_v18  ;;  %1781 = vmatpush.msra.mxu2 %v3153_v29 }
 0x95b   :  { %1686 = vmatpush.msrb.mxu1 %v3321_v56 }
 0x95c   :  { %1762 = vmatpush.msra.mxu3 %v3710_v14  ;;  %1782 = vmatpush.msra.mxu2 %v3171_v33 }
 0x95d   :  { %1687 = vmatpush.msrb.mxu1 %v3329_v12 }
 0x95e   :  { %1763 = vmatpush.msra.mxu3 %v3718_v24  ;;  %1783 = vmatpush.msra.mxu2 %v3189_v34 }
 0x95f   :  { %1688 = vmatpush.msrb.mxu1 %v3342_v52 }
 0x960   :  { %1764 = vmatpush.msra.mxu3 %v3111_v19  ;;  %1784 = vmatpush.msra.mxu2 %v3201_v35 }
 0x961   :  { %1689 = vmatpush.msrb.mxu1 %v3351_v22 }
 0x962   :  { %1765 = vmatpush.msra.mxu3 %v3123_v39  ;;  %1785 = vmatpush.msra.mxu2 %v3211_v38  ;;  %v4393_v39 = vld [vmem:[#allocation16_spill] sm:$0xff]  ;;  %v4395_v38 = vld [vmem:[#allocation21_spill] sm:$0xff] }
 0x963   :  { %1690 = vmatpush.msrb.mxu1 %v3359_v59 }
 0x964   :  { %1766 = vmatpush.msra.mxu3 %v3140_v27  ;;  %1786 = vmatpush.msra.mxu2 %v3225_v41 }
 0x965   :  { %1691 = vmatpush.msrb.mxu1 %v3367_v49 }
 0x966   :  { %1767 = vmatpush.msra.mxu3 %v3158_v31  ;;  %1787 = vmatpush.msra.mxu2 %v3236_v43  ;;  %v4394_v31 = vld [vmem:[#allocation22_spill] sm:$0xff] }
 0x967   :  { %1692 = vmatpush.msrb.mxu1 %v3378_v21 }
 0x968   :  { %1768 = vmatpush.msra.mxu3 %v4379_v26  ;;  %1788 = vmatpush.msra.mxu2 %v4380_v5 }
 0x969   :  { %1693 = vmatpush.msrb.mxu1 %v4381_v6 }
 0x96a   :  { %1769 = vmatpush.msra.mxu3 %v4382_v7  ;;  %1789 = vmatpush.msra.mxu2 %v4383_v8  ;;  %v4397_v8 = vld [vmem:[#allocation29_spill] sm:$0xff] }
 0x96b   :  { %1694 = vmatpush.msrb.mxu1 %v4384_v11 }
 0x96c   :  { %1770 = vmatpush.msra.mxu3 %v4385_v15  ;;  %1790 = vmatpush.msra.mxu2 %v4386_v17 }
 0x96d   :  { %1695 = vmatpush.msrb.mxu1 %v4387_v63 }
 0x96e   :  { %1771 = vmatpush.msra.mxu3 %v4388_v45  ;;  %1791 = vmatpush.msra.mxu2 %v4389_v42 }
 0x9cb   :  { %v1403_v19 = vpop.f32.mrf.mxu1 }
 0x9cc   :  { %v1404_v27 = vadd.f32 %v1403_v19, %v4393_v39  ;;  %v4334_v19 = vrot.slane %v3655_v62, 6 }
 0x9ce   :  { %v1448_v29 = vrot.slane %v1404_v27, 4 }
 0x9d0   :  { %v1452_v33 = vadd.f32 %v1448_v29, %v4394_v31 }
 0x9d1   :  { %v1423_v34 = vpop.f32.mrf.mxu3 }
 0x9d2   :  { %v2344_v35 = vmul.f32 -1.442695, %v1452_v33  ;;  %v1424_v41 = vadd.f32 %v1423_v34, %v4395_v38  ;;  %v1443_v26 = vpop.f32.mrf.mxu2 }
 0x9d3   :  { %v1444_v15 = vadd.f32 %v1443_v26, %v4397_v8  ;;  %v3827_v26 = vld [vmem:[%s4286_s5 + $0x170] sm:$0xff] }
 0x9d4   :  { %2500 = vpow2.f32 %v2344_v35  ;;  %v1449_v43 = vrot.slane %v1424_v41, 4  ;;  %v2129_v35 = vsel %vm2128_vm15, %v3595_v55, %v3655_v62 }
 0x9d5   :  { %v1493_v61 = vrot.slane %v1444_v15, 4  ;;  %v3846_v15 = vld [vmem:[%s4286_s5 + $0x148] sm:$0xff] }
 0x9d6   :  { %v1453_v54 = vadd.f32 %v1449_v43, %v4396_v48  ;;  %v3768_v48 = vld [vmem:[%s4286_s5 + $0x1d8] sm:$0xff] }
 0x9d8   :  { %v2345_v1 = vmul.f32 -1.442695, %v1453_v54  ;;  %v3775_v54 = vld [vmem:[%s4286_s5 + $0x1d0] sm:$0xff] }
 0x9da   :  { %v2501_v3 = vpop.eup %2500  ;;  %2502 = vpow2.f32 %v2345_v1  ;;  %v3781_v1 = vld [vmem:[%s4286_s5 + $0x1c0] sm:$0xff] }
 0x9db   :  { %v1460_v25 = vadd.f32 1.0, %v2501_v3  ;;  %v3788_v3 = vld [vmem:[%s4286_s5 + $0x1b8] sm:$0xff] }
 0x9dd   :  { %2504 = vrcp.f32 %v1460_v25  ;;  %v1473_v7 = vand.u32 2147483648, %v1460_v25  ;;  %v1471_v45 = vand.u32 2147483647, %v1460_v25  ;;  %vm1467_vm9 = vweird.f32 %v1460_v25 }
 0x9df   :  { %v1474_v37 = vor.u32 1.1754944e-38, %v1473_v7  ;;  %vm1472_vm11 = vcmp.eq.f32.partialorder %v1471_v45, 8.507059e+37  ;;  %v3840_v7 = vld [vmem:[%s4286_s5 + $0x158] sm:$0xff]  ;;  %v3859_v45 = vld [vmem:[%s4286_s5 + $0x130] sm:$0xff] }
 0x9e0   :  { %v2503_v56 = vpop.eup %2502 }
 0x9e1   :  { %v1461_v12 = vadd.f32 1.0, %v2503_v56  ;;  %v3801_v56 = vld [vmem:[%s4286_s5 + $0x1a0] sm:$0xff] }
 0x9e3   :  { %v2505_v0 = vpop.eup %2504  ;;  %2506 = vrcp.f32 %v1461_v12  ;;  %v1488_v28 = vand.u32 2147483648, %v1461_v12  ;;  %v1486_v36 = vand.u32 2147483647, %v1461_v12  ;;  %vm1482_vm12 = vweird.f32 %v1461_v12 }
 0x9e4   :  { %v1463_v44 = vmul.f32 %v2505_v0, %v1460_v25  ;;  %vm1468_vm8 = vweird.f32 %v2505_v0  ;;  %v3794_v25 = vld [vmem:[%s4286_s5 + $0x1a8] sm:$0xff] }
 0x9e5   :  { %vm1469_vm10 = vmor %vm1467_vm9, %vm1468_vm8  ;;  %v1489_v32 = vor.u32 1.1754944e-38, %v1488_v28  ;;  %vm1487_vm14 = vcmp.eq.f32.partialorder %v1486_v36, 8.507059e+37  ;;  %v3970_v28 = vld [vmem:[%s4286_s5 + $0x68] sm:$0xff] }
 0x9e6   :  { %v1464_v5 = vsub.f32 1.0, %v1463_v44  ;;  %v3820_v44 = vld [vmem:[%s4286_s5 + $0x178] sm:$0xff]  ;;  %4399 = vst [vmem:[#allocation9_spill] sm:$0xff] %v3970_v28 }
 0x9e8   :  { %v1465_v17 = vmul.f32 %v2505_v0, %v1464_v5  ;;  %v3833_v5 = vld [vmem:[%s4286_s5 + $0x160] sm:$0xff] }
 0x9e9   :  { %v2507_v42 = vpop.eup %2506 }
 0x9ea   :  { %v1478_v51 = vmul.f32 %v2507_v42, %v1461_v12  ;;  %v1466_v2 = vadd.f32 %v2505_v0, %v1465_v17  ;;  %vm1483_vm5 = vweird.f32 %v2507_v42  ;;  %v3807_v12 = vld [vmem:[%s4286_s5 + $0x190] sm:$0xff]  ;;  %v3853_v17 = vld [vmem:[%s4286_s5 + $0x140] sm:$0xff] }
 0x9eb   :  { %vm1484_vm13 = vmor %vm1482_vm12, %vm1483_vm5 }
 0x9ec   :  { %v1479_v20 = vsub.f32 1.0, %v1478_v51  ;;  %v1470_v9 = vsel %vm1469_vm10, %v2505_v0, %v1466_v2  ;;  %v3814_v0 = vld [vmem:[%s4286_s5 + $0x188] sm:$0xff]  ;;  %v3879_v2 = vld [vmem:[%s4286_s5 + $0x110] sm:$0xff] }
 0x9ed   :  { %v1475_v23 = vsel %vm1472_vm11, %v1474_v37, %v1470_v9  ;;  %v3873_v51 = vld [vmem:[%s4286_s5 + $0x108] sm:$0xff]  ;;  %v3892_v37 = vld [vmem:[%s4286_s5 + $0xf8] sm:$0xff]  ;;  %vm2134_vm11 = vcmask 1045504  }
 0x9ee   :  { %v1480_v57 = vmul.f32 %v2507_v42, %v1479_v20  ;;  %v1495_v53 = vmul.f32 %v1493_v61, %v1475_v23  ;;  %v3905_v20 = vld [vmem:[%s4286_s5 + $0xe0] sm:$0xff]  ;;  %v3918_v9 = vld [vmem:[%s4286_s5 + $0xc8] sm:$0xff]  ;;  %v3931_v61 = vld [vmem:[%s4286_s5 + $0xb0] sm:$0xff] }
 0x9ef   :  { %v3944_v23 = vld [vmem:[%s4286_s5 + $0x98] sm:$0xff] }
 0x9f0   :  { %v1481_v50 = vadd.f32 %v2507_v42, %v1480_v57  ;;  %v1496_v4 = vadd.f32 %v1495_v53, %v4398_v40  ;;  %v3957_v57 = vld [vmem:[%s4286_s5 + $0x80] sm:$0xff] }
 0x9f2   :  { %v1485_v58 = vsel %vm1484_vm13, %v2507_v42, %v1481_v50  ;;  %2508 = vtanh.f32 %v1496_v4  ;;  %v3866_v42 = vld [vmem:[%s4286_s5 + $0x128] sm:$0xff] }
 0x9f3   :  { %v1490_v10 = vsel %vm1487_vm14, %v1489_v32, %v1485_v58  ;;  %v4400_v32 = vld [vmem:[#allocation23_spill] sm:$0xff] }
 0x9f4   :  { %v1498_v27 = vsub.f32 1.0, %v1490_v10  ;;  %v1502_v33 = vmul.f32 %v4334_v19, %v1490_v10  ;;  %v4401_v10 = vld [vmem:[#allocation24_spill] sm:$0xff] }
 0x9f8   :  { %v2509_v29 = vpop.eup %2508 }
 0x9f9   :  { %v1499_v31 = vmul.f32 %v2509_v29, %v1498_v27 }
 0x9fb   :  { %v3755_v34 = vadd.f32 %v1502_v33, %v1499_v31 }
 0x9fd   :  { %v1505_v41 = vrot.slane %v3755_v34, 4  ;;  %v3763_v43 = vsel %vm2131_vm1, %v2129_v35, %v3755_v34 }
 0x9ff   :  { %1523 = vmatmul.f32.vlgmr.msrb.gmra.mxu0 %v1505_v41  ;;  %1543 = vmatmul.f32.vlgmr.msra.gmra.mxu1 %v1505_v41 }
 0xa00   :  { %1563 = vmatmul.f32.vlgmr.msrb.gmra.mxu3 %v1505_v41  ;;  %1796 = vmatpush.msrb.mxu0 %v3768_v48 }
 0xa01   :  { %1878 = vmatpush.msra.mxu1 %v3662_v47  ;;  %1898 = vmatpush.msrb.mxu3 %v3775_v54 }
 0xa02   :  { %1797 = vmatpush.msrb.mxu0 %v3781_v1 }
 0xa03   :  { %1879 = vmatpush.msra.mxu1 %v3670_v30  ;;  %1899 = vmatpush.msrb.mxu3 %v3788_v3 }
 0xa04   :  { %1798 = vmatpush.msrb.mxu0 %v3794_v25 }
 0xa05   :  { %1880 = vmatpush.msra.mxu1 %v3678_v46  ;;  %1900 = vmatpush.msrb.mxu3 %v3801_v56 }
 0xa06   :  { %1799 = vmatpush.msrb.mxu0 %v3807_v12 }
 0xa07   :  { %1881 = vmatpush.msra.mxu1 %v3686_v13  ;;  %1901 = vmatpush.msrb.mxu3 %v3814_v0 }
 0xa08   :  { %1800 = vmatpush.msrb.mxu0 %v3820_v44 }
 0xa09   :  { %1882 = vmatpush.msra.mxu1 %v3694_v16  ;;  %1902 = vmatpush.msrb.mxu3 %v3827_v26 }
 0xa0a   :  { %1801 = vmatpush.msrb.mxu0 %v3833_v5 }
 0xa0b   :  { %1883 = vmatpush.msra.mxu1 %v3702_v18  ;;  %1903 = vmatpush.msrb.mxu3 %v3840_v7 }
 0xa0c   :  { %1802 = vmatpush.msrb.mxu0 %v3846_v15 }
 0xa0d   :  { %1884 = vmatpush.msra.mxu1 %v3710_v14  ;;  %1904 = vmatpush.msrb.mxu3 %v3853_v17 }
 0xa0e   :  { %1803 = vmatpush.msrb.mxu0 %v3859_v45 }
 0xa0f   :  { %1885 = vmatpush.msra.mxu1 %v3718_v24  ;;  %1905 = vmatpush.msrb.mxu3 %v3866_v42 }
 0xa10   :  { %1804 = vmatpush.msrb.mxu0 %v3342_v52  ;;  %v3886_v52 = vld [vmem:[%s4286_s5 + $0xf0] sm:$0xff] }
 0xa11   :  { %1886 = vmatpush.msra.mxu1 %v3873_v51  ;;  %1906 = vmatpush.msrb.mxu3 %v3879_v2 }
 0xa12   :  { %1805 = vmatpush.msrb.mxu0 %v3351_v22  ;;  %v3899_v22 = vld [vmem:[%s4286_s5 + $0xd8] sm:$0xff] }
 0xa13   :  { %1887 = vmatpush.msra.mxu1 %v3886_v52  ;;  %1907 = vmatpush.msrb.mxu3 %v3892_v37 }
 0xa14   :  { %1806 = vmatpush.msrb.mxu0 %v3359_v59  ;;  %v3912_v59 = vld [vmem:[%s4286_s5 + $0xc0] sm:$0xff] }
 0xa15   :  { %1888 = vmatpush.msra.mxu1 %v3899_v22  ;;  %1908 = vmatpush.msrb.mxu3 %v3905_v20 }
 0xa16   :  { %1807 = vmatpush.msrb.mxu0 %v3367_v49  ;;  %v3925_v49 = vld [vmem:[%s4286_s5 + $0xa8] sm:$0xff] }
 0xa17   :  { %1889 = vmatpush.msra.mxu1 %v3912_v59  ;;  %1909 = vmatpush.msrb.mxu3 %v3918_v9 }
 0xa18   :  { %1808 = vmatpush.msrb.mxu0 %v3378_v21  ;;  %v3938_v21 = vld [vmem:[%s4286_s5 + $0x90] sm:$0xff] }
 0xa19   :  { %1890 = vmatpush.msra.mxu1 %v3925_v49  ;;  %1910 = vmatpush.msrb.mxu3 %v3931_v61 }
 0xa1a   :  { %1809 = vmatpush.msrb.mxu0 %v4381_v6  ;;  %v3951_v6 = vld [vmem:[%s4286_s5 + $0x78] sm:$0xff] }
 0xa1b   :  { %1891 = vmatpush.msra.mxu1 %v3938_v21  ;;  %1911 = vmatpush.msrb.mxu3 %v3944_v23 }
 0xa1c   :  { %1810 = vmatpush.msrb.mxu0 %v4384_v11  ;;  %v3964_v11 = vld [vmem:[%s4286_s5 + $0x60] sm:$0xff] }
 0xa1d   :  { %1892 = vmatpush.msra.mxu1 %v3951_v6  ;;  %1912 = vmatpush.msrb.mxu3 %v3957_v57 }
 0xa1e   :  { %1811 = vmatpush.msrb.mxu0 %v4387_v63 }
 0xa1f   :  { %1893 = vmatpush.msra.mxu1 %v3964_v11  ;;  %1913 = vmatpush.msrb.mxu3 %v3970_v28 }
 0xa7c   :  { %v1524_v53 = vpop.f32.mrf.mxu0  ;;  %v1544_v36 = vpop.f32.mrf.mxu1 }
 0xa7d   :  { %v1525_v50 = vadd.f32 %v1524_v53, %v4393_v39  ;;  %v1545_v63 = vadd.f32 %v1544_v36, %v4395_v38 }
 0xa7f   :  { %v1569_v40 = vrot.slane %v1525_v50, 2  ;;  %v1570_v4 = vrot.slane %v1545_v63, 2 }
 0xa81   :  { %v1573_v58 = vadd.f32 %v1569_v40, %v4400_v32  ;;  %v1574_v27 = vadd.f32 %v1570_v4, %v4401_v10 }
 0xa83   :  { %v2346_v29 = vmul.f32 -1.442695, %v1573_v58  ;;  %v2347_v31 = vmul.f32 -1.442695, %v1574_v27  ;;  %v1564_v50 = vpop.f32.mrf.mxu3 }
 0xa84   :  { %v1565_v4 = vadd.f32 %v1564_v50, %v4397_v8 }
 0xa85   :  { %2510 = vpow2.f32 %v2346_v29 }
 0xa86   :  { %2512 = vpow2.f32 %v2347_v31 }
 0xa8b   :  { %v2511_v33 = vpop.eup %2510 }
 0xa8c   :  { %v2513_v35 = vpop.eup %2512  ;;  %v1581_v41 = vadd.f32 1.0, %v2511_v33  ;;  %v1614_v33 = vrot.slane %v1565_v4, 2 }
 0xa8d   :  { %v1582_v19 = vadd.f32 1.0, %v2513_v35 }
 0xa8e   :  { %2514 = vrcp.f32 %v1581_v41  ;;  %v1594_v40 = vand.u32 2147483648, %v1581_v41  ;;  %v1592_v58 = vand.u32 2147483647, %v1581_v41  ;;  %vm1588_vm3 = vweird.f32 %v1581_v41 }
 0xa8f   :  { %2516 = vrcp.f32 %v1582_v19  ;;  %v1609_v28 = vand.u32 2147483648, %v1582_v19  ;;  %vm1603_vm8 = vweird.f32 %v1582_v19 }
 0xa90   :  { %v1595_v29 = vor.u32 1.1754944e-38, %v1594_v40  ;;  %vm1593_vm6 = vcmp.eq.f32.partialorder %v1592_v58, 8.507059e+37 }
 0xa91   :  { %v1610_v8 = vor.u32 1.1754944e-38, %v1609_v28 }
 0xa94   :  { %v2515_v55 = vpop.eup %2514 }
 0xa95   :  { %v2517_v53 = vpop.eup %2516  ;;  %v1584_v62 = vmul.f32 %v2515_v55, %v1581_v41  ;;  %vm1589_vm2 = vweird.f32 %v2515_v55 }
 0xa96   :  { %v1599_v36 = vmul.f32 %v2517_v53, %v1582_v19  ;;  %vm1590_vm4 = vmor %vm1588_vm3, %vm1589_vm2  ;;  %vm1604_vm7 = vweird.f32 %v2517_v53 }
 0xa97   :  { %v1585_v63 = vsub.f32 1.0, %v1584_v62  ;;  %vm1605_vm9 = vmor %vm1603_vm8, %vm1604_vm7 }
 0xa98   :  { %v1600_v39 = vsub.f32 1.0, %v1599_v36  ;;  %v1607_v36 = vand.u32 2147483647, %v1582_v19 }
 0xa99   :  { %v1586_v32 = vmul.f32 %v2515_v55, %v1585_v63 }
 0xa9a   :  { %v1601_v10 = vmul.f32 %v2517_v53, %v1600_v39  ;;  %vm1608_vm10 = vcmp.eq.f32.partialorder %v1607_v36, 8.507059e+37 }
 0xa9b   :  { %v1587_v27 = vadd.f32 %v2515_v55, %v1586_v32 }
 0xa9c   :  { %v1602_v38 = vadd.f32 %v2517_v53, %v1601_v10 }
 0xa9d   :  { %v1591_v31 = vsel %vm1590_vm4, %v2515_v55, %v1587_v27  ;;  %v1621_v55 = vrot.slane %v3755_v34, 6 }
 0xa9e   :  { %v1596_v35 = vsel %vm1593_vm6, %v1595_v29, %v1591_v31  ;;  %v1606_v63 = vsel %vm1605_vm9, %v2517_v53, %v1602_v38  ;;  %v4407_v29 = vld [vmem:[#allocation29_spill] sm:$0xff] }
 0xa9f   :  { %v1616_v62 = vmul.f32 %v1614_v33, %v1596_v35  ;;  %v1611_v39 = vsel %vm1608_vm10, %v1610_v8, %v1606_v63  ;;  %v4403_v8 = vld [vmem:[#allocation21_spill] sm:$0xff] }
 0xaa0   :  { %v1619_v41 = vsub.f32 1.0, %v1611_v39  ;;  %v1623_v32 = vmul.f32 %v1621_v55, %v1611_v39  ;;  %v4408_v39 = vld [vmem:[#allocation25_spill] sm:$0xff] }
 0xaa1   :  { %v1617_v50 = vadd.f32 %v1616_v62, %v4391_v60  ;;  %v4016_v60 = vld [vmem:[%s4286_s5 + $0x118] sm:$0xff] }
 0xaa3   :  { %2518 = vtanh.f32 %v1617_v50 }
 0xaa9   :  { %v2519_v40 = vpop.eup %2518 }
 0xaaa   :  { %v1620_v4 = vmul.f32 %v2519_v40, %v1619_v41 }
 0xaac   :  { %v1624_v58 = vadd.f32 %v1623_v32, %v1620_v4 }
 0xaae   :  { %v3980_v10 = vrot.slane %v1624_v58, 6  ;;  %v3984_v19 = vsel %vm2134_vm11, %v3763_v43, %v1624_v58 }
 0xab0   :  { %1656 = vmatmul.f32.vlgmr.msrb.gmra.mxu2 %v3980_v10  ;;  %1676 = vmatmul.f32.vlgmr.msra.gmra.mxu0 %v3980_v10 }
 0xab1   :  { %1696 = vmatmul.f32.vlgmr.msrb.gmra.mxu1 %v3980_v10  ;;  %1918 = vmatpush.msrb.mxu2 %v3768_v48 }
 0xab2   :  { %1999 = vmatpush.msra.mxu0 %v3662_v47  ;;  %2019 = vmatpush.msrb.mxu1 %v3775_v54  ;;  %v4024_v47 = vld [vmem:[%s4286_s5 + $0x100] sm:$0xff]  ;;  %v4404_v54 = vld [vmem:[#allocation17_spill] sm:$0xff] }
 0xab3   :  { %1919 = vmatpush.msrb.mxu2 %v3781_v1 }
 0xab4   :  { %2000 = vmatpush.msra.mxu0 %v3670_v30  ;;  %2020 = vmatpush.msrb.mxu1 %v3788_v3  ;;  %v4032_v30 = vld [vmem:[%s4286_s5 + $0xe8] sm:$0xff] }
 0xab5   :  { %1920 = vmatpush.msrb.mxu2 %v3794_v25 }
 0xab6   :  { %2001 = vmatpush.msra.mxu0 %v3678_v46  ;;  %2021 = vmatpush.msrb.mxu1 %v3801_v56  ;;  %v4040_v46 = vld [vmem:[%s4286_s5 + $0xd0] sm:$0xff] }
 0xab7   :  { %1921 = vmatpush.msrb.mxu2 %v3807_v12 }
 0xab8   :  { %2002 = vmatpush.msra.mxu0 %v3686_v13  ;;  %2022 = vmatpush.msrb.mxu1 %v3814_v0  ;;  %v4048_v13 = vld [vmem:[%s4286_s5 + $0xb8] sm:$0xff] }
 0xab9   :  { %1922 = vmatpush.msrb.mxu2 %v3820_v44 }
 0xaba   :  { %2003 = vmatpush.msra.mxu0 %v3694_v16  ;;  %2023 = vmatpush.msrb.mxu1 %v3827_v26  ;;  %v4056_v16 = vld [vmem:[%s4286_s5 + $0xa0] sm:$0xff]  ;;  %v4405_v26 = vld [vmem:[#allocation16_spill] sm:$0xff] }
 0xabb   :  { %1923 = vmatpush.msrb.mxu2 %v3833_v5 }
 0xabc   :  { %2004 = vmatpush.msra.mxu0 %v3702_v18  ;;  %2024 = vmatpush.msrb.mxu1 %v3840_v7  ;;  %v4064_v18 = vld [vmem:[%s4286_s5 + $0x88] sm:$0xff] }
 0xabd   :  { %1924 = vmatpush.msrb.mxu2 %v3846_v15 }
 0xabe   :  { %2005 = vmatpush.msra.mxu0 %v3710_v14  ;;  %2025 = vmatpush.msrb.mxu1 %v3853_v17  ;;  %v4072_v14 = vld [vmem:[%s4286_s5 + $0x70] sm:$0xff]  ;;  %v4406_v17 = vld [vmem:[#allocation18_spill] sm:$0xff] }
 0xabf   :  { %1925 = vmatpush.msrb.mxu2 %v3859_v45 }
 0xac0   :  { %2006 = vmatpush.msra.mxu0 %v3718_v24  ;;  %2026 = vmatpush.msrb.mxu1 %v3866_v42  ;;  %v4402_v24 = vld [vmem:[#allocation9_spill] sm:$0xff] }
 0xac1   :  { %1926 = vmatpush.msrb.mxu2 %v4016_v60 }
 0xac2   :  { %2007 = vmatpush.msra.mxu0 %v3873_v51  ;;  %2027 = vmatpush.msrb.mxu1 %v3879_v2 }
 0xac3   :  { %1927 = vmatpush.msrb.mxu2 %v4024_v47 }
 0xac4   :  { %2008 = vmatpush.msra.mxu0 %v3886_v52  ;;  %2028 = vmatpush.msrb.mxu1 %v3892_v37 }
 0xac5   :  { %1928 = vmatpush.msrb.mxu2 %v4032_v30 }
 0xac6   :  { %2009 = vmatpush.msra.mxu0 %v3899_v22  ;;  %2029 = vmatpush.msrb.mxu1 %v3905_v20 }
 0xac7   :  { %1929 = vmatpush.msrb.mxu2 %v4040_v46 }
 0xac8   :  { %2010 = vmatpush.msra.mxu0 %v3912_v59  ;;  %2030 = vmatpush.msrb.mxu1 %v3918_v9 }
 0xac9   :  { %1930 = vmatpush.msrb.mxu2 %v4048_v13 }
 0xaca   :  { %2011 = vmatpush.msra.mxu0 %v3925_v49  ;;  %2031 = vmatpush.msrb.mxu1 %v3931_v61 }
 0xacb   :  { %1931 = vmatpush.msrb.mxu2 %v4056_v16 }
 0xacc   :  { %2012 = vmatpush.msra.mxu0 %v3938_v21  ;;  %2032 = vmatpush.msrb.mxu1 %v3944_v23 }
 0xacd   :  { %1932 = vmatpush.msrb.mxu2 %v4064_v18 }
 0xace   :  { %2013 = vmatpush.msra.mxu0 %v3951_v6  ;;  %2033 = vmatpush.msrb.mxu1 %v3957_v57 }
 0xacf   :  { %1933 = vmatpush.msrb.mxu2 %v4072_v14 }
 0xad0   :  { %2014 = vmatpush.msra.mxu0 %v3964_v11  ;;  %2034 = vmatpush.msrb.mxu1 %v4402_v24 }
 0xb2d   :  { %v1677_v38 = vpop.f32.mrf.mxu0 }
 0xb2e   :  { %v1678_v43 = vadd.f32 %v1677_v38, %v4403_v8  ;;  %v1697_v28 = vpop.f32.mrf.mxu1 }
 0xb2f   :  { %v1698_v31 = vadd.f32 %v1697_v28, %v4407_v29  ;;  %v2155_v28 = vld [vmem:[%s4288_s7] sm:$0xff] }
 0xb30   :  { %v1701_v3 = vadd.f32 %v1678_v43, %v4404_v54 }
 0xb32   :  { %v2349_v56 = vmul.f32 -1.442695, %v1701_v3 }
 0xb33   :  { %v1657_v0 = vpop.f32.mrf.mxu2 }
 0xb34   :  { %2520 = vpow2.f32 %v2349_v56  ;;  %v1658_v7 = vadd.f32 %v1657_v0, %v4405_v26  ;;  %v2164_v0 = vld [vmem:[%s4288_s7 + $0x48] sm:$0xff] }
 0xb36   :  { %v1700_v42 = vadd.f32 %v1658_v7, %v4406_v17  ;;  %v2163_v7 = vld [vmem:[%s4288_s7 + $0x40] sm:$0xff] }
 0xb38   :  { %v2348_v51 = vmul.f32 -1.442695, %v1700_v42  ;;  %v2162_v42 = vld [vmem:[%s4288_s7 + $0x38] sm:$0xff] }
 0xb3a   :  { %v2521_v2 = vpop.eup %2520  ;;  %2522 = vpow2.f32 %v2348_v51  ;;  %v2161_v51 = vld [vmem:[%s4288_s7 + $0x30] sm:$0xff] }
 0xb3b   :  { %v1709_v52 = vadd.f32 1.0, %v2521_v2 }
 0xb3d   :  { %2524 = vrcp.f32 %v1709_v52  ;;  %v1736_v36 = vand.u32 2147483648, %v1709_v52  ;;  %vm1730_vm3 = vweird.f32 %v1709_v52  ;;  %v1734_v63 = vand.u32 2147483647, %v1709_v52 }
 0xb3f   :  { %v1737_v40 = vor.u32 1.1754944e-38, %v1736_v36  ;;  %vm1735_vm6 = vcmp.eq.f32.partialorder %v1734_v63, 8.507059e+37 }
 0xb40   :  { %v2523_v37 = vpop.eup %2522 }
 0xb41   :  { %v1708_v22 = vadd.f32 1.0, %v2523_v37 }
 0xb43   :  { %2526 = vrcp.f32 %v1708_v22  ;;  %v2525_v20 = vpop.eup %2524  ;;  %v1721_v23 = vand.u32 2147483648, %v1708_v22  ;;  %v1719_v57 = vand.u32 2147483647, %v1708_v22  ;;  %vm1715_vm12 = vweird.f32 %v1708_v22 }
 0xb44   :  { %v1726_v59 = vmul.f32 %v2525_v20, %v1709_v52  ;;  %vm1731_vm2 = vweird.f32 %v2525_v20 }
 0xb45   :  { %v1722_v27 = vor.u32 1.1754944e-38, %v1721_v23  ;;  %vm1720_vm14 = vcmp.eq.f32.partialorder %v1719_v57, 8.507059e+37  ;;  %vm1732_vm4 = vmor %vm1730_vm3, %vm1731_vm2  ;;  %vm2143_vm2 = vcmp.ge.f32.partialorder %v3984_v19, 0.0 }
 0xb46   :  { %v1727_v61 = vsub.f32 1.0, %v1726_v59  ;;  %v2159_v59 = vld [vmem:[%s4288_s7 + $0x20] sm:$0xff] }
 0xb48   :  { %v1728_v11 = vmul.f32 %v2525_v20, %v1727_v61 }
 0xb49   :  { %v2527_v9 = vpop.eup %2526 }
 0xb4a   :  { %v1711_v49 = vmul.f32 %v2527_v9, %v1708_v22  ;;  %vm1716_vm5 = vweird.f32 %v2527_v9  ;;  %v1729_v35 = vadd.f32 %v2525_v20, %v1728_v11  ;;  %v2160_v22 = vld [vmem:[%s4288_s7 + $0x28] sm:$0xff] }
 0xb4b   :  { %vm1717_vm13 = vmor %vm1715_vm12, %vm1716_vm5 }
 0xb4c   :  { %v1712_v21 = vsub.f32 1.0, %v1711_v49  ;;  %v1733_v55 = vsel %vm1732_vm4, %v2525_v20, %v1729_v35  ;;  %v2157_v49 = vld [vmem:[%s4288_s7 + $0x10] sm:$0xff] }
 0xb4d   :  { %v1738_v4 = vsel %vm1735_vm6, %v1737_v40, %v1733_v55 }
 0xb4e   :  { %v1713_v6 = vmul.f32 %v2527_v9, %v1712_v21  ;;  %v1743_v32 = vsub.f32 1.0, %v1738_v4  ;;  %v1745_v38 = vmul.f32 %v1738_v4, %v3980_v10  ;;  %v2156_v21 = vld [vmem:[%s4288_s7 + $0x8] sm:$0xff] }
 0xb50   :  { %v1714_v53 = vadd.f32 %v2527_v9, %v1713_v6 }
 0xb52   :  { %v1718_v33 = vsel %vm1717_vm13, %v2527_v9, %v1714_v53  ;;  %v2158_v9 = vld [vmem:[%s4288_s7 + $0x18] sm:$0xff] }
 0xb53   :  { %v1723_v62 = vsel %vm1720_vm14, %v1722_v27, %v1718_v33 }
 0xb54   :  { %v1740_v50 = vmul.f32 %v1723_v62, %v1698_v31 }
 0xb56   :  { %v1741_v41 = vadd.f32 %v1740_v50, %v4408_v39 }
 0xb58   :  { %2528 = vtanh.f32 %v1741_v41 }
 0xb5e   :  { %v2529_v58 = vpop.eup %2528 }
 0xb5f   :  { %v1744_v24 = vmul.f32 %v2529_v58, %v1743_v32 }
 0xb61   :  { %v4084_v43 = vadd.f32 %v1745_v38, %v1744_v24  ;;  %v4411_v38 = vld [vmem:[#allocation27_spill] sm:$0xff] }
 0xb63   :  { %1772 = vmatmul.f32.vlgmr.msra.gmra.mxu3 %v4084_v43  ;;  %1792 = vmatmul.f32.vlgmr.msra.gmra.mxu2 %v4084_v43 }
 0xb64   :  { %1812 = vmatmul.f32.vlgmr.msrb.gmra.mxu0 %v4084_v43  ;;  %2039 = vmatpush.msra.mxu3 %v3768_v48  ;;  %v2170_v48 = vld [vmem:[%s4288_s7 + $0x78] sm:$0xff] }
 0xb65   :  { %2188 = vmatpush.msra.mxu2 %v2170_v48 }
 0xb66   :  { %2040 = vmatpush.msra.mxu3 %v3781_v1 }
 0xb68   :  { %2041 = vmatpush.msra.mxu3 %v3794_v25 }
 0xb6a   :  { %2042 = vmatpush.msra.mxu3 %v3807_v12  ;;  %v2169_v12 = vld [vmem:[%s4288_s7 + $0x70] sm:$0xff] }
 0xb6b   :  { %2189 = vmatpush.msra.mxu2 %v2169_v12 }
 0xb6c   :  { %2043 = vmatpush.msra.mxu3 %v3820_v44 }
 0xb6e   :  { %2044 = vmatpush.msra.mxu3 %v3833_v5 }
 0xb70   :  { %2045 = vmatpush.msra.mxu3 %v3846_v15  ;;  %v2168_v15 = vld [vmem:[%s4288_s7 + $0x68] sm:$0xff] }
 0xb71   :  { %2190 = vmatpush.msra.mxu2 %v2168_v15 }
 0xb72   :  { %2046 = vmatpush.msra.mxu3 %v3859_v45 }
 0xb74   :  { %2047 = vmatpush.msra.mxu3 %v4016_v60 }
 0xb76   :  { %2048 = vmatpush.msra.mxu3 %v4024_v47  ;;  %v2167_v47 = vld [vmem:[%s4288_s7 + $0x60] sm:$0xff] }
 0xb77   :  { %2191 = vmatpush.msra.mxu2 %v2167_v47 }
 0xb78   :  { %2049 = vmatpush.msra.mxu3 %v4032_v30  ;;  %v2166_v30 = vld [vmem:[%s4288_s7 + $0x58] sm:$0xff] }
 0xb79   :  { %2192 = vmatpush.msra.mxu2 %v2166_v30 }
 0xb7a   :  { %2050 = vmatpush.msra.mxu3 %v4040_v46  ;;  %v4409_v46 = vld [vmem:[#allocation19_spill] sm:$0xff] }
 0xb7c   :  { %2051 = vmatpush.msra.mxu3 %v4048_v13 }
 0xb7e   :  { %2052 = vmatpush.msra.mxu3 %v4056_v16  ;;  %v4410_v16 = vld [vmem:[#allocation20_spill] sm:$0xff] }
 0xb80   :  { %2053 = vmatpush.msra.mxu3 %v4064_v18 }
 0xb82   :  { %2054 = vmatpush.msra.mxu3 %v4072_v14  ;;  %v2165_v14 = vld [vmem:[%s4288_s7 + $0x50] sm:$0xff] }
 0xb83   :  { %2193 = vmatpush.msra.mxu2 %v2165_v14 }
 0xb85   :  { %2194 = vmatpush.msra.mxu2 %v2164_v0 }
 0xb87   :  { %2195 = vmatpush.msra.mxu2 %v2163_v7 }
 0xb89   :  { %2196 = vmatpush.msra.mxu2 %v2162_v42 }
 0xb8b   :  { %2197 = vmatpush.msra.mxu2 %v2161_v51 }
 0xb8d   :  { %2198 = vmatpush.msra.mxu2 %v2160_v22 }
 0xb8f   :  { %2199 = vmatpush.msra.mxu2 %v2159_v59 }
 0xb91   :  { %2200 = vmatpush.msra.mxu2 %v2158_v9 }
 0xb93   :  { %2201 = vmatpush.msra.mxu2 %v2157_v49 }
 0xb95   :  { %2202 = vmatpush.msra.mxu2 %v2156_v21 }
 0xb97   :  { %2203 = vmatpush.msra.mxu2 %v2155_v28 }
 0xbe1   :  { %v1813_v57 = vpop.f32.mrf.mxu0 }
 0xbe2   :  { %v1814_v33 = vadd.f32 %v1813_v57, %v4407_v29 }
 0xbe4   :  { %v1863_v41 = vrot.slane %v1814_v33, 6 }
 0xbe6   :  { %v1773_v1 = vpop.f32.mrf.mxu3  ;;  %v1793_v25 = vpop.f32.mrf.mxu2 }
 0xbe7   :  { %v1774_v44 = vadd.f32 %v1773_v1, %v4405_v26  ;;  %v1794_v5 = vadd.f32 %v1793_v25, %v4403_v8 }
 0xbe9   :  { %v1818_v45 = vrot.slane %v1774_v44, 6  ;;  %v1819_v60 = vrot.slane %v1794_v5, 6  ;;  %v1871_v5 = vrot.slane %v4084_v43, 6 }
 0xbeb   :  { %v1822_v13 = vadd.f32 %v1818_v45, %v4409_v46  ;;  %v1823_v18 = vadd.f32 %v1819_v60, %v4410_v16 }
 0xbed   :  { %v2350_v3 = vmul.f32 -1.442695, %v1822_v13  ;;  %v2351_v56 = vmul.f32 -1.442695, %v1823_v18  ;;  %v2147_v13 = vmul.f32 0.01, %v3984_v19 }
 0xbef   :  { %2530 = vpow2.f32 %v2350_v3  ;;  %v2151_v18 = vsel %vm2143_vm2, %v3984_v19, %v2147_v13  ;;  %v2184_v13 = vld [vmem:[%s4288_s7 + $0xe8] sm:$0xff] }
 0xbf0   :  { %2532 = vpow2.f32 %v2351_v56 }
 0xbf5   :  { %v2531_v2 = vpop.eup %2530 }
 0xbf6   :  { %v2533_v52 = vpop.eup %2532  ;;  %v1830_v37 = vadd.f32 1.0, %v2531_v2 }
 0xbf7   :  { %v1831_v20 = vadd.f32 1.0, %v2533_v52 }
 0xbf8   :  { %2534 = vrcp.f32 %v1830_v37  ;;  %v1843_v27 = vand.u32 2147483648, %v1830_v37  ;;  %v1841_v62 = vand.u32 2147483647, %v1830_v37  ;;  %vm1837_vm8 = vweird.f32 %v1830_v37 }
 0xbf9   :  { %2536 = vrcp.f32 %v1831_v20  ;;  %v1858_v58 = vand.u32 2147483648, %v1831_v20  ;;  %vm1852_vm12 = vweird.f32 %v1831_v20  ;;  %v1856_v24 = vand.u32 2147483647, %v1831_v20 }
 0xbfa   :  { %v1844_v63 = vor.u32 1.1754944e-38, %v1843_v27  ;;  %vm1842_vm10 = vcmp.eq.f32.partialorder %v1841_v62, 8.507059e+37 }
 0xbfb   :  { %v1859_v25 = vor.u32 1.1754944e-38, %v1858_v58  ;;  %vm1857_vm14 = vcmp.eq.f32.partialorder %v1856_v24, 8.507059e+37 }
 0xbfe   :  { %v2535_v61 = vpop.eup %2534 }
 0xbff   :  { %v2537_v23 = vpop.eup %2536  ;;  %v1833_v6 = vmul.f32 %v2535_v61, %v1830_v37  ;;  %vm1838_vm7 = vweird.f32 %v2535_v61 }
 0xc00   :  { %v1848_v11 = vmul.f32 %v2537_v23, %v1831_v20  ;;  %vm1839_vm9 = vmor %vm1837_vm8, %vm1838_vm7  ;;  %vm1853_vm5 = vweird.f32 %v2537_v23 }
 0xc01   :  { %v1834_v53 = vsub.f32 1.0, %v1833_v6  ;;  %vm1854_vm13 = vmor %vm1852_vm12, %vm1853_vm5 }
 0xc02   :  { %v1849_v31 = vsub.f32 1.0, %v1848_v11 }
 0xc03   :  { %v1835_v35 = vmul.f32 %v2535_v61, %v1834_v53 }
 0xc04   :  { %v1850_v36 = vmul.f32 %v2537_v23, %v1849_v31 }
 0xc05   :  { %v1836_v50 = vadd.f32 %v2535_v61, %v1835_v35 }
 0xc06   :  { %v1851_v4 = vadd.f32 %v2537_v23, %v1850_v36 }
 0xc07   :  { %v1840_v55 = vsel %vm1839_vm9, %v2535_v61, %v1836_v50 }
 0xc08   :  { %v1845_v40 = vsel %vm1842_vm10, %v1844_v63, %v1840_v55  ;;  %v1855_v1 = vsel %vm1854_vm13, %v2537_v23, %v1851_v4 }
 0xc09   :  { %v1865_v32 = vmul.f32 %v1863_v41, %v1845_v40  ;;  %v1860_v12 = vsel %vm1857_vm14, %v1859_v25, %v1855_v1 }
 0xc0a   :  { %v1868_v44 = vsub.f32 1.0, %v1860_v12  ;;  %v1873_v60 = vmul.f32 %v1871_v5, %v1860_v12 }
 0xc0b   :  { %v1866_v48 = vadd.f32 %v1865_v32, %v4411_v38 }
 0xc0d   :  { %2538 = vtanh.f32 %v1866_v48 }
 0xc13   :  { %v2539_v15 = vpop.eup %2538 }
 0xc14   :  { %v1869_v45 = vmul.f32 %v2539_v15, %v1868_v44  ;;  %v2186_v15 = vld [vmem:[%s4288_s7 + $0xf8] sm:$0xff] }
 0xc15   :  { %2211 = vmatpush.msrb.mxu0 %v2186_v15 }
 0xc16   :  { %v4160_v47 = vadd.f32 %v1873_v60, %v1869_v45  ;;  %v2185_v45 = vld [vmem:[%s4288_s7 + $0xf0] sm:$0xff] }
 0xc17   :  { %2212 = vmatpush.msrb.mxu0 %v2185_v45 }
 0xc18   :  { %v1876_v30 = vrot.slane %v4160_v47, 2  ;;  %v1992_v58 = vrot.slane %v4160_v47, 6 }
 0xc19   :  { %2213 = vmatpush.msrb.mxu0 %v2184_v13 }
 0xc1a   :  { %1894 = vmatmul.f32.vlgmr.msra.gmra.mxu1 %v1876_v30  ;;  %1914 = vmatmul.f32.vlgmr.msrb.gmra.mxu3 %v1876_v30 }
 0xc1b   :  { %1934 = vmatmul.f32.vlgmr.msrb.gmra.mxu2 %v1876_v30 }
 0xc23   :  { %2204 = vmatmul.f32.vlgmr.msra.gmra.mxu2 %v2151_v18 }
 0xc97   :  { %v1895_v14 = vpop.f32.mrf.mxu1 }
 0xc98   :  { %v1896_v3 = vadd.f32 %v1895_v14, %v4405_v26 }
 0xc9a   :  { %v1940_v56 = vrot.slane %v1896_v3, 4  ;;  %v2183_v3 = vld [vmem:[%s4288_s7 + $0xe0] sm:$0xff] }
 0xc9b   :  { %2214 = vmatpush.msrb.mxu0 %v2183_v3 }
 0xc9c   :  { %v1944_v0 = vadd.f32 %v1940_v56, %v4406_v17 }
 0xc9d   :  { %v1915_v7 = vpop.f32.mrf.mxu3 }
 0xc9e   :  { %v2352_v42 = vmul.f32 -1.442695, %v1944_v0  ;;  %v1916_v51 = vadd.f32 %v1915_v7, %v4403_v8  ;;  %v1935_v61 = vpop.f32.mrf.mxu2  ;;  %v2182_v7 = vld [vmem:[%s4288_s7 + $0xd8] sm:$0xff] }
 0xc9f   :  { %v1936_v23 = vadd.f32 %v1935_v61, %v4407_v29  ;;  %2215 = vmatpush.msrb.mxu0 %v2182_v7  ;;  %v2174_v61 = vld [vmem:[%s4288_s7 + $0x98] sm:$0xff] }
 0xca0   :  { %2540 = vpow2.f32 %v2352_v42  ;;  %v1941_v2 = vrot.slane %v1916_v51, 4 }
 0xca1   :  { %v1985_v33 = vrot.slane %v1936_v23, 4 }
 0xca2   :  { %v1945_v52 = vadd.f32 %v1941_v2, %v4404_v54 }
 0xca4   :  { %v2353_v37 = vmul.f32 -1.442695, %v1945_v52  ;;  %v2180_v52 = vld [vmem:[%s4288_s7 + $0xc8] sm:$0xff] }
 0xca6   :  { %v2541_v22 = vpop.eup %2540  ;;  %2542 = vpow2.f32 %v2353_v37  ;;  %v2179_v37 = vld [vmem:[%s4288_s7 + $0xc0] sm:$0xff] }
 0xca7   :  { %v1952_v20 = vadd.f32 1.0, %v2541_v22  ;;  %v2176_v22 = vld [vmem:[%s4288_s7 + $0xa8] sm:$0xff] }
 0xca9   :  { %2544 = vrcp.f32 %v1952_v20  ;;  %v1965_v21 = vand.u32 2147483648, %v1952_v20  ;;  %v1963_v57 = vand.u32 2147483647, %v1952_v20  ;;  %vm1959_vm4 = vweird.f32 %v1952_v20 }
 0xcab   :  { %v1966_v53 = vor.u32 1.1754944e-38, %v1965_v21  ;;  %vm1964_vm7 = vcmp.eq.f32.partialorder %v1963_v57, 8.507059e+37  ;;  %v2172_v21 = vld [vmem:[%s4288_s7 + $0x88] sm:$0xff] }
 0xcac   :  { %v2543_v19 = vpop.eup %2542 }
 0xcad   :  { %v1953_v59 = vadd.f32 1.0, %v2543_v19 }
 0xcaf   :  { %v2545_v9 = vpop.eup %2544  ;;  %2546 = vrcp.f32 %v1953_v59  ;;  %v1980_v36 = vand.u32 2147483648, %v1953_v59  ;;  %v1978_v63 = vand.u32 2147483647, %v1953_v59  ;;  %vm1974_vm9 = vweird.f32 %v1953_v59 }
 0xcb0   :  { %v1955_v49 = vmul.f32 %v2545_v9, %v1952_v20  ;;  %vm1960_vm3 = vweird.f32 %v2545_v9 }
 0xcb1   :  { %vm1961_vm6 = vmor %vm1959_vm4, %vm1960_vm3  ;;  %v1981_v40 = vor.u32 1.1754944e-38, %v1980_v36  ;;  %vm1979_vm5 = vcmp.eq.f32.partialorder %v1978_v63, 8.507059e+37 }
 0xcb2   :  { %v1956_v17 = vsub.f32 1.0, %v1955_v49 }
 0xcb4   :  { %v1957_v6 = vmul.f32 %v2545_v9, %v1956_v17  ;;  %v2173_v17 = vld [vmem:[%s4288_s7 + $0x90] sm:$0xff] }
 0xcb5   :  { %v2547_v11 = vpop.eup %2546 }
 0xcb6   :  { %v1970_v54 = vmul.f32 %v2547_v11, %v1953_v59  ;;  %v1958_v28 = vadd.f32 %v2545_v9, %v1957_v6  ;;  %vm1975_vm8 = vweird.f32 %v2547_v11  ;;  %v2171_v6 = vld [vmem:[%s4288_s7 + $0x80] sm:$0xff] }
 0xcb7   :  { %vm1976_vm10 = vmor %vm1974_vm9, %vm1975_vm8 }
 0xcb8   :  { %v1971_v27 = vsub.f32 1.0, %v1970_v54  ;;  %v1962_v31 = vsel %vm1961_vm6, %v2545_v9, %v1958_v28  ;;  %v2175_v9 = vld [vmem:[%s4288_s7 + $0xa0] sm:$0xff] }
 0xcb9   :  { %v1967_v35 = vsel %vm1964_vm7, %v1966_v53, %v1962_v31 }
 0xcba   :  { %v1972_v62 = vmul.f32 %v2547_v11, %v1971_v27  ;;  %v1987_v50 = vmul.f32 %v1985_v33, %v1967_v35 }
 0xcbc   :  { %v1973_v41 = vadd.f32 %v2547_v11, %v1972_v62  ;;  %v1988_v55 = vadd.f32 %v1987_v50, %v4408_v39  ;;  %v2137_v39 = vsel %vm2128_vm15, %v4084_v43, %v4160_v47 }
 0xcbe   :  { %v1977_v4 = vsel %vm1976_vm10, %v2547_v11, %v1973_v41  ;;  %2548 = vtanh.f32 %v1988_v55 }
 0xcbf   :  { %v1982_v32 = vsel %vm1979_vm5, %v1981_v40, %v1977_v4 }
 0xcc0   :  { %v1990_v24 = vsub.f32 1.0, %v1982_v32  ;;  %v1994_v25 = vmul.f32 %v1992_v58, %v1982_v32 }
 0xcc4   :  { %v2549_v48 = vpop.eup %2548 }
 0xcc5   :  { %v1991_v1 = vmul.f32 %v2549_v48, %v1990_v24 }
 0xcc7   :  { %v4175_v12 = vadd.f32 %v1994_v25, %v1991_v1 }
 0xcc9   :  { %v1997_v44 = vrot.slane %v4175_v12, 4  ;;  %v4183_v5 = vsel %vm2131_vm1, %v2137_v39, %v4175_v12  ;;  %v2113_v15 = vrot.slane %v4175_v12, 6  ;;  %v2120_v3 = vrot.slane %v4175_v12, 2 }
 0xccb   :  { %2015 = vmatmul.f32.vlgmr.msra.gmra.mxu0 %v1997_v44  ;;  %2035 = vmatmul.f32.vlgmr.msrb.gmra.mxu1 %v1997_v44 }
 0xccc   :  { %2055 = vmatmul.f32.vlgmr.msra.gmra.mxu3 %v1997_v44 }
 0xd48   :  { %v2016_v60 = vpop.f32.mrf.mxu0  ;;  %v2036_v30 = vpop.f32.mrf.mxu1 }
 0xd49   :  { %v2017_v18 = vadd.f32 %v2016_v60, %v4405_v26  ;;  %v2037_v14 = vadd.f32 %v2036_v30, %v4403_v8  ;;  %v2181_v8 = vld [vmem:[%s4288_s7 + $0xd0] sm:$0xff] }
 0xd4a   :  { %2216 = vmatpush.msrb.mxu0 %v2181_v8 }
 0xd4b   :  { %v2061_v56 = vrot.slane %v2017_v18, 2  ;;  %v2062_v0 = vrot.slane %v2037_v14, 2 }
 0xd4c   :  { %2217 = vmatpush.msrb.mxu0 %v2180_v52 }
 0xd4d   :  { %v2065_v42 = vadd.f32 %v2061_v56, %v4409_v46  ;;  %v2066_v51 = vadd.f32 %v2062_v0, %v4410_v16  ;;  %v2178_v46 = vld [vmem:[%s4288_s7 + $0xb8] sm:$0xff]  ;;  %v2177_v16 = vld [vmem:[%s4288_s7 + $0xb0] sm:$0xff]  ;;  %v2122_v0 = vrot.slane %v4084_v43, 2  ;;  %v4414_v43 = vld [vmem:[#allocation31_spill] sm:$0xff] }
 0xd4e   :  { %2218 = vmatpush.msrb.mxu0 %v2179_v37  ;;  %v2126_v52 = vrot.slane %v4414_v43, 2 }
 0xd4f   :  { %v2354_v26 = vmul.f32 -1.442695, %v2065_v42  ;;  %v2355_v2 = vmul.f32 -1.442695, %v2066_v51  ;;  %v2056_v28 = vpop.f32.mrf.mxu3 }
 0xd50   :  { %2219 = vmatpush.msrb.mxu0 %v2178_v46  ;;  %v2057_v33 = vadd.f32 %v2056_v28, %v4407_v29 }
 0xd51   :  { %2550 = vpow2.f32 %v2354_v26 }
 0xd52   :  { %2552 = vpow2.f32 %v2355_v2  ;;  %2220 = vmatpush.msrb.mxu0 %v2177_v16  ;;  %v2106_v55 = vrot.slane %v2057_v33, 2 }
 0xd54   :  { %2221 = vmatpush.msrb.mxu0 %v2176_v22  ;;  %v2205_v22 = vpop.f32.mrf.mxu2 }
 0xd56   :  { %2222 = vmatpush.msrb.mxu0 %v2175_v9  ;;  %v4415_v9 = vld [vmem:[#allocation3_spill] sm:$0xff] }
 0xd57   :  { %v2551_v20 = vpop.eup %2550 }
 0xd58   :  { %v2553_v19 = vpop.eup %2552  ;;  %v2073_v59 = vadd.f32 1.0, %v2551_v20  ;;  %2223 = vmatpush.msrb.mxu0 %v2174_v61 }
 0xd59   :  { %v2074_v49 = vadd.f32 1.0, %v2553_v19 }
 0xd5a   :  { %2554 = vrcp.f32 %v2073_v59  ;;  %2224 = vmatpush.msrb.mxu0 %v2173_v17  ;;  %v2086_v31 = vand.u32 2147483648, %v2073_v59  ;;  %v2084_v62 = vand.u32 2147483647, %v2073_v59  ;;  %vm2080_vm13 = vweird.f32 %v2073_v59 }
 0xd5b   :  { %2556 = vrcp.f32 %v2074_v49  ;;  %v2101_v24 = vand.u32 2147483648, %v2074_v49  ;;  %vm2095_vm4 = vweird.f32 %v2074_v49  ;;  %v2099_v48 = vand.u32 2147483647, %v2074_v49 }
 0xd5c   :  { %2225 = vmatpush.msrb.mxu0 %v2172_v21  ;;  %v2087_v63 = vor.u32 1.1754944e-38, %v2086_v31  ;;  %vm2085_vm2 = vcmp.eq.f32.partialorder %v2084_v62, 8.507059e+37 }
 0xd5d   :  { %v2102_v25 = vor.u32 1.1754944e-38, %v2101_v24  ;;  %vm2100_vm7 = vcmp.eq.f32.partialorder %v2099_v48, 8.507059e+37 }
 0xd5e   :  { %2226 = vmatpush.msrb.mxu0 %v2171_v6 }
 0xd60   :  { %v2555_v23 = vpop.eup %2554 }
 0xd61   :  { %v2557_v57 = vpop.eup %2556  ;;  %v2076_v11 = vmul.f32 %v2555_v23, %v2073_v59  ;;  %vm2081_vm12 = vweird.f32 %v2555_v23 }
 0xd62   :  { %v2091_v54 = vmul.f32 %v2557_v57, %v2074_v49  ;;  %vm2082_vm14 = vmor %vm2080_vm13, %vm2081_vm12  ;;  %vm2096_vm3 = vweird.f32 %v2557_v57 }
 0xd63   :  { %v2077_v53 = vsub.f32 1.0, %v2076_v11  ;;  %vm2097_vm6 = vmor %vm2095_vm4, %vm2096_vm3 }
 0xd64   :  { %v2092_v27 = vsub.f32 1.0, %v2091_v54 }
 0xd65   :  { %v2078_v35 = vmul.f32 %v2555_v23, %v2077_v53  ;;  %v4417_v53 = vld [vmem:[#allocation2_spill] sm:$0xff] }
 0xd66   :  { %v2093_v36 = vmul.f32 %v2557_v57, %v2092_v27 }
 0xd67   :  { %v2079_v50 = vadd.f32 %v2555_v23, %v2078_v35 }
 0xd68   :  { %v2094_v4 = vadd.f32 %v2557_v57, %v2093_v36 }
 0xd69   :  { %v2083_v41 = vsel %vm2082_vm14, %v2555_v23, %v2079_v50 }
 0xd6a   :  { %v2088_v40 = vsel %vm2085_vm2, %v2087_v63, %v2083_v41  ;;  %v2098_v1 = vsel %vm2097_vm6, %v2557_v57, %v2094_v4  ;;  %v4416_v57 = vld [vmem:[#allocation4_spill] sm:$0xff] }
 0xd6b   :  { %v2108_v32 = vmul.f32 %v2106_v55, %v2088_v40  ;;  %v2103_v39 = vsel %vm2100_vm7, %v2102_v25, %v2098_v1 }
 0xd6c   :  { %v2111_v44 = vsub.f32 1.0, %v2103_v39  ;;  %v2115_v30 = vmul.f32 %v2113_v15, %v2103_v39 }
 0xd6d   :  { %v2109_v29 = vadd.f32 %v2108_v32, %v4411_v38  ;;  %v2124_v38 = vrot.slane %v3755_v34, 2  ;;  %v4412_v34 = vld [vmem:[#allocation5_spill] sm:$0xff] }
 0xd6e   :  { %v4413_v26 = vrot.slane %v4412_v34, 6 }
 0xd6f   :  { %2558 = vtanh.f32 %v2109_v29  ;;  %v2138_v42 = vsel %vm2128_vm15, %v3980_v10, %v2124_v38 }
 0xd70   :  { %v2140_v2 = vsel %vm2131_vm1, %v2138_v42, %v4413_v26 }
 0xd71   :  { %v2142_v10 = vsel %vm2134_vm11, %v2140_v2, %v2126_v52 }
 0xd72   :  { %v2150_v46 = vmul.f32 0.01, %v2142_v10 }
 0xd75   :  { %v2559_v45 = vpop.eup %2558 }
 0xd76   :  { %v2112_v60 = vmul.f32 %v2559_v45, %v2111_v44 }
 0xd78   :  { %v2116_v13 = vadd.f32 %v2115_v30, %v2112_v60  ;;  %v2619_v30 = vld [vmem:[%s4284_s3] sm:$0xff] }
 0xd7a   :  { %v2118_v18 = vrot.slane %v2116_v13, 6  ;;  %v2141_v14 = vsel %vm2134_vm11, %v4183_v5, %v2116_v13  ;;  %v2280_v13 = vperm.slane %v2619_v30, 6 }
 0xd7b   :  { %vm2145_vm8 = vcmp.ge.f32.partialorder %v2141_v14, 0.0  ;;  %v2149_v56 = vmul.f32 0.01, %v2141_v14 }
 0xd7c   :  { %v2130_v7 = vsel %vm2128_vm15, %v2118_v18, %v2120_v3  ;;  %vm2146_vm15 = vcmp.ge.f32.partialorder %v2142_v10, 0.0  ;;  %v2283_v3 = vperm.slane %v2619_v30, 7 }
 0xd7d   :  { %v2153_v51 = vsel %vm2145_vm8, %v2141_v14, %v2149_v56  ;;  %v2133_v8 = vsel %vm2131_vm1, %v2130_v7, %v1992_v58  ;;  %v2154_v47 = vsel %vm2146_vm15, %v2142_v10, %v2150_v46  ;;  %v2618_v58 = vld [vmem:[%s4284_s3 + $0x8] sm:$0xff] }
 0xd7e   :  { %2207 = vmatmul.f32.gmra.mxu2 %v2153_v51  ;;  %v2136_v5 = vsel %vm2134_vm11, %v2133_v8, %v2122_v0  ;;  %v2187_v16 = vperm.slane %v2618_v58, 4 }
 0xd7f   :  { %vm2144_vm9 = vcmp.ge.f32.partialorder %v2136_v5, 0.0  ;;  %v2148_v12 = vmul.f32 0.01, %v2136_v5 }
 0xd80   :  { %v2206_v20 = vadd.f32 %v2205_v22, %v2187_v16 }
 0xd81   :  { %v2152_v37 = vsel %vm2144_vm9, %v2136_v5, %v2148_v12 }
 0xd82   :  { %2227 = vmatmul.f32.vlgmr.msrb.gmra.mxu0 %v2152_v37 }
 0xd8a   :  { %2230 = vmatmul.f32.gmra.mxu0 %v2154_v47 }
 0xdff   :  { %v2228_v19 = vpop.f32.mrf.mxu0 }
 0xe00   :  { %v2229_v59 = vadd.f32 %v2228_v19, %v2206_v20 }
 0xe01   :  { %v2208_v61 = vpop.f32.mrf.mxu2 }
 0xe02   :  { %v2234_v49 = vadd.f32 %v2229_v59, %v4415_v9  ;;  %v2209_v21 = vadd.f32 %v2208_v61, %v2187_v16 }
 0xe04   :  { %v2236_v17 = vsel %vm37_vm0, %v2234_v49, 0.0 }
 0xe05   :  { %2237 = vadd.xlane.f32.xlu1 %v2236_v17 }
 0xe07   :  { %v2231_v23 = vpop.f32.mrf.mxu0 }
 0xe08   :  { %v2232_v6 = vadd.f32 %v2231_v23, %v2209_v21 }
 0xe0a   :  { %v2235_v11 = vadd.f32 %v2232_v6, %v4416_v57 }
 0xe0c   :  { %v2239_v54 = vsel %vm37_vm0, %v2235_v11, 0.0 }
 0xe0d   :  { %2240 = vadd.xlane.f32.xlu0 %v2239_v54 }
 0xe78   :  { %v2238_v28 = vpop.xlane.xlu1 %2237 }
 0xe79   :  { %v2242_v27 = vmul.f32 %v2238_v28, %v4417_v53 }
 0xe7b   :  { %v2244_v31 = vsub.f32 %v2234_v49, %v2242_v27 }
 0xe7d   :  { %v2246_v33 = vmul.f32 %v2244_v31, %v2244_v31 }
 0xe7f   :  { %v2248_v35 = vsel %vm37_vm0, %v2246_v33, 0.0 }
 0xe80   :  { %v2241_v62 = vpop.xlane.xlu0 %2240  ;;  %2249 = vadd.xlane.f32.xlu2 %v2248_v35 }
 0xe81   :  { %v2243_v36 = vmul.f32 %v2241_v62, %v4417_v53 }
 0xe83   :  { %v2245_v50 = vsub.f32 %v2235_v11, %v2243_v36 }
 0xe85   :  { %v2247_v63 = vmul.f32 %v2245_v50, %v2245_v50 }
 0xe87   :  { %v2251_v41 = vsel %vm37_vm0, %v2247_v63, 0.0 }
 0xe88   :  { %2252 = vadd.xlane.f32.xlu1 %v2251_v41 }
 0xef3   :  { %v2250_v55 = vpop.xlane.xlu2 %2249 }
 0xef4   :  { %v2254_v40 = vmul.f32 %v2250_v55, %v4417_v53 }
 0xef6   :  { %v2256_v4 = vadd.f32 1e-05, %v2254_v40 }
 0xef8   :  { %2560 = vrsqrt.f32 %v2256_v4  ;;  %vm2264_vm11 = vweird.f32 %v2256_v4 }
 0xefb   :  { %v2253_v32 = vpop.xlane.xlu1 %2252 }
 0xefc   :  { %v2255_v24 = vmul.f32 %v2253_v32, %v4417_v53 }
 0xefe   :  { %v2561_v48 = vpop.eup %2560  ;;  %v2257_v29 = vadd.f32 1e-05, %v2255_v24 }
 0xeff   :  { %v2259_v1 = vmul.f32 %v2561_v48, %v2256_v4  ;;  %vm2265_vm1 = vweird.f32 %v2561_v48 }
 0xf00   :  { %2562 = vrsqrt.f32 %v2257_v29  ;;  %vm2266_vm10 = vmor %vm2264_vm11, %vm2265_vm1  ;;  %vm2274_vm12 = vweird.f32 %v2257_v29 }
 0xf01   :  { %v2260_v25 = vmul.f32 %v2561_v48, %v2259_v1 }
 0xf03   :  { %v2261_v39 = vmul.f32 0.5, %v2260_v25 }
 0xf05   :  { %v2262_v44 = vsub.f32 1.5, %v2261_v39 }
 0xf06   :  { %v2563_v15 = vpop.eup %2562 }
 0xf07   :  { %v2263_v45 = vmul.f32 %v2561_v48, %v2262_v44  ;;  %v2269_v60 = vmul.f32 %v2563_v15, %v2257_v29  ;;  %vm2275_vm5 = vweird.f32 %v2563_v15 }
 0xf08   :  { %vm2276_vm13 = vmor %vm2274_vm12, %vm2275_vm5 }
 0xf09   :  { %v2267_v18 = vsel %vm2266_vm10, %v2561_v48, %v2263_v45  ;;  %v2270_v14 = vmul.f32 %v2563_v15, %v2269_v60 }
 0xf0a   :  { %v2278_v38 = vmul.f32 %v2267_v18, %v2244_v31 }
 0xf0b   :  { %v2271_v56 = vmul.f32 0.5, %v2270_v14 }
 0xf0c   :  { %v2281_v0 = vmul.f32 %v2280_v13, %v2278_v38 }
 0xf0d   :  { %v2272_v7 = vsub.f32 1.5, %v2271_v56 }
 0xf0e   :  { %v2284_v42 = vadd.f32 %v2283_v3, %v2281_v0 }
 0xf0f   :  { %v2273_v51 = vmul.f32 %v2563_v15, %v2272_v7 }
 0xf10   :  { %2286 = vst.msk [vmem:[%s4289_s8] sm:$0xff] %vm37_vm0, %v2284_v42 }
 0xf11   :  { %v2277_v8 = vsel %vm2276_vm13, %v2563_v15, %v2273_v51 }
 0xf12   :  { %v2279_v5 = vmul.f32 %v2277_v8, %v2245_v50 }
 0xf14   :  { %v2282_v12 = vmul.f32 %v2280_v13, %v2279_v5 }
 0xf16   :  { %v2285_v34 = vadd.f32 %v2283_v3, %v2282_v12 }
 0xf18   :  { %2287 = vst.msk [vmem:[%s4289_s8 + $0x8] sm:$0xff] %vm37_vm0, %v2285_v34 }

</bundles_post_ra>
